<compile_context>
chip_gen: v5e
topology: v5e:2x2
jax: 0.10.0
libtpu: 0.0.40
codegen_flags: <defaults>
</compile_context>

<pallas_src>
import jax
import jax.numpy as jnp
from jax import lax
from jax.experimental import pallas as pl
from jax.experimental.pallas import tpu as pltpu

KMEANS_ITERS = 10
HIDDEN = 32
CPAD = 8          # channel padding for the stacked k-means (max C across scales)


# -----------------------------------------------------------------------------
# Fused kernel: stacked k-means (all scales) + fused discriminator + BCE.
# -----------------------------------------------------------------------------
def kmeans_loss_kernel(x_ref, valid_ref, m1_init_ref, y_ref, sel_ref,
                       w1_ref, b1_ref, w2_ref, b2_ref, out_ref):
    """
    x_ref   : (S, C, HW)  stacked / zero-padded channel maps, S = 3*B
    valid   : (S, C)      1.0 for real channels, 0.0 for padded channels
    m1_init : (S, C)      one-hot init point of cluster 1 (channel C_orig//2)
    y_ref   : (S, 1)      domain labels, repeated per scale block
    sel_ref : (S, 3)      per-scale batch-mean selector (1/B at [scale*B+b, scale])
    w1/b1/w2/b2 : fused block discriminator weights
    out_ref : (1, 3)      (Dlf, Dmf, Dsf)
    """
    x = x_ref[...]
    valid = valid_ref[...]
    s_dim, c_dim, _ = x.shape

    # Gram matrix of the C channel maps per image, computed once.  Every Lloyd
    # iteration below touches only (S, C, C)-sized data.
    g = jnp.einsum('sid,sjd->sij', x, x,
                   preferred_element_type=jnp.float32)           # (S, C, C)

    # TODO(synk): kmeans_pytorch uses random point init + tolerance-based
    # convergence; here we use deterministic init (points 0 and C//2) and a
    # fixed number of Lloyd iterations.
    ch = lax.broadcasted_iota(jnp.int32, (s_dim, c_dim), 1)
    m0 = (ch == 0).astype(jnp.float32)                           # (S, C)
    m1 = m1_init_ref[...]                                        # (S, C)
    n0 = jnp.sum(m0, axis=-1, keepdims=True)                     # (S, 1) == 1
    n1 = jnp.sum(m1, axis=-1, keepdims=True)                     # (S, 1) == 1

    def assign(m0, n0, m1, n1):
        # x_i.c_k = (G m_k)_i / n_k   and   ||c_k||^2 = m_k^T G m_k / n_k^2
        p0 = jnp.sum(g * m0[:, None, :], axis=-1)                # (S, C)
        p1 = jnp.sum(g * m1[:, None, :], axis=-1)                # (S, C)
        q0 = jnp.sum(m0 * p0, axis=-1, keepdims=True)            # (S, 1)
        q1 = jnp.sum(m1 * p1, axis=-1, keepdims=True)            # (S, 1)
        # d1 < d0  <=>  2 x.(c0-c1) + ||c1||^2 - ||c0||^2 < 0, multiplied
        # through by n0^2 * n1^2 (> 0: counts never drop below 1).
        score = (2.0 * (n0 * n1 * n1) * p0 - 2.0 * (n0 * n0 * n1) * p1
                 + (n0 * n0) * q1 - (n1 * n1) * q0)              # (S, C)
        a1 = (score < 0.0).astype(jnp.float32) * valid           # (S, C)
        a0 = valid - a1
        k1 = jnp.sum(a1, axis=-1, keepdims=True)                 # (S, 1)
        k0 = jnp.sum(a0, axis=-1, keepdims=True)                 # (S, 1)
        return a0, k0, a1, k1

    for _ in range(KMEANS_ITERS):                                # static unroll
        a0, k0, a1, k1 = assign(m0, n0, m1, n1)
        # keep old cluster membership/count if the new cluster is empty
        m0 = jnp.where(k0 > 0.0, a0, m0)
        n0 = jnp.where(k0 > 0.0, k0, n0)
        m1 = jnp.where(k1 > 0.0, a1, m1)
        n1 = jnp.where(k1 > 0.0, k1, n1)

    # Final assignment for the majority vote (argmax(bincount); tie -> cluster
    # 0); the object center itself uses the iteration-10 cluster state.
    _, k0, _, k1 = assign(m0, n0, m1, n1)
    pick1 = k1 > k0                                              # (S, 1)
    m_obj = jnp.where(pick1, m1, m0)                             # (S, C)
    n_obj = jnp.where(pick1, n1, n0)                             # (S, 1)
    # Materialize the chosen center once: the only HW-wide k-means op left.
    obj = jnp.sum(m_obj[:, :, None] * x, axis=1) / n_obj         # (S, HW)

    # Substitute fused 2-layer discriminator (block weights for all scales) +
    # numerically stable BCE-with-logits; invalid cross-scale logit columns are
    # zeroed by the selection mask.
    h = jnp.dot(obj, w1_ref[...], preferred_element_type=jnp.float32) + b1_ref[...]
    h = jnp.maximum(h, 0.0)                                      # (S, 3*HIDDEN)
    z = jnp.dot(h, w2_ref[...], preferred_element_type=jnp.float32) + b2_ref[...]
    y = y_ref[...]                                               # (S, 1)
    loss = jnp.maximum(z, 0.0) - z * y + jnp.log(1.0 + jnp.exp(-jnp.abs(z)))
    out_ref[...] = jnp.sum(loss * sel_ref[...], axis=0, keepdims=True)   # (1, 3)


# -----------------------------------------------------------------------------
# Parameter setup (deterministic) + full forward.
# -----------------------------------------------------------------------------
def make_disc_params(key, in_dim, hidden=HIDDEN):
    # TODO(synk): `no_channel_disc` is not defined by the reference module; we
    # substitute a deterministic 2-layer MLP discriminator (H*W -> 32 -> 1).
    k1, k2 = jax.random.split(key)
    w1 = jax.random.normal(k1, (in_dim, hidden), jnp.float32) * 0.05
    b1 = jnp.zeros((1, hidden), jnp.float32)
    w2 = jax.random.normal(k2, (hidden, 1), jnp.float32) * 0.05
    b2 = jnp.zeros((1, 1), jnp.float32)
    return (w1, b1, w2, b2)


def fuse_disc_params(param_list, hw_pad, hidden=HIDDEN):
    """Block layer-1 weight (hw_pad, 3*hidden) + block-diagonal layer-2 weight
    (3*hidden, 3) so all three discriminators run as two MXU matmuls."""
    n = len(param_list)
    w1_all = jnp.zeros((hw_pad, n * hidden), jnp.float32)
    w2_all = jnp.zeros((n * hidden, n), jnp.float32)
    b1_parts, b2_parts = [], []
    for i, (w1, b1, w2, b2) in enumerate(param_list):
        in_dim = w1.shape[0]
        w1_all = w1_all.at[:in_dim, i * hidden:(i + 1) * hidden].set(w1)
        w2_all = w2_all.at[i * hidden:(i + 1) * hidden, i:i + 1].set(w2)
        b1_parts.append(b1)
        b2_parts.append(b2)
    b1_all = jnp.concatenate(b1_parts, axis=1)                   # (1, 3*hidden)
    b2_all = jnp.concatenate(b2_parts, axis=1)                   # (1, 3)
    return w1_all, b1_all, w2_all, b2_all


def kmeans_loss_forward(lf, mf, sf, da_preds, da_images, da_labels, params):
    # da_preds / da_images are unused by the reference forward as well.
    del da_preds, da_images
    feats = (lf, mf, sf)
    b = lf.shape[0]
    hw_pad = max(f.shape[2] * f.shape[3] for f in feats)
    hw_pad = ((hw_pad + 127) // 128) * 128

    # Stack the three scales into one (3B, CPAD, hw_pad) pseudo-batch so a
    # single Lloyd chain covers all of them (padded channels are masked out).
    x_parts, valid_parts, m1_parts = [], [], []
    for f in feats:
        _, c, h, w = f.shape
        x = f.reshape(b, c, h * w).astype(jnp.float32)
        x_parts.append(jnp.pad(x, ((0, 0), (0, CPAD - c), (0, hw_pad - h * w))))
        v = (jnp.arange(CPAD) < c).astype(jnp.float32)
        m1 = (jnp.arange(CPAD) == (c // 2)).astype(jnp.float32)
        valid_parts.append(jnp.tile(v[None, :], (b, 1)))
        m1_parts.append(jnp.tile(m1[None, :], (b, 1)))
    x_stacked = jnp.concatenate(x_parts, axis=0)                 # (3B, 8, hw_pad)
    valid = jnp.concatenate(valid_parts, axis=0)                 # (3B, 8)
    m1_init = jnp.concatenate(m1_parts, axis=0)                  # (3B, 8)

    y = da_labels.astype(jnp.float32).reshape(b, 1)
    y_stacked = jnp.tile(y, (3, 1))                              # (3B, 1)
    sel = jnp.repeat(jnp.eye(3, dtype=jnp.float32), b, axis=0) / float(b)  # (3B, 3)

    w1_all, b1_all, w2_all, b2_all = fuse_disc_params(
        [params["lf"], params["mf"], params["sf"]], hw_pad)

    vmem = pl.BlockSpec(memory_space=pltpu.MemorySpace.VMEM)
    out = pl.pallas_call(
        kmeans_loss_kernel,
        out_shape=jax.ShapeDtypeStruct((1, 3), jnp.float32),
        in_specs=[vmem] * 9,
        out_specs=vmem,
    )(x_stacked, valid, m1_init, y_stacked, sel, w1_all, b1_all, w2_all, b2_all)
    return out[0, 0], out[0, 1], out[0, 2]                       # (Dlf, Dmf, Dsf)


if __name__ == "__main__":
    key = jax.random.PRNGKey(0)
    k_lf, k_mf, k_sf, k_lbl, k_p1, k_p2, k_p3 = jax.random.split(key, 7)

    # NCHW feature maps at three scales.
    lf = jax.random.normal(k_lf, (2, 4, 16, 16), jnp.float32)
    mf = jax.random.normal(k_mf, (2, 6, 8, 8), jnp.float32)
    sf = jax.random.normal(k_sf, (2, 8, 8, 8), jnp.float32)

    da_labels = jnp.array([0.0, 1.0], jnp.float32)        # domain labels
    da_preds = jnp.zeros((2, 1), jnp.float32)              # unused
    da_images = jnp.zeros((2, 3, 16, 16), jnp.float32)     # unused

    params = {
        "lf": make_disc_params(k_p1, 16 * 16),
        "mf": make_disc_params(k_p2, 8 * 8),
        "sf": make_disc_params(k_p3, 8 * 8),
    }

    d_lf, d_mf, d_sf = kmeans_loss_forward(
        lf, mf, sf, da_preds, da_images, da_labels, params)
    jax.block_until_ready((d_lf, d_mf, d_sf))
    print("KERNEL_OK")
</pallas_src>

<mosaic_0001>
module attributes {stable_mosaic.version = 11 : i64} {
  func.func @kmeans_loss_kernel(%arg0: memref<6x8x256xf32, #tpu.memory_space<vmem>>, %arg1: memref<6x8xf32, #tpu.memory_space<vmem>>, %arg2: memref<6x8xf32, #tpu.memory_space<vmem>>, %arg3: memref<6x1xf32, #tpu.memory_space<vmem>>, %arg4: memref<6x3xf32, #tpu.memory_space<vmem>>, %arg5: memref<256x96xf32, #tpu.memory_space<vmem>>, %arg6: memref<1x96xf32, #tpu.memory_space<vmem>>, %arg7: memref<96x3xf32, #tpu.memory_space<vmem>>, %arg8: memref<1x3xf32, #tpu.memory_space<vmem>>, %arg9: memref<1x3xf32, #tpu.memory_space<vmem>>) attributes {dimension_semantics = [], scalar_prefetch = 0 : i64, scratch_operands = 0 : i64, tpu.core_type = #tpu.core_type<tc>} {
    %c0 = arith.constant 0 : index
    %c0_0 = arith.constant 0 : index
    %c0_1 = arith.constant 0 : index
    %0 = vector.load %arg0[%c0, %c0_0, %c0_1] : memref<6x8x256xf32, #tpu.memory_space<vmem>>, vector<6x8x256xf32>
    %c0_2 = arith.constant 0 : index
    %c0_3 = arith.constant 0 : index
    %1 = vector.load %arg1[%c0_2, %c0_3] : memref<6x8xf32, #tpu.memory_space<vmem>>, vector<6x8xf32>
    "tpu.trace_start"() <{level = 10 : i32, message = "sid,sjd->sij"}> : () -> ()
    %cst = arith.constant dense<0.000000e+00> : vector<6x8x8xf32>
    %2 = tpu.matmul %0, %0, %cst {dimension_numbers = #tpu.dot_dimension_numbers<[2], [2], [1], [1], [0, 0, 0, 1, 1, 1], [0], [0]>} : vector<6x8x256xf32>, vector<6x8x256xf32>, vector<6x8x8xf32> -> vector<6x8x8xf32>
    "tpu.trace_stop"() : () -> ()
    %3 = tpu.iota {dimensions = array<i32: 1>} : vector<6x8xi32>
    %c0_i32 = arith.constant 0 : i32
    %4 = vector.broadcast %c0_i32 : i32 to vector<6x8xi32>
    %5 = arith.cmpi eq, %3, %4 : vector<6x8xi32>
    %6 = arith.extui %5 : vector<6x8xi1> to vector<6x8xi32>
    %7 = arith.sitofp %6 : vector<6x8xi32> to vector<6x8xf32>
    %c0_4 = arith.constant 0 : index
    %c0_5 = arith.constant 0 : index
    %8 = vector.load %arg2[%c0_4, %c0_5] : memref<6x8xf32, #tpu.memory_space<vmem>>, vector<6x8xf32>
    %cst_6 = arith.constant dense<0.000000e+00> : vector<6xf32>
    %9 = vector.multi_reduction <add>, %7, %cst_6 [1] : vector<6x8xf32> to vector<6xf32>
    %10 = vector.shape_cast %9 : vector<6xf32> to vector<6x1xf32>
    %cst_7 = arith.constant dense<0.000000e+00> : vector<6xf32>
    %11 = vector.multi_reduction <add>, %8, %cst_7 [1] : vector<6x8xf32> to vector<6xf32>
    %12 = vector.shape_cast %11 : vector<6xf32> to vector<6x1xf32>
    %13 = vector.shape_cast %7 : vector<6x8xf32> to vector<6x1x8xf32>
    %14 = vector.broadcast %13 : vector<6x1x8xf32> to vector<6x8x8xf32>
    %15 = arith.mulf %2, %14 : vector<6x8x8xf32>
    %cst_8 = arith.constant dense<0.000000e+00> : vector<6x8xf32>
    %16 = vector.multi_reduction <add>, %15, %cst_8 [2] : vector<6x8x8xf32> to vector<6x8xf32>
    %17 = vector.shape_cast %8 : vector<6x8xf32> to vector<6x1x8xf32>
    %18 = vector.broadcast %17 : vector<6x1x8xf32> to vector<6x8x8xf32>
    %19 = arith.mulf %2, %18 : vector<6x8x8xf32>
    %cst_9 = arith.constant dense<0.000000e+00> : vector<6x8xf32>
    %20 = vector.multi_reduction <add>, %19, %cst_9 [2] : vector<6x8x8xf32> to vector<6x8xf32>
    %21 = arith.mulf %7, %16 : vector<6x8xf32>
    %cst_10 = arith.constant dense<0.000000e+00> : vector<6xf32>
    %22 = vector.multi_reduction <add>, %21, %cst_10 [1] : vector<6x8xf32> to vector<6xf32>
    %23 = vector.shape_cast %22 : vector<6xf32> to vector<6x1xf32>
    %24 = arith.mulf %8, %20 : vector<6x8xf32>
    %cst_11 = arith.constant dense<0.000000e+00> : vector<6xf32>
    %25 = vector.multi_reduction <add>, %24, %cst_11 [1] : vector<6x8xf32> to vector<6xf32>
    %26 = vector.shape_cast %25 : vector<6xf32> to vector<6x1xf32>
    %27 = arith.mulf %10, %12 : vector<6x1xf32>
    %28 = arith.mulf %27, %12 : vector<6x1xf32>
    %cst_12 = arith.constant 2.000000e+00 : f32
    %29 = vector.broadcast %cst_12 : f32 to vector<6x1xf32>
    %30 = arith.mulf %29, %28 : vector<6x1xf32>
    %31 = vector.broadcast %30 : vector<6x1xf32> to vector<6x8xf32>
    %32 = arith.mulf %31, %16 : vector<6x8xf32>
    %33 = arith.mulf %10, %10 : vector<6x1xf32>
    %34 = arith.mulf %33, %12 : vector<6x1xf32>
    %cst_13 = arith.constant 2.000000e+00 : f32
    %35 = vector.broadcast %cst_13 : f32 to vector<6x1xf32>
    %36 = arith.mulf %35, %34 : vector<6x1xf32>
    %37 = vector.broadcast %36 : vector<6x1xf32> to vector<6x8xf32>
    %38 = arith.mulf %37, %20 : vector<6x8xf32>
    %39 = arith.subf %32, %38 : vector<6x8xf32>
    %40 = arith.mulf %10, %10 : vector<6x1xf32>
    %41 = arith.mulf %40, %26 : vector<6x1xf32>
    %42 = vector.broadcast %41 : vector<6x1xf32> to vector<6x8xf32>
    %43 = arith.addf %39, %42 : vector<6x8xf32>
    %44 = arith.mulf %12, %12 : vector<6x1xf32>
    %45 = arith.mulf %44, %23 : vector<6x1xf32>
    %46 = vector.broadcast %45 : vector<6x1xf32> to vector<6x8xf32>
    %47 = arith.subf %43, %46 : vector<6x8xf32>
    %cst_14 = arith.constant 0.000000e+00 : f32
    %48 = vector.broadcast %cst_14 : f32 to vector<6x8xf32>
    %49 = arith.cmpf olt, %47, %48 : vector<6x8xf32>
    %50 = arith.extui %49 : vector<6x8xi1> to vector<6x8xi32>
    %51 = arith.sitofp %50 : vector<6x8xi32> to vector<6x8xf32>
    %52 = arith.mulf %51, %1 : vector<6x8xf32>
    %53 = arith.subf %1, %52 : vector<6x8xf32>
    %cst_15 = arith.constant dense<0.000000e+00> : vector<6xf32>
    %54 = vector.multi_reduction <add>, %52, %cst_15 [1] : vector<6x8xf32> to vector<6xf32>
    %55 = vector.shape_cast %54 : vector<6xf32> to vector<6x1xf32>
    %cst_16 = arith.constant dense<0.000000e+00> : vector<6xf32>
    %56 = vector.multi_reduction <add>, %53, %cst_16 [1] : vector<6x8xf32> to vector<6xf32>
    %57 = vector.shape_cast %56 : vector<6xf32> to vector<6x1xf32>
    %cst_17 = arith.constant 0.000000e+00 : f32
    %58 = vector.broadcast %cst_17 : f32 to vector<6x1xf32>
    %59 = arith.cmpf ogt, %57, %58 : vector<6x1xf32>
    %60 = vector.shape_cast %59 : vector<6x1xi1> to vector<6x1xi1>
    %61 = vector.broadcast %60 : vector<6x1xi1> to vector<6x8xi1>
    %62 = arith.select %61, %53, %7 : vector<6x8xi1>, vector<6x8xf32>
    %cst_18 = arith.constant 0.000000e+00 : f32
    %63 = vector.broadcast %cst_18 : f32 to vector<6x1xf32>
    %64 = arith.cmpf ogt, %57, %63 : vector<6x1xf32>
    %65 = arith.select %64, %57, %10 : vector<6x1xi1>, vector<6x1xf32>
    %cst_19 = arith.constant 0.000000e+00 : f32
    %66 = vector.broadcast %cst_19 : f32 to vector<6x1xf32>
    %67 = arith.cmpf ogt, %55, %66 : vector<6x1xf32>
    %68 = vector.shape_cast %67 : vector<6x1xi1> to vector<6x1xi1>
    %69 = vector.broadcast %68 : vector<6x1xi1> to vector<6x8xi1>
    %70 = arith.select %69, %52, %8 : vector<6x8xi1>, vector<6x8xf32>
    %cst_20 = arith.constant 0.000000e+00 : f32
    %71 = vector.broadcast %cst_20 : f32 to vector<6x1xf32>
    %72 = arith.cmpf ogt, %55, %71 : vector<6x1xf32>
    %73 = arith.select %72, %55, %12 : vector<6x1xi1>, vector<6x1xf32>
    %74 = vector.shape_cast %62 : vector<6x8xf32> to vector<6x1x8xf32>
    %75 = vector.broadcast %74 : vector<6x1x8xf32> to vector<6x8x8xf32>
    %76 = arith.mulf %2, %75 : vector<6x8x8xf32>
    %cst_21 = arith.constant dense<0.000000e+00> : vector<6x8xf32>
    %77 = vector.multi_reduction <add>, %76, %cst_21 [2] : vector<6x8x8xf32> to vector<6x8xf32>
    %78 = vector.shape_cast %70 : vector<6x8xf32> to vector<6x1x8xf32>
    %79 = vector.broadcast %78 : vector<6x1x8xf32> to vector<6x8x8xf32>
    %80 = arith.mulf %2, %79 : vector<6x8x8xf32>
    %cst_22 = arith.constant dense<0.000000e+00> : vector<6x8xf32>
    %81 = vector.multi_reduction <add>, %80, %cst_22 [2] : vector<6x8x8xf32> to vector<6x8xf32>
    %82 = arith.mulf %62, %77 : vector<6x8xf32>
    %cst_23 = arith.constant dense<0.000000e+00> : vector<6xf32>
    %83 = vector.multi_reduction <add>, %82, %cst_23 [1] : vector<6x8xf32> to vector<6xf32>
    %84 = vector.shape_cast %83 : vector<6xf32> to vector<6x1xf32>
    %85 = arith.mulf %70, %81 : vector<6x8xf32>
    %cst_24 = arith.constant dense<0.000000e+00> : vector<6xf32>
    %86 = vector.multi_reduction <add>, %85, %cst_24 [1] : vector<6x8xf32> to vector<6xf32>
    %87 = vector.shape_cast %86 : vector<6xf32> to vector<6x1xf32>
    %88 = arith.mulf %65, %73 : vector<6x1xf32>
    %89 = arith.mulf %88, %73 : vector<6x1xf32>
    %cst_25 = arith.constant 2.000000e+00 : f32
    %90 = vector.broadcast %cst_25 : f32 to vector<6x1xf32>
    %91 = arith.mulf %90, %89 : vector<6x1xf32>
    %92 = vector.broadcast %91 : vector<6x1xf32> to vector<6x8xf32>
    %93 = arith.mulf %92, %77 : vector<6x8xf32>
    %94 = arith.mulf %65, %65 : vector<6x1xf32>
    %95 = arith.mulf %94, %73 : vector<6x1xf32>
    %cst_26 = arith.constant 2.000000e+00 : f32
    %96 = vector.broadcast %cst_26 : f32 to vector<6x1xf32>
    %97 = arith.mulf %96, %95 : vector<6x1xf32>
    %98 = vector.broadcast %97 : vector<6x1xf32> to vector<6x8xf32>
    %99 = arith.mulf %98, %81 : vector<6x8xf32>
    %100 = arith.subf %93, %99 : vector<6x8xf32>
    %101 = arith.mulf %65, %65 : vector<6x1xf32>
    %102 = arith.mulf %101, %87 : vector<6x1xf32>
    %103 = vector.broadcast %102 : vector<6x1xf32> to vector<6x8xf32>
    %104 = arith.addf %100, %103 : vector<6x8xf32>
    %105 = arith.mulf %73, %73 : vector<6x1xf32>
    %106 = arith.mulf %105, %84 : vector<6x1xf32>
    %107 = vector.broadcast %106 : vector<6x1xf32> to vector<6x8xf32>
    %108 = arith.subf %104, %107 : vector<6x8xf32>
    %cst_27 = arith.constant 0.000000e+00 : f32
    %109 = vector.broadcast %cst_27 : f32 to vector<6x8xf32>
    %110 = arith.cmpf olt, %108, %109 : vector<6x8xf32>
    %111 = arith.extui %110 : vector<6x8xi1> to vector<6x8xi32>
    %112 = arith.sitofp %111 : vector<6x8xi32> to vector<6x8xf32>
    %113 = arith.mulf %112, %1 : vector<6x8xf32>
    %114 = arith.subf %1, %113 : vector<6x8xf32>
    %cst_28 = arith.constant dense<0.000000e+00> : vector<6xf32>
    %115 = vector.multi_reduction <add>, %113, %cst_28 [1] : vector<6x8xf32> to vector<6xf32>
    %116 = vector.shape_cast %115 : vector<6xf32> to vector<6x1xf32>
    %cst_29 = arith.constant dense<0.000000e+00> : vector<6xf32>
    %117 = vector.multi_reduction <add>, %114, %cst_29 [1] : vector<6x8xf32> to vector<6xf32>
    %118 = vector.shape_cast %117 : vector<6xf32> to vector<6x1xf32>
    %cst_30 = arith.constant 0.000000e+00 : f32
    %119 = vector.broadcast %cst_30 : f32 to vector<6x1xf32>
    %120 = arith.cmpf ogt, %118, %119 : vector<6x1xf32>
    %121 = vector.shape_cast %120 : vector<6x1xi1> to vector<6x1xi1>
    %122 = vector.broadcast %121 : vector<6x1xi1> to vector<6x8xi1>
    %123 = arith.select %122, %114, %62 : vector<6x8xi1>, vector<6x8xf32>
    %cst_31 = arith.constant 0.000000e+00 : f32
    %124 = vector.broadcast %cst_31 : f32 to vector<6x1xf32>
    %125 = arith.cmpf ogt, %118, %124 : vector<6x1xf32>
    %126 = arith.select %125, %118, %65 : vector<6x1xi1>, vector<6x1xf32>
    %cst_32 = arith.constant 0.000000e+00 : f32
    %127 = vector.broadcast %cst_32 : f32 to vector<6x1xf32>
    %128 = arith.cmpf ogt, %116, %127 : vector<6x1xf32>
    %129 = vector.shape_cast %128 : vector<6x1xi1> to vector<6x1xi1>
    %130 = vector.broadcast %129 : vector<6x1xi1> to vector<6x8xi1>
    %131 = arith.select %130, %113, %70 : vector<6x8xi1>, vector<6x8xf32>
    %cst_33 = arith.constant 0.000000e+00 : f32
    %132 = vector.broadcast %cst_33 : f32 to vector<6x1xf32>
    %133 = arith.cmpf ogt, %116, %132 : vector<6x1xf32>
    %134 = arith.select %133, %116, %73 : vector<6x1xi1>, vector<6x1xf32>
    %135 = vector.shape_cast %123 : vector<6x8xf32> to vector<6x1x8xf32>
    %136 = vector.broadcast %135 : vector<6x1x8xf32> to vector<6x8x8xf32>
    %137 = arith.mulf %2, %136 : vector<6x8x8xf32>
    %cst_34 = arith.constant dense<0.000000e+00> : vector<6x8xf32>
    %138 = vector.multi_reduction <add>, %137, %cst_34 [2] : vector<6x8x8xf32> to vector<6x8xf32>
    %139 = vector.shape_cast %131 : vector<6x8xf32> to vector<6x1x8xf32>
    %140 = vector.broadcast %139 : vector<6x1x8xf32> to vector<6x8x8xf32>
    %141 = arith.mulf %2, %140 : vector<6x8x8xf32>
    %cst_35 = arith.constant dense<0.000000e+00> : vector<6x8xf32>
    %142 = vector.multi_reduction <add>, %141, %cst_35 [2] : vector<6x8x8xf32> to vector<6x8xf32>
    %143 = arith.mulf %123, %138 : vector<6x8xf32>
    %cst_36 = arith.constant dense<0.000000e+00> : vector<6xf32>
    %144 = vector.multi_reduction <add>, %143, %cst_36 [1] : vector<6x8xf32> to vector<6xf32>
    %145 = vector.shape_cast %144 : vector<6xf32> to vector<6x1xf32>
    %146 = arith.mulf %131, %142 : vector<6x8xf32>
    %cst_37 = arith.constant dense<0.000000e+00> : vector<6xf32>
    %147 = vector.multi_reduction <add>, %146, %cst_37 [1] : vector<6x8xf32> to vector<6xf32>
    %148 = vector.shape_cast %147 : vector<6xf32> to vector<6x1xf32>
    %149 = arith.mulf %126, %134 : vector<6x1xf32>
    %150 = arith.mulf %149, %134 : vector<6x1xf32>
    %cst_38 = arith.constant 2.000000e+00 : f32
    %151 = vector.broadcast %cst_38 : f32 to vector<6x1xf32>
    %152 = arith.mulf %151, %150 : vector<6x1xf32>
    %153 = vector.broadcast %152 : vector<6x1xf32> to vector<6x8xf32>
    %154 = arith.mulf %153, %138 : vector<6x8xf32>
    %155 = arith.mulf %126, %126 : vector<6x1xf32>
    %156 = arith.mulf %155, %134 : vector<6x1xf32>
    %cst_39 = arith.constant 2.000000e+00 : f32
    %157 = vector.broadcast %cst_39 : f32 to vector<6x1xf32>
    %158 = arith.mulf %157, %156 : vector<6x1xf32>
    %159 = vector.broadcast %158 : vector<6x1xf32> to vector<6x8xf32>
    %160 = arith.mulf %159, %142 : vector<6x8xf32>
    %161 = arith.subf %154, %160 : vector<6x8xf32>
    %162 = arith.mulf %126, %126 : vector<6x1xf32>
    %163 = arith.mulf %162, %148 : vector<6x1xf32>
    %164 = vector.broadcast %163 : vector<6x1xf32> to vector<6x8xf32>
    %165 = arith.addf %161, %164 : vector<6x8xf32>
    %166 = arith.mulf %134, %134 : vector<6x1xf32>
    %167 = arith.mulf %166, %145 : vector<6x1xf32>
    %168 = vector.broadcast %167 : vector<6x1xf32> to vector<6x8xf32>
    %169 = arith.subf %165, %168 : vector<6x8xf32>
    %cst_40 = arith.constant 0.000000e+00 : f32
    %170 = vector.broadcast %cst_40 : f32 to vector<6x8xf32>
    %171 = arith.cmpf olt, %169, %170 : vector<6x8xf32>
    %172 = arith.extui %171 : vector<6x8xi1> to vector<6x8xi32>
    %173 = arith.sitofp %172 : vector<6x8xi32> to vector<6x8xf32>
    %174 = arith.mulf %173, %1 : vector<6x8xf32>
    %175 = arith.subf %1, %174 : vector<6x8xf32>
    %cst_41 = arith.constant dense<0.000000e+00> : vector<6xf32>
    %176 = vector.multi_reduction <add>, %174, %cst_41 [1] : vector<6x8xf32> to vector<6xf32>
    %177 = vector.shape_cast %176 : vector<6xf32> to vector<6x1xf32>
    %cst_42 = arith.constant dense<0.000000e+00> : vector<6xf32>
    %178 = vector.multi_reduction <add>, %175, %cst_42 [1] : vector<6x8xf32> to vector<6xf32>
    %179 = vector.shape_cast %178 : vector<6xf32> to vector<6x1xf32>
    %cst_43 = arith.constant 0.000000e+00 : f32
    %180 = vector.broadcast %cst_43 : f32 to vector<6x1xf32>
    %181 = arith.cmpf ogt, %179, %180 : vector<6x1xf32>
    %182 = vector.shape_cast %181 : vector<6x1xi1> to vector<6x1xi1>
    %183 = vector.broadcast %182 : vector<6x1xi1> to vector<6x8xi1>
    %184 = arith.select %183, %175, %123 : vector<6x8xi1>, vector<6x8xf32>
    %cst_44 = arith.constant 0.000000e+00 : f32
    %185 = vector.broadcast %cst_44 : f32 to vector<6x1xf32>
    %186 = arith.cmpf ogt, %179, %185 : vector<6x1xf32>
    %187 = arith.select %186, %179, %126 : vector<6x1xi1>, vector<6x1xf32>
    %cst_45 = arith.constant 0.000000e+00 : f32
    %188 = vector.broadcast %cst_45 : f32 to vector<6x1xf32>
    %189 = arith.cmpf ogt, %177, %188 : vector<6x1xf32>
    %190 = vector.shape_cast %189 : vector<6x1xi1> to vector<6x1xi1>
    %191 = vector.broadcast %190 : vector<6x1xi1> to vector<6x8xi1>
    %192 = arith.select %191, %174, %131 : vector<6x8xi1>, vector<6x8xf32>
    %cst_46 = arith.constant 0.000000e+00 : f32
    %193 = vector.broadcast %cst_46 : f32 to vector<6x1xf32>
    %194 = arith.cmpf ogt, %177, %193 : vector<6x1xf32>
    %195 = arith.select %194, %177, %134 : vector<6x1xi1>, vector<6x1xf32>
    %196 = vector.shape_cast %184 : vector<6x8xf32> to vector<6x1x8xf32>
    %197 = vector.broadcast %196 : vector<6x1x8xf32> to vector<6x8x8xf32>
    %198 = arith.mulf %2, %197 : vector<6x8x8xf32>
    %cst_47 = arith.constant dense<0.000000e+00> : vector<6x8xf32>
    %199 = vector.multi_reduction <add>, %198, %cst_47 [2] : vector<6x8x8xf32> to vector<6x8xf32>
    %200 = vector.shape_cast %192 : vector<6x8xf32> to vector<6x1x8xf32>
    %201 = vector.broadcast %200 : vector<6x1x8xf32> to vector<6x8x8xf32>
    %202 = arith.mulf %2, %201 : vector<6x8x8xf32>
    %cst_48 = arith.constant dense<0.000000e+00> : vector<6x8xf32>
    %203 = vector.multi_reduction <add>, %202, %cst_48 [2] : vector<6x8x8xf32> to vector<6x8xf32>
    %204 = arith.mulf %184, %199 : vector<6x8xf32>
    %cst_49 = arith.constant dense<0.000000e+00> : vector<6xf32>
    %205 = vector.multi_reduction <add>, %204, %cst_49 [1] : vector<6x8xf32> to vector<6xf32>
    %206 = vector.shape_cast %205 : vector<6xf32> to vector<6x1xf32>
    %207 = arith.mulf %192, %203 : vector<6x8xf32>
    %cst_50 = arith.constant dense<0.000000e+00> : vector<6xf32>
    %208 = vector.multi_reduction <add>, %207, %cst_50 [1] : vector<6x8xf32> to vector<6xf32>
    %209 = vector.shape_cast %208 : vector<6xf32> to vector<6x1xf32>
    %210 = arith.mulf %187, %195 : vector<6x1xf32>
    %211 = arith.mulf %210, %195 : vector<6x1xf32>
    %cst_51 = arith.constant 2.000000e+00 : f32
    %212 = vector.broadcast %cst_51 : f32 to vector<6x1xf32>
    %213 = arith.mulf %212, %211 : vector<6x1xf32>
    %214 = vector.broadcast %213 : vector<6x1xf32> to vector<6x8xf32>
    %215 = arith.mulf %214, %199 : vector<6x8xf32>
    %216 = arith.mulf %187, %187 : vector<6x1xf32>
    %217 = arith.mulf %216, %195 : vector<6x1xf32>
    %cst_52 = arith.constant 2.000000e+00 : f32
    %218 = vector.broadcast %cst_52 : f32 to vector<6x1xf32>
    %219 = arith.mulf %218, %217 : vector<6x1xf32>
    %220 = vector.broadcast %219 : vector<6x1xf32> to vector<6x8xf32>
    %221 = arith.mulf %220, %203 : vector<6x8xf32>
    %222 = arith.subf %215, %221 : vector<6x8xf32>
    %223 = arith.mulf %187, %187 : vector<6x1xf32>
    %224 = arith.mulf %223, %209 : vector<6x1xf32>
    %225 = vector.broadcast %224 : vector<6x1xf32> to vector<6x8xf32>
    %226 = arith.addf %222, %225 : vector<6x8xf32>
    %227 = arith.mulf %195, %195 : vector<6x1xf32>
    %228 = arith.mulf %227, %206 : vector<6x1xf32>
    %229 = vector.broadcast %228 : vector<6x1xf32> to vector<6x8xf32>
    %230 = arith.subf %226, %229 : vector<6x8xf32>
    %cst_53 = arith.constant 0.000000e+00 : f32
    %231 = vector.broadcast %cst_53 : f32 to vector<6x8xf32>
    %232 = arith.cmpf olt, %230, %231 : vector<6x8xf32>
    %233 = arith.extui %232 : vector<6x8xi1> to vector<6x8xi32>
    %234 = arith.sitofp %233 : vector<6x8xi32> to vector<6x8xf32>
    %235 = arith.mulf %234, %1 : vector<6x8xf32>
    %236 = arith.subf %1, %235 : vector<6x8xf32>
    %cst_54 = arith.constant dense<0.000000e+00> : vector<6xf32>
    %237 = vector.multi_reduction <add>, %235, %cst_54 [1] : vector<6x8xf32> to vector<6xf32>
    %238 = vector.shape_cast %237 : vector<6xf32> to vector<6x1xf32>
    %cst_55 = arith.constant dense<0.000000e+00> : vector<6xf32>
    %239 = vector.multi_reduction <add>, %236, %cst_55 [1] : vector<6x8xf32> to vector<6xf32>
    %240 = vector.shape_cast %239 : vector<6xf32> to vector<6x1xf32>
    %cst_56 = arith.constant 0.000000e+00 : f32
    %241 = vector.broadcast %cst_56 : f32 to vector<6x1xf32>
    %242 = arith.cmpf ogt, %240, %241 : vector<6x1xf32>
    %243 = vector.shape_cast %242 : vector<6x1xi1> to vector<6x1xi1>
    %244 = vector.broadcast %243 : vector<6x1xi1> to vector<6x8xi1>
    %245 = arith.select %244, %236, %184 : vector<6x8xi1>, vector<6x8xf32>
    %cst_57 = arith.constant 0.000000e+00 : f32
    %246 = vector.broadcast %cst_57 : f32 to vector<6x1xf32>
    %247 = arith.cmpf ogt, %240, %246 : vector<6x1xf32>
    %248 = arith.select %247, %240, %187 : vector<6x1xi1>, vector<6x1xf32>
    %cst_58 = arith.constant 0.000000e+00 : f32
    %249 = vector.broadcast %cst_58 : f32 to vector<6x1xf32>
    %250 = arith.cmpf ogt, %238, %249 : vector<6x1xf32>
    %251 = vector.shape_cast %250 : vector<6x1xi1> to vector<6x1xi1>
    %252 = vector.broadcast %251 : vector<6x1xi1> to vector<6x8xi1>
    %253 = arith.select %252, %235, %192 : vector<6x8xi1>, vector<6x8xf32>
    %cst_59 = arith.constant 0.000000e+00 : f32
    %254 = vector.broadcast %cst_59 : f32 to vector<6x1xf32>
    %255 = arith.cmpf ogt, %238, %254 : vector<6x1xf32>
    %256 = arith.select %255, %238, %195 : vector<6x1xi1>, vector<6x1xf32>
    %257 = vector.shape_cast %245 : vector<6x8xf32> to vector<6x1x8xf32>
    %258 = vector.broadcast %257 : vector<6x1x8xf32> to vector<6x8x8xf32>
    %259 = arith.mulf %2, %258 : vector<6x8x8xf32>
    %cst_60 = arith.constant dense<0.000000e+00> : vector<6x8xf32>
    %260 = vector.multi_reduction <add>, %259, %cst_60 [2] : vector<6x8x8xf32> to vector<6x8xf32>
    %261 = vector.shape_cast %253 : vector<6x8xf32> to vector<6x1x8xf32>
    %262 = vector.broadcast %261 : vector<6x1x8xf32> to vector<6x8x8xf32>
    %263 = arith.mulf %2, %262 : vector<6x8x8xf32>
    %cst_61 = arith.constant dense<0.000000e+00> : vector<6x8xf32>
    %264 = vector.multi_reduction <add>, %263, %cst_61 [2] : vector<6x8x8xf32> to vector<6x8xf32>
    %265 = arith.mulf %245, %260 : vector<6x8xf32>
    %cst_62 = arith.constant dense<0.000000e+00> : vector<6xf32>
    %266 = vector.multi_reduction <add>, %265, %cst_62 [1] : vector<6x8xf32> to vector<6xf32>
    %267 = vector.shape_cast %266 : vector<6xf32> to vector<6x1xf32>
    %268 = arith.mulf %253, %264 : vector<6x8xf32>
    %cst_63 = arith.constant dense<0.000000e+00> : vector<6xf32>
    %269 = vector.multi_reduction <add>, %268, %cst_63 [1] : vector<6x8xf32> to vector<6xf32>
    %270 = vector.shape_cast %269 : vector<6xf32> to vector<6x1xf32>
    %271 = arith.mulf %248, %256 : vector<6x1xf32>
    %272 = arith.mulf %271, %256 : vector<6x1xf32>
    %cst_64 = arith.constant 2.000000e+00 : f32
    %273 = vector.broadcast %cst_64 : f32 to vector<6x1xf32>
    %274 = arith.mulf %273, %272 : vector<6x1xf32>
    %275 = vector.broadcast %274 : vector<6x1xf32> to vector<6x8xf32>
    %276 = arith.mulf %275, %260 : vector<6x8xf32>
    %277 = arith.mulf %248, %248 : vector<6x1xf32>
    %278 = arith.mulf %277, %256 : vector<6x1xf32>
    %cst_65 = arith.constant 2.000000e+00 : f32
    %279 = vector.broadcast %cst_65 : f32 to vector<6x1xf32>
    %280 = arith.mulf %279, %278 : vector<6x1xf32>
    %281 = vector.broadcast %280 : vector<6x1xf32> to vector<6x8xf32>
    %282 = arith.mulf %281, %264 : vector<6x8xf32>
    %283 = arith.subf %276, %282 : vector<6x8xf32>
    %284 = arith.mulf %248, %248 : vector<6x1xf32>
    %285 = arith.mulf %284, %270 : vector<6x1xf32>
    %286 = vector.broadcast %285 : vector<6x1xf32> to vector<6x8xf32>
    %287 = arith.addf %283, %286 : vector<6x8xf32>
    %288 = arith.mulf %256, %256 : vector<6x1xf32>
    %289 = arith.mulf %288, %267 : vector<6x1xf32>
    %290 = vector.broadcast %289 : vector<6x1xf32> to vector<6x8xf32>
    %291 = arith.subf %287, %290 : vector<6x8xf32>
    %cst_66 = arith.constant 0.000000e+00 : f32
    %292 = vector.broadcast %cst_66 : f32 to vector<6x8xf32>
    %293 = arith.cmpf olt, %291, %292 : vector<6x8xf32>
    %294 = arith.extui %293 : vector<6x8xi1> to vector<6x8xi32>
    %295 = arith.sitofp %294 : vector<6x8xi32> to vector<6x8xf32>
    %296 = arith.mulf %295, %1 : vector<6x8xf32>
    %297 = arith.subf %1, %296 : vector<6x8xf32>
    %cst_67 = arith.constant dense<0.000000e+00> : vector<6xf32>
    %298 = vector.multi_reduction <add>, %296, %cst_67 [1] : vector<6x8xf32> to vector<6xf32>
    %299 = vector.shape_cast %298 : vector<6xf32> to vector<6x1xf32>
    %cst_68 = arith.constant dense<0.000000e+00> : vector<6xf32>
    %300 = vector.multi_reduction <add>, %297, %cst_68 [1] : vector<6x8xf32> to vector<6xf32>
    %301 = vector.shape_cast %300 : vector<6xf32> to vector<6x1xf32>
    %cst_69 = arith.constant 0.000000e+00 : f32
    %302 = vector.broadcast %cst_69 : f32 to vector<6x1xf32>
    %303 = arith.cmpf ogt, %301, %302 : vector<6x1xf32>
    %304 = vector.shape_cast %303 : vector<6x1xi1> to vector<6x1xi1>
    %305 = vector.broadcast %304 : vector<6x1xi1> to vector<6x8xi1>
    %306 = arith.select %305, %297, %245 : vector<6x8xi1>, vector<6x8xf32>
    %cst_70 = arith.constant 0.000000e+00 : f32
    %307 = vector.broadcast %cst_70 : f32 to vector<6x1xf32>
    %308 = arith.cmpf ogt, %301, %307 : vector<6x1xf32>
    %309 = arith.select %308, %301, %248 : vector<6x1xi1>, vector<6x1xf32>
    %cst_71 = arith.constant 0.000000e+00 : f32
    %310 = vector.broadcast %cst_71 : f32 to vector<6x1xf32>
    %311 = arith.cmpf ogt, %299, %310 : vector<6x1xf32>
    %312 = vector.shape_cast %311 : vector<6x1xi1> to vector<6x1xi1>
    %313 = vector.broadcast %312 : vector<6x1xi1> to vector<6x8xi1>
    %314 = arith.select %313, %296, %253 : vector<6x8xi1>, vector<6x8xf32>
    %cst_72 = arith.constant 0.000000e+00 : f32
    %315 = vector.broadcast %cst_72 : f32 to vector<6x1xf32>
    %316 = arith.cmpf ogt, %299, %315 : vector<6x1xf32>
    %317 = arith.select %316, %299, %256 : vector<6x1xi1>, vector<6x1xf32>
    %318 = vector.shape_cast %306 : vector<6x8xf32> to vector<6x1x8xf32>
    %319 = vector.broadcast %318 : vector<6x1x8xf32> to vector<6x8x8xf32>
    %320 = arith.mulf %2, %319 : vector<6x8x8xf32>
    %cst_73 = arith.constant dense<0.000000e+00> : vector<6x8xf32>
    %321 = vector.multi_reduction <add>, %320, %cst_73 [2] : vector<6x8x8xf32> to vector<6x8xf32>
    %322 = vector.shape_cast %314 : vector<6x8xf32> to vector<6x1x8xf32>
    %323 = vector.broadcast %322 : vector<6x1x8xf32> to vector<6x8x8xf32>
    %324 = arith.mulf %2, %323 : vector<6x8x8xf32>
    %cst_74 = arith.constant dense<0.000000e+00> : vector<6x8xf32>
    %325 = vector.multi_reduction <add>, %324, %cst_74 [2] : vector<6x8x8xf32> to vector<6x8xf32>
    %326 = arith.mulf %306, %321 : vector<6x8xf32>
    %cst_75 = arith.constant dense<0.000000e+00> : vector<6xf32>
    %327 = vector.multi_reduction <add>, %326, %cst_75 [1] : vector<6x8xf32> to vector<6xf32>
    %328 = vector.shape_cast %327 : vector<6xf32> to vector<6x1xf32>
    %329 = arith.mulf %314, %325 : vector<6x8xf32>
    %cst_76 = arith.constant dense<0.000000e+00> : vector<6xf32>
    %330 = vector.multi_reduction <add>, %329, %cst_76 [1] : vector<6x8xf32> to vector<6xf32>
    %331 = vector.shape_cast %330 : vector<6xf32> to vector<6x1xf32>
    %332 = arith.mulf %309, %317 : vector<6x1xf32>
    %333 = arith.mulf %332, %317 : vector<6x1xf32>
    %cst_77 = arith.constant 2.000000e+00 : f32
    %334 = vector.broadcast %cst_77 : f32 to vector<6x1xf32>
    %335 = arith.mulf %334, %333 : vector<6x1xf32>
    %336 = vector.broadcast %335 : vector<6x1xf32> to vector<6x8xf32>
    %337 = arith.mulf %336, %321 : vector<6x8xf32>
    %338 = arith.mulf %309, %309 : vector<6x1xf32>
    %339 = arith.mulf %338, %317 : vector<6x1xf32>
    %cst_78 = arith.constant 2.000000e+00 : f32
    %340 = vector.broadcast %cst_78 : f32 to vector<6x1xf32>
    %341 = arith.mulf %340, %339 : vector<6x1xf32>
    %342 = vector.broadcast %341 : vector<6x1xf32> to vector<6x8xf32>
    %343 = arith.mulf %342, %325 : vector<6x8xf32>
    %344 = arith.subf %337, %343 : vector<6x8xf32>
    %345 = arith.mulf %309, %309 : vector<6x1xf32>
    %346 = arith.mulf %345, %331 : vector<6x1xf32>
    %347 = vector.broadcast %346 : vector<6x1xf32> to vector<6x8xf32>
    %348 = arith.addf %344, %347 : vector<6x8xf32>
    %349 = arith.mulf %317, %317 : vector<6x1xf32>
    %350 = arith.mulf %349, %328 : vector<6x1xf32>
    %351 = vector.broadcast %350 : vector<6x1xf32> to vector<6x8xf32>
    %352 = arith.subf %348, %351 : vector<6x8xf32>
    %cst_79 = arith.constant 0.000000e+00 : f32
    %353 = vector.broadcast %cst_79 : f32 to vector<6x8xf32>
    %354 = arith.cmpf olt, %352, %353 : vector<6x8xf32>
    %355 = arith.extui %354 : vector<6x8xi1> to vector<6x8xi32>
    %356 = arith.sitofp %355 : vector<6x8xi32> to vector<6x8xf32>
    %357 = arith.mulf %356, %1 : vector<6x8xf32>
    %358 = arith.subf %1, %357 : vector<6x8xf32>
    %cst_80 = arith.constant dense<0.000000e+00> : vector<6xf32>
    %359 = vector.multi_reduction <add>, %357, %cst_80 [1] : vector<6x8xf32> to vector<6xf32>
    %360 = vector.shape_cast %359 : vector<6xf32> to vector<6x1xf32>
    %cst_81 = arith.constant dense<0.000000e+00> : vector<6xf32>
    %361 = vector.multi_reduction <add>, %358, %cst_81 [1] : vector<6x8xf32> to vector<6xf32>
    %362 = vector.shape_cast %361 : vector<6xf32> to vector<6x1xf32>
    %cst_82 = arith.constant 0.000000e+00 : f32
    %363 = vector.broadcast %cst_82 : f32 to vector<6x1xf32>
    %364 = arith.cmpf ogt, %362, %363 : vector<6x1xf32>
    %365 = vector.shape_cast %364 : vector<6x1xi1> to vector<6x1xi1>
    %366 = vector.broadcast %365 : vector<6x1xi1> to vector<6x8xi1>
    %367 = arith.select %366, %358, %306 : vector<6x8xi1>, vector<6x8xf32>
    %cst_83 = arith.constant 0.000000e+00 : f32
    %368 = vector.broadcast %cst_83 : f32 to vector<6x1xf32>
    %369 = arith.cmpf ogt, %362, %368 : vector<6x1xf32>
    %370 = arith.select %369, %362, %309 : vector<6x1xi1>, vector<6x1xf32>
    %cst_84 = arith.constant 0.000000e+00 : f32
    %371 = vector.broadcast %cst_84 : f32 to vector<6x1xf32>
    %372 = arith.cmpf ogt, %360, %371 : vector<6x1xf32>
    %373 = vector.shape_cast %372 : vector<6x1xi1> to vector<6x1xi1>
    %374 = vector.broadcast %373 : vector<6x1xi1> to vector<6x8xi1>
    %375 = arith.select %374, %357, %314 : vector<6x8xi1>, vector<6x8xf32>
    %cst_85 = arith.constant 0.000000e+00 : f32
    %376 = vector.broadcast %cst_85 : f32 to vector<6x1xf32>
    %377 = arith.cmpf ogt, %360, %376 : vector<6x1xf32>
    %378 = arith.select %377, %360, %317 : vector<6x1xi1>, vector<6x1xf32>
    %379 = vector.shape_cast %367 : vector<6x8xf32> to vector<6x1x8xf32>
    %380 = vector.broadcast %379 : vector<6x1x8xf32> to vector<6x8x8xf32>
    %381 = arith.mulf %2, %380 : vector<6x8x8xf32>
    %cst_86 = arith.constant dense<0.000000e+00> : vector<6x8xf32>
    %382 = vector.multi_reduction <add>, %381, %cst_86 [2] : vector<6x8x8xf32> to vector<6x8xf32>
    %383 = vector.shape_cast %375 : vector<6x8xf32> to vector<6x1x8xf32>
    %384 = vector.broadcast %383 : vector<6x1x8xf32> to vector<6x8x8xf32>
    %385 = arith.mulf %2, %384 : vector<6x8x8xf32>
    %cst_87 = arith.constant dense<0.000000e+00> : vector<6x8xf32>
    %386 = vector.multi_reduction <add>, %385, %cst_87 [2] : vector<6x8x8xf32> to vector<6x8xf32>
    %387 = arith.mulf %367, %382 : vector<6x8xf32>
    %cst_88 = arith.constant dense<0.000000e+00> : vector<6xf32>
    %388 = vector.multi_reduction <add>, %387, %cst_88 [1] : vector<6x8xf32> to vector<6xf32>
    %389 = vector.shape_cast %388 : vector<6xf32> to vector<6x1xf32>
    %390 = arith.mulf %375, %386 : vector<6x8xf32>
    %cst_89 = arith.constant dense<0.000000e+00> : vector<6xf32>
    %391 = vector.multi_reduction <add>, %390, %cst_89 [1] : vector<6x8xf32> to vector<6xf32>
    %392 = vector.shape_cast %391 : vector<6xf32> to vector<6x1xf32>
    %393 = arith.mulf %370, %378 : vector<6x1xf32>
    %394 = arith.mulf %393, %378 : vector<6x1xf32>
    %cst_90 = arith.constant 2.000000e+00 : f32
    %395 = vector.broadcast %cst_90 : f32 to vector<6x1xf32>
    %396 = arith.mulf %395, %394 : vector<6x1xf32>
    %397 = vector.broadcast %396 : vector<6x1xf32> to vector<6x8xf32>
    %398 = arith.mulf %397, %382 : vector<6x8xf32>
    %399 = arith.mulf %370, %370 : vector<6x1xf32>
    %400 = arith.mulf %399, %378 : vector<6x1xf32>
    %cst_91 = arith.constant 2.000000e+00 : f32
    %401 = vector.broadcast %cst_91 : f32 to vector<6x1xf32>
    %402 = arith.mulf %401, %400 : vector<6x1xf32>
    %403 = vector.broadcast %402 : vector<6x1xf32> to vector<6x8xf32>
    %404 = arith.mulf %403, %386 : vector<6x8xf32>
    %405 = arith.subf %398, %404 : vector<6x8xf32>
    %406 = arith.mulf %370, %370 : vector<6x1xf32>
    %407 = arith.mulf %406, %392 : vector<6x1xf32>
    %408 = vector.broadcast %407 : vector<6x1xf32> to vector<6x8xf32>
    %409 = arith.addf %405, %408 : vector<6x8xf32>
    %410 = arith.mulf %378, %378 : vector<6x1xf32>
    %411 = arith.mulf %410, %389 : vector<6x1xf32>
    %412 = vector.broadcast %411 : vector<6x1xf32> to vector<6x8xf32>
    %413 = arith.subf %409, %412 : vector<6x8xf32>
    %cst_92 = arith.constant 0.000000e+00 : f32
    %414 = vector.broadcast %cst_92 : f32 to vector<6x8xf32>
    %415 = arith.cmpf olt, %413, %414 : vector<6x8xf32>
    %416 = arith.extui %415 : vector<6x8xi1> to vector<6x8xi32>
    %417 = arith.sitofp %416 : vector<6x8xi32> to vector<6x8xf32>
    %418 = arith.mulf %417, %1 : vector<6x8xf32>
    %419 = arith.subf %1, %418 : vector<6x8xf32>
    %cst_93 = arith.constant dense<0.000000e+00> : vector<6xf32>
    %420 = vector.multi_reduction <add>, %418, %cst_93 [1] : vector<6x8xf32> to vector<6xf32>
    %421 = vector.shape_cast %420 : vector<6xf32> to vector<6x1xf32>
    %cst_94 = arith.constant dense<0.000000e+00> : vector<6xf32>
    %422 = vector.multi_reduction <add>, %419, %cst_94 [1] : vector<6x8xf32> to vector<6xf32>
    %423 = vector.shape_cast %422 : vector<6xf32> to vector<6x1xf32>
    %cst_95 = arith.constant 0.000000e+00 : f32
    %424 = vector.broadcast %cst_95 : f32 to vector<6x1xf32>
    %425 = arith.cmpf ogt, %423, %424 : vector<6x1xf32>
    %426 = vector.shape_cast %425 : vector<6x1xi1> to vector<6x1xi1>
    %427 = vector.broadcast %426 : vector<6x1xi1> to vector<6x8xi1>
    %428 = arith.select %427, %419, %367 : vector<6x8xi1>, vector<6x8xf32>
    %cst_96 = arith.constant 0.000000e+00 : f32
    %429 = vector.broadcast %cst_96 : f32 to vector<6x1xf32>
    %430 = arith.cmpf ogt, %423, %429 : vector<6x1xf32>
    %431 = arith.select %430, %423, %370 : vector<6x1xi1>, vector<6x1xf32>
    %cst_97 = arith.constant 0.000000e+00 : f32
    %432 = vector.broadcast %cst_97 : f32 to vector<6x1xf32>
    %433 = arith.cmpf ogt, %421, %432 : vector<6x1xf32>
    %434 = vector.shape_cast %433 : vector<6x1xi1> to vector<6x1xi1>
    %435 = vector.broadcast %434 : vector<6x1xi1> to vector<6x8xi1>
    %436 = arith.select %435, %418, %375 : vector<6x8xi1>, vector<6x8xf32>
    %cst_98 = arith.constant 0.000000e+00 : f32
    %437 = vector.broadcast %cst_98 : f32 to vector<6x1xf32>
    %438 = arith.cmpf ogt, %421, %437 : vector<6x1xf32>
    %439 = arith.select %438, %421, %378 : vector<6x1xi1>, vector<6x1xf32>
    %440 = vector.shape_cast %428 : vector<6x8xf32> to vector<6x1x8xf32>
    %441 = vector.broadcast %440 : vector<6x1x8xf32> to vector<6x8x8xf32>
    %442 = arith.mulf %2, %441 : vector<6x8x8xf32>
    %cst_99 = arith.constant dense<0.000000e+00> : vector<6x8xf32>
    %443 = vector.multi_reduction <add>, %442, %cst_99 [2] : vector<6x8x8xf32> to vector<6x8xf32>
    %444 = vector.shape_cast %436 : vector<6x8xf32> to vector<6x1x8xf32>
    %445 = vector.broadcast %444 : vector<6x1x8xf32> to vector<6x8x8xf32>
    %446 = arith.mulf %2, %445 : vector<6x8x8xf32>
    %cst_100 = arith.constant dense<0.000000e+00> : vector<6x8xf32>
    %447 = vector.multi_reduction <add>, %446, %cst_100 [2] : vector<6x8x8xf32> to vector<6x8xf32>
    %448 = arith.mulf %428, %443 : vector<6x8xf32>
    %cst_101 = arith.constant dense<0.000000e+00> : vector<6xf32>
    %449 = vector.multi_reduction <add>, %448, %cst_101 [1] : vector<6x8xf32> to vector<6xf32>
    %450 = vector.shape_cast %449 : vector<6xf32> to vector<6x1xf32>
    %451 = arith.mulf %436, %447 : vector<6x8xf32>
    %cst_102 = arith.constant dense<0.000000e+00> : vector<6xf32>
    %452 = vector.multi_reduction <add>, %451, %cst_102 [1] : vector<6x8xf32> to vector<6xf32>
    %453 = vector.shape_cast %452 : vector<6xf32> to vector<6x1xf32>
    %454 = arith.mulf %431, %439 : vector<6x1xf32>
    %455 = arith.mulf %454, %439 : vector<6x1xf32>
    %cst_103 = arith.constant 2.000000e+00 : f32
    %456 = vector.broadcast %cst_103 : f32 to vector<6x1xf32>
    %457 = arith.mulf %456, %455 : vector<6x1xf32>
    %458 = vector.broadcast %457 : vector<6x1xf32> to vector<6x8xf32>
    %459 = arith.mulf %458, %443 : vector<6x8xf32>
    %460 = arith.mulf %431, %431 : vector<6x1xf32>
    %461 = arith.mulf %460, %439 : vector<6x1xf32>
    %cst_104 = arith.constant 2.000000e+00 : f32
    %462 = vector.broadcast %cst_104 : f32 to vector<6x1xf32>
    %463 = arith.mulf %462, %461 : vector<6x1xf32>
    %464 = vector.broadcast %463 : vector<6x1xf32> to vector<6x8xf32>
    %465 = arith.mulf %464, %447 : vector<6x8xf32>
    %466 = arith.subf %459, %465 : vector<6x8xf32>
    %467 = arith.mulf %431, %431 : vector<6x1xf32>
    %468 = arith.mulf %467, %453 : vector<6x1xf32>
    %469 = vector.broadcast %468 : vector<6x1xf32> to vector<6x8xf32>
    %470 = arith.addf %466, %469 : vector<6x8xf32>
    %471 = arith.mulf %439, %439 : vector<6x1xf32>
    %472 = arith.mulf %471, %450 : vector<6x1xf32>
    %473 = vector.broadcast %472 : vector<6x1xf32> to vector<6x8xf32>
    %474 = arith.subf %470, %473 : vector<6x8xf32>
    %cst_105 = arith.constant 0.000000e+00 : f32
    %475 = vector.broadcast %cst_105 : f32 to vector<6x8xf32>
    %476 = arith.cmpf olt, %474, %475 : vector<6x8xf32>
    %477 = arith.extui %476 : vector<6x8xi1> to vector<6x8xi32>
    %478 = arith.sitofp %477 : vector<6x8xi32> to vector<6x8xf32>
    %479 = arith.mulf %478, %1 : vector<6x8xf32>
    %480 = arith.subf %1, %479 : vector<6x8xf32>
    %cst_106 = arith.constant dense<0.000000e+00> : vector<6xf32>
    %481 = vector.multi_reduction <add>, %479, %cst_106 [1] : vector<6x8xf32> to vector<6xf32>
    %482 = vector.shape_cast %481 : vector<6xf32> to vector<6x1xf32>
    %cst_107 = arith.constant dense<0.000000e+00> : vector<6xf32>
    %483 = vector.multi_reduction <add>, %480, %cst_107 [1] : vector<6x8xf32> to vector<6xf32>
    %484 = vector.shape_cast %483 : vector<6xf32> to vector<6x1xf32>
    %cst_108 = arith.constant 0.000000e+00 : f32
    %485 = vector.broadcast %cst_108 : f32 to vector<6x1xf32>
    %486 = arith.cmpf ogt, %484, %485 : vector<6x1xf32>
    %487 = vector.shape_cast %486 : vector<6x1xi1> to vector<6x1xi1>
    %488 = vector.broadcast %487 : vector<6x1xi1> to vector<6x8xi1>
    %489 = arith.select %488, %480, %428 : vector<6x8xi1>, vector<6x8xf32>
    %cst_109 = arith.constant 0.000000e+00 : f32
    %490 = vector.broadcast %cst_109 : f32 to vector<6x1xf32>
    %491 = arith.cmpf ogt, %484, %490 : vector<6x1xf32>
    %492 = arith.select %491, %484, %431 : vector<6x1xi1>, vector<6x1xf32>
    %cst_110 = arith.constant 0.000000e+00 : f32
    %493 = vector.broadcast %cst_110 : f32 to vector<6x1xf32>
    %494 = arith.cmpf ogt, %482, %493 : vector<6x1xf32>
    %495 = vector.shape_cast %494 : vector<6x1xi1> to vector<6x1xi1>
    %496 = vector.broadcast %495 : vector<6x1xi1> to vector<6x8xi1>
    %497 = arith.select %496, %479, %436 : vector<6x8xi1>, vector<6x8xf32>
    %cst_111 = arith.constant 0.000000e+00 : f32
    %498 = vector.broadcast %cst_111 : f32 to vector<6x1xf32>
    %499 = arith.cmpf ogt, %482, %498 : vector<6x1xf32>
    %500 = arith.select %499, %482, %439 : vector<6x1xi1>, vector<6x1xf32>
    %501 = vector.shape_cast %489 : vector<6x8xf32> to vector<6x1x8xf32>
    %502 = vector.broadcast %501 : vector<6x1x8xf32> to vector<6x8x8xf32>
    %503 = arith.mulf %2, %502 : vector<6x8x8xf32>
    %cst_112 = arith.constant dense<0.000000e+00> : vector<6x8xf32>
    %504 = vector.multi_reduction <add>, %503, %cst_112 [2] : vector<6x8x8xf32> to vector<6x8xf32>
    %505 = vector.shape_cast %497 : vector<6x8xf32> to vector<6x1x8xf32>
    %506 = vector.broadcast %505 : vector<6x1x8xf32> to vector<6x8x8xf32>
    %507 = arith.mulf %2, %506 : vector<6x8x8xf32>
    %cst_113 = arith.constant dense<0.000000e+00> : vector<6x8xf32>
    %508 = vector.multi_reduction <add>, %507, %cst_113 [2] : vector<6x8x8xf32> to vector<6x8xf32>
    %509 = arith.mulf %489, %504 : vector<6x8xf32>
    %cst_114 = arith.constant dense<0.000000e+00> : vector<6xf32>
    %510 = vector.multi_reduction <add>, %509, %cst_114 [1] : vector<6x8xf32> to vector<6xf32>
    %511 = vector.shape_cast %510 : vector<6xf32> to vector<6x1xf32>
    %512 = arith.mulf %497, %508 : vector<6x8xf32>
    %cst_115 = arith.constant dense<0.000000e+00> : vector<6xf32>
    %513 = vector.multi_reduction <add>, %512, %cst_115 [1] : vector<6x8xf32> to vector<6xf32>
    %514 = vector.shape_cast %513 : vector<6xf32> to vector<6x1xf32>
    %515 = arith.mulf %492, %500 : vector<6x1xf32>
    %516 = arith.mulf %515, %500 : vector<6x1xf32>
    %cst_116 = arith.constant 2.000000e+00 : f32
    %517 = vector.broadcast %cst_116 : f32 to vector<6x1xf32>
    %518 = arith.mulf %517, %516 : vector<6x1xf32>
    %519 = vector.broadcast %518 : vector<6x1xf32> to vector<6x8xf32>
    %520 = arith.mulf %519, %504 : vector<6x8xf32>
    %521 = arith.mulf %492, %492 : vector<6x1xf32>
    %522 = arith.mulf %521, %500 : vector<6x1xf32>
    %cst_117 = arith.constant 2.000000e+00 : f32
    %523 = vector.broadcast %cst_117 : f32 to vector<6x1xf32>
    %524 = arith.mulf %523, %522 : vector<6x1xf32>
    %525 = vector.broadcast %524 : vector<6x1xf32> to vector<6x8xf32>
    %526 = arith.mulf %525, %508 : vector<6x8xf32>
    %527 = arith.subf %520, %526 : vector<6x8xf32>
    %528 = arith.mulf %492, %492 : vector<6x1xf32>
    %529 = arith.mulf %528, %514 : vector<6x1xf32>
    %530 = vector.broadcast %529 : vector<6x1xf32> to vector<6x8xf32>
    %531 = arith.addf %527, %530 : vector<6x8xf32>
    %532 = arith.mulf %500, %500 : vector<6x1xf32>
    %533 = arith.mulf %532, %511 : vector<6x1xf32>
    %534 = vector.broadcast %533 : vector<6x1xf32> to vector<6x8xf32>
    %535 = arith.subf %531, %534 : vector<6x8xf32>
    %cst_118 = arith.constant 0.000000e+00 : f32
    %536 = vector.broadcast %cst_118 : f32 to vector<6x8xf32>
    %537 = arith.cmpf olt, %535, %536 : vector<6x8xf32>
    %538 = arith.extui %537 : vector<6x8xi1> to vector<6x8xi32>
    %539 = arith.sitofp %538 : vector<6x8xi32> to vector<6x8xf32>
    %540 = arith.mulf %539, %1 : vector<6x8xf32>
    %541 = arith.subf %1, %540 : vector<6x8xf32>
    %cst_119 = arith.constant dense<0.000000e+00> : vector<6xf32>
    %542 = vector.multi_reduction <add>, %540, %cst_119 [1] : vector<6x8xf32> to vector<6xf32>
    %543 = vector.shape_cast %542 : vector<6xf32> to vector<6x1xf32>
    %cst_120 = arith.constant dense<0.000000e+00> : vector<6xf32>
    %544 = vector.multi_reduction <add>, %541, %cst_120 [1] : vector<6x8xf32> to vector<6xf32>
    %545 = vector.shape_cast %544 : vector<6xf32> to vector<6x1xf32>
    %cst_121 = arith.constant 0.000000e+00 : f32
    %546 = vector.broadcast %cst_121 : f32 to vector<6x1xf32>
    %547 = arith.cmpf ogt, %545, %546 : vector<6x1xf32>
    %548 = vector.shape_cast %547 : vector<6x1xi1> to vector<6x1xi1>
    %549 = vector.broadcast %548 : vector<6x1xi1> to vector<6x8xi1>
    %550 = arith.select %549, %541, %489 : vector<6x8xi1>, vector<6x8xf32>
    %cst_122 = arith.constant 0.000000e+00 : f32
    %551 = vector.broadcast %cst_122 : f32 to vector<6x1xf32>
    %552 = arith.cmpf ogt, %545, %551 : vector<6x1xf32>
    %553 = arith.select %552, %545, %492 : vector<6x1xi1>, vector<6x1xf32>
    %cst_123 = arith.constant 0.000000e+00 : f32
    %554 = vector.broadcast %cst_123 : f32 to vector<6x1xf32>
    %555 = arith.cmpf ogt, %543, %554 : vector<6x1xf32>
    %556 = vector.shape_cast %555 : vector<6x1xi1> to vector<6x1xi1>
    %557 = vector.broadcast %556 : vector<6x1xi1> to vector<6x8xi1>
    %558 = arith.select %557, %540, %497 : vector<6x8xi1>, vector<6x8xf32>
    %cst_124 = arith.constant 0.000000e+00 : f32
    %559 = vector.broadcast %cst_124 : f32 to vector<6x1xf32>
    %560 = arith.cmpf ogt, %543, %559 : vector<6x1xf32>
    %561 = arith.select %560, %543, %500 : vector<6x1xi1>, vector<6x1xf32>
    %562 = vector.shape_cast %550 : vector<6x8xf32> to vector<6x1x8xf32>
    %563 = vector.broadcast %562 : vector<6x1x8xf32> to vector<6x8x8xf32>
    %564 = arith.mulf %2, %563 : vector<6x8x8xf32>
    %cst_125 = arith.constant dense<0.000000e+00> : vector<6x8xf32>
    %565 = vector.multi_reduction <add>, %564, %cst_125 [2] : vector<6x8x8xf32> to vector<6x8xf32>
    %566 = vector.shape_cast %558 : vector<6x8xf32> to vector<6x1x8xf32>
    %567 = vector.broadcast %566 : vector<6x1x8xf32> to vector<6x8x8xf32>
    %568 = arith.mulf %2, %567 : vector<6x8x8xf32>
    %cst_126 = arith.constant dense<0.000000e+00> : vector<6x8xf32>
    %569 = vector.multi_reduction <add>, %568, %cst_126 [2] : vector<6x8x8xf32> to vector<6x8xf32>
    %570 = arith.mulf %550, %565 : vector<6x8xf32>
    %cst_127 = arith.constant dense<0.000000e+00> : vector<6xf32>
    %571 = vector.multi_reduction <add>, %570, %cst_127 [1] : vector<6x8xf32> to vector<6xf32>
    %572 = vector.shape_cast %571 : vector<6xf32> to vector<6x1xf32>
    %573 = arith.mulf %558, %569 : vector<6x8xf32>
    %cst_128 = arith.constant dense<0.000000e+00> : vector<6xf32>
    %574 = vector.multi_reduction <add>, %573, %cst_128 [1] : vector<6x8xf32> to vector<6xf32>
    %575 = vector.shape_cast %574 : vector<6xf32> to vector<6x1xf32>
    %576 = arith.mulf %553, %561 : vector<6x1xf32>
    %577 = arith.mulf %576, %561 : vector<6x1xf32>
    %cst_129 = arith.constant 2.000000e+00 : f32
    %578 = vector.broadcast %cst_129 : f32 to vector<6x1xf32>
    %579 = arith.mulf %578, %577 : vector<6x1xf32>
    %580 = vector.broadcast %579 : vector<6x1xf32> to vector<6x8xf32>
    %581 = arith.mulf %580, %565 : vector<6x8xf32>
    %582 = arith.mulf %553, %553 : vector<6x1xf32>
    %583 = arith.mulf %582, %561 : vector<6x1xf32>
    %cst_130 = arith.constant 2.000000e+00 : f32
    %584 = vector.broadcast %cst_130 : f32 to vector<6x1xf32>
    %585 = arith.mulf %584, %583 : vector<6x1xf32>
    %586 = vector.broadcast %585 : vector<6x1xf32> to vector<6x8xf32>
    %587 = arith.mulf %586, %569 : vector<6x8xf32>
    %588 = arith.subf %581, %587 : vector<6x8xf32>
    %589 = arith.mulf %553, %553 : vector<6x1xf32>
    %590 = arith.mulf %589, %575 : vector<6x1xf32>
    %591 = vector.broadcast %590 : vector<6x1xf32> to vector<6x8xf32>
    %592 = arith.addf %588, %591 : vector<6x8xf32>
    %593 = arith.mulf %561, %561 : vector<6x1xf32>
    %594 = arith.mulf %593, %572 : vector<6x1xf32>
    %595 = vector.broadcast %594 : vector<6x1xf32> to vector<6x8xf32>
    %596 = arith.subf %592, %595 : vector<6x8xf32>
    %cst_131 = arith.constant 0.000000e+00 : f32
    %597 = vector.broadcast %cst_131 : f32 to vector<6x8xf32>
    %598 = arith.cmpf olt, %596, %597 : vector<6x8xf32>
    %599 = arith.extui %598 : vector<6x8xi1> to vector<6x8xi32>
    %600 = arith.sitofp %599 : vector<6x8xi32> to vector<6x8xf32>
    %601 = arith.mulf %600, %1 : vector<6x8xf32>
    %602 = arith.subf %1, %601 : vector<6x8xf32>
    %cst_132 = arith.constant dense<0.000000e+00> : vector<6xf32>
    %603 = vector.multi_reduction <add>, %601, %cst_132 [1] : vector<6x8xf32> to vector<6xf32>
    %604 = vector.shape_cast %603 : vector<6xf32> to vector<6x1xf32>
    %cst_133 = arith.constant dense<0.000000e+00> : vector<6xf32>
    %605 = vector.multi_reduction <add>, %602, %cst_133 [1] : vector<6x8xf32> to vector<6xf32>
    %606 = vector.shape_cast %605 : vector<6xf32> to vector<6x1xf32>
    %cst_134 = arith.constant 0.000000e+00 : f32
    %607 = vector.broadcast %cst_134 : f32 to vector<6x1xf32>
    %608 = arith.cmpf ogt, %606, %607 : vector<6x1xf32>
    %609 = vector.shape_cast %608 : vector<6x1xi1> to vector<6x1xi1>
    %610 = vector.broadcast %609 : vector<6x1xi1> to vector<6x8xi1>
    %611 = arith.select %610, %602, %550 : vector<6x8xi1>, vector<6x8xf32>
    %cst_135 = arith.constant 0.000000e+00 : f32
    %612 = vector.broadcast %cst_135 : f32 to vector<6x1xf32>
    %613 = arith.cmpf ogt, %606, %612 : vector<6x1xf32>
    %614 = arith.select %613, %606, %553 : vector<6x1xi1>, vector<6x1xf32>
    %cst_136 = arith.constant 0.000000e+00 : f32
    %615 = vector.broadcast %cst_136 : f32 to vector<6x1xf32>
    %616 = arith.cmpf ogt, %604, %615 : vector<6x1xf32>
    %617 = vector.shape_cast %616 : vector<6x1xi1> to vector<6x1xi1>
    %618 = vector.broadcast %617 : vector<6x1xi1> to vector<6x8xi1>
    %619 = arith.select %618, %601, %558 : vector<6x8xi1>, vector<6x8xf32>
    %cst_137 = arith.constant 0.000000e+00 : f32
    %620 = vector.broadcast %cst_137 : f32 to vector<6x1xf32>
    %621 = arith.cmpf ogt, %604, %620 : vector<6x1xf32>
    %622 = arith.select %621, %604, %561 : vector<6x1xi1>, vector<6x1xf32>
    %623 = vector.shape_cast %611 : vector<6x8xf32> to vector<6x1x8xf32>
    %624 = vector.broadcast %623 : vector<6x1x8xf32> to vector<6x8x8xf32>
    %625 = arith.mulf %2, %624 : vector<6x8x8xf32>
    %cst_138 = arith.constant dense<0.000000e+00> : vector<6x8xf32>
    %626 = vector.multi_reduction <add>, %625, %cst_138 [2] : vector<6x8x8xf32> to vector<6x8xf32>
    %627 = vector.shape_cast %619 : vector<6x8xf32> to vector<6x1x8xf32>
    %628 = vector.broadcast %627 : vector<6x1x8xf32> to vector<6x8x8xf32>
    %629 = arith.mulf %2, %628 : vector<6x8x8xf32>
    %cst_139 = arith.constant dense<0.000000e+00> : vector<6x8xf32>
    %630 = vector.multi_reduction <add>, %629, %cst_139 [2] : vector<6x8x8xf32> to vector<6x8xf32>
    %631 = arith.mulf %611, %626 : vector<6x8xf32>
    %cst_140 = arith.constant dense<0.000000e+00> : vector<6xf32>
    %632 = vector.multi_reduction <add>, %631, %cst_140 [1] : vector<6x8xf32> to vector<6xf32>
    %633 = vector.shape_cast %632 : vector<6xf32> to vector<6x1xf32>
    %634 = arith.mulf %619, %630 : vector<6x8xf32>
    %cst_141 = arith.constant dense<0.000000e+00> : vector<6xf32>
    %635 = vector.multi_reduction <add>, %634, %cst_141 [1] : vector<6x8xf32> to vector<6xf32>
    %636 = vector.shape_cast %635 : vector<6xf32> to vector<6x1xf32>
    %637 = arith.mulf %614, %622 : vector<6x1xf32>
    %638 = arith.mulf %637, %622 : vector<6x1xf32>
    %cst_142 = arith.constant 2.000000e+00 : f32
    %639 = vector.broadcast %cst_142 : f32 to vector<6x1xf32>
    %640 = arith.mulf %639, %638 : vector<6x1xf32>
    %641 = vector.broadcast %640 : vector<6x1xf32> to vector<6x8xf32>
    %642 = arith.mulf %641, %626 : vector<6x8xf32>
    %643 = arith.mulf %614, %614 : vector<6x1xf32>
    %644 = arith.mulf %643, %622 : vector<6x1xf32>
    %cst_143 = arith.constant 2.000000e+00 : f32
    %645 = vector.broadcast %cst_143 : f32 to vector<6x1xf32>
    %646 = arith.mulf %645, %644 : vector<6x1xf32>
    %647 = vector.broadcast %646 : vector<6x1xf32> to vector<6x8xf32>
    %648 = arith.mulf %647, %630 : vector<6x8xf32>
    %649 = arith.subf %642, %648 : vector<6x8xf32>
    %650 = arith.mulf %614, %614 : vector<6x1xf32>
    %651 = arith.mulf %650, %636 : vector<6x1xf32>
    %652 = vector.broadcast %651 : vector<6x1xf32> to vector<6x8xf32>
    %653 = arith.addf %649, %652 : vector<6x8xf32>
    %654 = arith.mulf %622, %622 : vector<6x1xf32>
    %655 = arith.mulf %654, %633 : vector<6x1xf32>
    %656 = vector.broadcast %655 : vector<6x1xf32> to vector<6x8xf32>
    %657 = arith.subf %653, %656 : vector<6x8xf32>
    %cst_144 = arith.constant 0.000000e+00 : f32
    %658 = vector.broadcast %cst_144 : f32 to vector<6x8xf32>
    %659 = arith.cmpf olt, %657, %658 : vector<6x8xf32>
    %660 = arith.extui %659 : vector<6x8xi1> to vector<6x8xi32>
    %661 = arith.sitofp %660 : vector<6x8xi32> to vector<6x8xf32>
    %662 = arith.mulf %661, %1 : vector<6x8xf32>
    %663 = arith.subf %1, %662 : vector<6x8xf32>
    %cst_145 = arith.constant dense<0.000000e+00> : vector<6xf32>
    %664 = vector.multi_reduction <add>, %662, %cst_145 [1] : vector<6x8xf32> to vector<6xf32>
    %665 = vector.shape_cast %664 : vector<6xf32> to vector<6x1xf32>
    %cst_146 = arith.constant dense<0.000000e+00> : vector<6xf32>
    %666 = vector.multi_reduction <add>, %663, %cst_146 [1] : vector<6x8xf32> to vector<6xf32>
    %667 = vector.shape_cast %666 : vector<6xf32> to vector<6x1xf32>
    %668 = arith.cmpf ogt, %665, %667 : vector<6x1xf32>
    %669 = vector.shape_cast %668 : vector<6x1xi1> to vector<6x1xi1>
    %670 = vector.broadcast %669 : vector<6x1xi1> to vector<6x8xi1>
    %671 = arith.select %670, %619, %611 : vector<6x8xi1>, vector<6x8xf32>
    %672 = arith.select %668, %622, %614 : vector<6x1xi1>, vector<6x1xf32>
    %673 = vector.shape_cast %671 : vector<6x8xf32> to vector<6x8x1xf32>
    %674 = vector.broadcast %673 : vector<6x8x1xf32> to vector<6x8x256xf32>
    %675 = arith.mulf %674, %0 : vector<6x8x256xf32>
    %cst_147 = arith.constant dense<0.000000e+00> : vector<6x256xf32>
    %676 = vector.multi_reduction <add>, %675, %cst_147 [1] : vector<6x8x256xf32> to vector<6x256xf32>
    %677 = vector.broadcast %672 : vector<6x1xf32> to vector<6x256xf32>
    %678 = arith.divf %676, %677 : vector<6x256xf32>
    %c0_148 = arith.constant 0 : index
    %c0_149 = arith.constant 0 : index
    %679 = vector.load %arg5[%c0_148, %c0_149] : memref<256x96xf32, #tpu.memory_space<vmem>>, vector<256x96xf32>
    %cst_150 = arith.constant dense<0.000000e+00> : vector<6x96xf32>
    %680 = tpu.matmul %678, %679, %cst_150 {dimension_numbers = #tpu.dot_dimension_numbers<[1], [0], [0], [1], [0, 0, 1, 1], [], []>} : vector<6x256xf32>, vector<256x96xf32>, vector<6x96xf32> -> vector<6x96xf32>
    %c0_151 = arith.constant 0 : index
    %c0_152 = arith.constant 0 : index
    %681 = vector.load %arg6[%c0_151, %c0_152] : memref<1x96xf32, #tpu.memory_space<vmem>>, vector<1x96xf32>
    %682 = vector.broadcast %681 : vector<1x96xf32> to vector<6x96xf32>
    %683 = arith.addf %680, %682 : vector<6x96xf32>
    %cst_153 = arith.constant 0.000000e+00 : f32
    %684 = vector.broadcast %cst_153 : f32 to vector<6x96xf32>
    %685 = arith.maximumf %683, %684 : vector<6x96xf32>
    %c0_154 = arith.constant 0 : index
    %c0_155 = arith.constant 0 : index
    %686 = vector.load %arg7[%c0_154, %c0_155] : memref<96x3xf32, #tpu.memory_space<vmem>>, vector<96x3xf32>
    %cst_156 = arith.constant dense<0.000000e+00> : vector<6x3xf32>
    %687 = tpu.matmul %685, %686, %cst_156 {dimension_numbers = #tpu.dot_dimension_numbers<[1], [0], [0], [1], [0, 0, 1, 1], [], []>} : vector<6x96xf32>, vector<96x3xf32>, vector<6x3xf32> -> vector<6x3xf32>
    %c0_157 = arith.constant 0 : index
    %c0_158 = arith.constant 0 : index
    %688 = vector.load %arg8[%c0_157, %c0_158] : memref<1x3xf32, #tpu.memory_space<vmem>>, vector<1x3xf32>
    %689 = vector.broadcast %688 : vector<1x3xf32> to vector<6x3xf32>
    %690 = arith.addf %687, %689 : vector<6x3xf32>
    %c0_159 = arith.constant 0 : index
    %c0_160 = arith.constant 0 : index
    %691 = vector.load %arg3[%c0_159, %c0_160] : memref<6x1xf32, #tpu.memory_space<vmem>>, vector<6x1xf32>
    %cst_161 = arith.constant 0.000000e+00 : f32
    %692 = vector.broadcast %cst_161 : f32 to vector<6x3xf32>
    %693 = arith.maximumf %690, %692 : vector<6x3xf32>
    %694 = vector.broadcast %691 : vector<6x1xf32> to vector<6x3xf32>
    %695 = arith.mulf %690, %694 : vector<6x3xf32>
    %696 = arith.subf %693, %695 : vector<6x3xf32>
    %697 = math.absf %690 : vector<6x3xf32>
    %cst_162 = arith.constant 0.000000e+00 : f32
    %698 = vector.broadcast %cst_162 : f32 to vector<6x3xf32>
    %699 = arith.subf %698, %697 : vector<6x3xf32>
    %700 = math.exp %699 : vector<6x3xf32>
    %cst_163 = arith.constant 1.000000e+00 : f32
    %701 = vector.broadcast %cst_163 : f32 to vector<6x3xf32>
    %702 = arith.addf %701, %700 : vector<6x3xf32>
    %703 = math.log %702 : vector<6x3xf32>
    %704 = arith.addf %696, %703 : vector<6x3xf32>
    %c0_164 = arith.constant 0 : index
    %c0_165 = arith.constant 0 : index
    %705 = vector.load %arg4[%c0_164, %c0_165] : memref<6x3xf32, #tpu.memory_space<vmem>>, vector<6x3xf32>
    %706 = arith.mulf %704, %705 : vector<6x3xf32>
    %cst_166 = arith.constant dense<0.000000e+00> : vector<3xf32>
    %707 = vector.multi_reduction <add>, %706, %cst_166 [0] : vector<6x3xf32> to vector<3xf32>
    %708 = vector.shape_cast %707 : vector<3xf32> to vector<1x3xf32>
    %c0_167 = arith.constant 0 : index
    %c0_168 = arith.constant 0 : index
    %709 = vector.load %arg9[%c0_167, %c0_168] : memref<1x3xf32, #tpu.memory_space<vmem>>, vector<1x3xf32>
    tpu.vector_store %arg9[%c0_167, %c0_168], %708 {strides = array<i32>} : memref<1x3xf32, #tpu.memory_space<vmem>>, vector<1x3xf32>,
    return
  }
}

</mosaic_0001>

<bundles_post_ra>
// kernel: tpu_custom_call.1
= control target key start
LH: loop header
LB: loop body
LE: loop exit
PB: predicated region body
PF: predicated region fallthrough
CT: control target
= control target key end

     0   :  { %s4277_s0 = inlined_call_operand.vmem [shape: f32[6,8,256], index: 0, kind: input, shape index: {}]   ;;  %s4278_s1 = inlined_call_operand.vmem [shape: f32[6,8], index: 1, kind: input, shape index: {}]   ;;  %s4279_s2 = inlined_call_operand.vmem [shape: f32[6,8], index: 2, kind: input, shape index: {}]   ;;  %s4280_s3 = inlined_call_operand.vmem [shape: f32[6,1], index: 3, kind: input, shape index: {}]   ;;  %s4281_s4 = inlined_call_operand.vmem [shape: f32[6,3], index: 4, kind: input, shape index: {}]   ;;  %s4282_s5 = inlined_call_operand.vmem [shape: f32[256,96], index: 5, kind: input, shape index: {}]   ;;  %s4283_s6 = inlined_call_operand.vmem [shape: f32[1,96], index: 6, kind: input, shape index: {}]   ;;  %s4284_s7 = inlined_call_operand.vmem [shape: f32[96,3], index: 7, kind: input, shape index: {}]   ;;  %s4285_s8 = inlined_call_operand.vmem [shape: f32[1,3], index: 8, kind: input, shape index: {}]   ;;  %s4286_s9 = inlined_call_operand.hbm [shape: f32[1,3], index: 9, kind: output, shape index: {}]  }
   0x1   :  { %v33_v0 = vld [vmem:[%s4277_s0] sm:$0xff]  ;;  %v38_v2 = vld [vmem:[%s4277_s0 + $0x28] sm:$0xff]  ;;  %v36_v6 = vld [vmem:[%s4277_s0 + $0x18] sm:$0xff] }
   0x2   :  { %v37_v1 = vld [vmem:[%s4277_s0 + $0x20] sm:$0xff]  ;;  %61 = vmatpush.xpose.msra.mxu3 %v33_v0  ;;  %v34_v3 = vld [vmem:[%s4277_s0 + $0x8] sm:$0xff]  ;;  %161 = vmatpush.xpose.msra.mxu1 %v38_v2  ;;  %v35_v7 = vld [vmem:[%s4277_s0 + $0x10] sm:$0xff] }
   0x3   :  { %141 = vmatpush.xpose.msra.mxu0 %v37_v1  ;;  %v41_v4 = vld [vmem:[%s4277_s0 + $0x40] sm:$0xff]  ;;  %v42_v5 = vld [vmem:[%s4277_s0 + $0x48] sm:$0xff]  ;;  %v39_v8 = vld [vmem:[%s4277_s0 + $0x30] sm:$0xff] }
   0x5   :  { %62 = vmatmul.f32.vlgmr.msra.gmra.mxu3 %v33_v0 }
   0x6   :  { %81 = vmatpush.xpose.msrb.mxu3 %v34_v3  ;;  %241 = vmatpush.xpose.msrb.mxu1 %v42_v5 }
   0x7   :  { %221 = vmatpush.xpose.msrb.mxu0 %v41_v4 }
   0x8   :  { %142 = vmatmul.f32.vlgmr.msra.gmra.mxu0 %v37_v1 }
   0x9   :  { %14 = vsyncpa [#allocation3], 0  ;;  %162 = vmatmul.f32.vlgmr.msra.gmra.mxu1 %v38_v2  ;;  %101 = vmatpush.xpose.msra.mxu2 %v35_v7  ;;  %v43_v9 = vld [vmem:[%s4277_s0 + $0x50] sm:$0xff]  ;;  %v40_v10 = vld [vmem:[%s4277_s0 + $0x38] sm:$0xff]  ;;  %v286_v12 = vlaneseq  ;;  %v2602_v15 = vmov 0.0   ;;  %vm292_vm1 = vcmask 64512  }
   0xa   :  { %121 = vmatpush.xpose.msra.mxu3 %v36_v6  ;;  %v44_v11 = vld [vmem:[%s4277_s0 + $0x58] sm:$0xff]  ;;  %v2698_v14 = vld [vmem:[%s4279_s2] sm:$0x3f]  ;;  %vm296_vm2 = vcmask 62464   ;;  %vm396_vm3 = vcmask 1041409   ;;  %vm398_vm4 = vcmask 1042434  }
   0xb   :  { %v2692_v13 = vand.u32 127, %v286_v12  ;;  %v344_v17 = vrot.slane %v2698_v14, 2  ;;  %v346_v26 = vrot.slane %v2698_v14, 4  ;;  %v348_v35 = vperm.slane %v2698_v14, 0  ;;  %s2514_s21 = sshll.u32 %s4286_s9, 4  ;;  %s2515_s21 = int_to_ptr.hbm [resolvable:$true] %s2514_s21 }
   0xc   :  { %102 = vmatmul.f32.vlgmr.msra.gmra.mxu2 %v35_v7  ;;  %v343_v44 = vrot.slane %v2698_v14, 1  ;;  %v345_v56 = vrot.slane %v2698_v14, 3  ;;  %v347_v2 = vrot.slane %v2698_v14, 5  ;;  %vm4289_vm5 = vcmask 1043459  }
   0xd   :  { %181 = vmatpush.xpose.msrb.mxu2 %v39_v8  ;;  %82 = vmatmul.f32.vlgmr.msrb.gmra.mxu3 %v34_v3  ;;  %vm288_vm0 = vcmp.eq.s32.totalorder %v2692_v13, 0  ;;  %v350_v20 = vperm.slane %v344_v17, 0  ;;  %v352_v31 = vperm.slane %v346_v26, 0  ;;  %vm4288_vm6 = vcmask 1044484  }
   0xe   :  { %201 = vmatpush.xpose.msrb.mxu3 %v40_v10  ;;  %v2701_v16 = vsel %vm288_vm0, 1.0, %v2602_v15  ;;  %v349_v49 = vperm.slane %v343_v44, 0  ;;  %v351_v61 = vperm.slane %v345_v56, 0  ;;  %v353_v7 = vperm.slane %v347_v2, 0 }
   0xf   :  { %v302_v18 = vrot.slane %v2701_v16, 2  ;;  %v306_v38 = vperm.slane %v2701_v16, 0  ;;  %v304_v41 = vrot.slane %v2701_v16, 4  ;;  %v301_v43 = vrot.slane %v2701_v16, 1 }
  0x10   :  { %222 = vmatmul.f32.vlgmr.msrb.gmra.mxu0 %v41_v4  ;;  %v303_v0 = vrot.slane %v2701_v16, 3  ;;  %vm4287_vm7 = vcmask 1045509  }
  0x11   :  { %261 = vmatpush.xpose.msra.mxu2 %v43_v9  ;;  %242 = vmatmul.f32.vlgmr.msrb.gmra.mxu1 %v42_v5  ;;  %v308_v21 = vperm.slane %v302_v18, 0  ;;  %v310_v47 = vperm.slane %v304_v41, 0  ;;  %v307_v48 = vperm.slane %v301_v43, 0 }
  0x12   :  { %v309_v4 = vperm.slane %v303_v0, 0 }
  0x14   :  { %182 = vmatmul.f32.vlgmr.msrb.gmra.mxu2 %v39_v8 }
  0x15   :  { %122 = vmatmul.f32.vlgmr.msra.gmra.mxu3 %v36_v6  ;;  %v297_v6 = vsel %vm296_vm2, %v2698_v14, 0.0 }
  0x16   :  { %281 = vmatpush.xpose.msra.mxu3 %v44_v11 }
  0x1c   :  { %262 = vmatmul.f32.vlgmr.msra.gmra.mxu2 %v43_v9 }
  0x1d   :  { %202 = vmatmul.f32.vlgmr.msrb.gmra.mxu3 %v40_v10 }
  0x25   :  { %282 = vmatmul.f32.vlgmr.msra.gmra.mxu3 %v44_v11  ;;  %v305_v11 = vrot.slane %v2701_v16, 5 }
  0x85   :  { %v143_v19 = vpop.f32.mrf.mxu0 }
  0x86   :  { %v163_v22 = vpop.f32.mrf.mxu1 }
  0x87   :  { %v2705_v23 = vadd.f32 %v163_v22, %v143_v19  ;;  %v293_v22 = vsel %vm292_vm1, %v2701_v16, 0.0 }
  0x88   :  { %v63_v28 = vpop.f32.mrf.mxu3 }
  0x89   :  { %v362_v24 = vmul.f32 %v350_v20, %v2705_v23  ;;  %v320_v25 = vmul.f32 %v308_v21, %v2705_v23  ;;  %v311_v20 = vperm.slane %v305_v11, 0 }
  0x8b   :  { %v372_v27 = vsel %vm292_vm1, %v362_v24, 0.0  ;;  %v330_v29 = vsel %vm292_vm1, %v320_v25, 0.0 }
  0x8c   :  { %373 = vadd.xlane.f32.xlu1 %v372_v27  ;;  %331 = vadd.xlane.f32.xlu0 %v330_v29 }
  0x8d   :  { %v223_v30 = vpop.f32.mrf.mxu0 }
  0x8e   :  { %v243_v32 = vpop.f32.mrf.mxu1 }
  0x8f   :  { %v2712_v33 = vadd.f32 %v243_v32, %v223_v30  ;;  %v103_v40 = vpop.f32.mrf.mxu2 }
  0x90   :  { %v83_v37 = vpop.f32.mrf.mxu3 }
  0x91   :  { %v364_v34 = vmul.f32 %v352_v31, %v2712_v33  ;;  %v2718_v39 = vadd.f32 %v83_v37, %v63_v28  ;;  %v322_v53 = vmul.f32 %v310_v47, %v2712_v33 }
  0x93   :  { %v378_v36 = vsel %vm292_vm1, %v364_v34, 0.0  ;;  %v360_v42 = vmul.f32 %v348_v35, %v2718_v39  ;;  %v318_v45 = vmul.f32 %v306_v38, %v2718_v39  ;;  %v336_v60 = vsel %vm292_vm1, %v322_v53, 0.0 }
  0x94   :  { %379 = vadd.xlane.f32.xlu1 %v378_v36 }
  0x95   :  { %v366_v46 = vsel %vm292_vm1, %v360_v42, 0.0  ;;  %v324_v51 = vsel %vm292_vm1, %v318_v45, 0.0 }
  0x96   :  { %367 = vadd.xlane.f32.xlu0 %v366_v46 }
  0x97   :  { %v183_v57 = vpop.f32.mrf.mxu2 }
  0x98   :  { %v123_v50 = vpop.f32.mrf.mxu3 }
  0x99   :  { %v2727_v52 = vadd.f32 %v123_v50, %v103_v40 }
  0x9b   :  { %v319_v54 = vmul.f32 %v307_v48, %v2727_v52  ;;  %v361_v55 = vmul.f32 %v349_v49, %v2727_v52 }
  0x9c   :  { %325 = vadd.xlane.f32.xlu1 %v324_v51 }
  0x9d   :  { %v327_v58 = vsel %vm292_vm1, %v319_v54, 0.0  ;;  %v369_v59 = vsel %vm292_vm1, %v361_v55, 0.0 }
  0x9e   :  { %328 = vadd.xlane.f32.xlu2 %v327_v58  ;;  %370 = vadd.xlane.f32.xlu0 %v369_v59 }
  0x9f   :  { %v263_v5 = vpop.f32.mrf.mxu2 }
  0xa0   :  { %v203_v62 = vpop.f32.mrf.mxu3 }
  0xa1   :  { %v2736_v63 = vadd.f32 %v203_v62, %v183_v57 }
  0xa3   :  { %v363_v1 = vmul.f32 %v351_v61, %v2736_v63  ;;  %v321_v10 = vmul.f32 %v309_v4, %v2736_v63 }
  0xa4   :  { %337 = vadd.xlane.f32.xlu1 %v336_v60 }
  0xa5   :  { %v375_v3 = vsel %vm292_vm1, %v363_v1, 0.0  ;;  %v333_v18 = vsel %vm292_vm1, %v321_v10, 0.0 }
  0xa6   :  { %376 = vadd.xlane.f32.xlu2 %v375_v3 }
  0xa8   :  { %v283_v8 = vpop.f32.mrf.mxu3 }
  0xa9   :  { %v2744_v9 = vadd.f32 %v283_v8, %v263_v5 }
  0xab   :  { %v365_v17 = vmul.f32 %v353_v7, %v2744_v9  ;;  %v323_v21 = vmul.f32 %v311_v20, %v2744_v9 }
  0xac   :  { %298 = vadd.xlane.f32.xlu1 %v297_v6 }
  0xad   :  { %v381_v19 = vsel %vm292_vm1, %v365_v17, 0.0  ;;  %v339_v24 = vsel %vm292_vm1, %v323_v21, 0.0 }
  0xae   :  { %334 = vadd.xlane.f32.xlu2 %v333_v18  ;;  %382 = vadd.xlane.f32.xlu0 %v381_v19 }
  0xb6   :  { %340 = vadd.xlane.f32.xlu2 %v339_v24  ;;  %294 = vadd.xlane.f32.xlu0 %v293_v22 }
  0xff   :  { %v332_v25 = vpop.xlane.xlu0 %331  ;;  %v374_v26 = vpop.xlane.xlu1 %373 }
 0x100   :  { %v419_v38 = vperm.slane %v374_v26, %v2692_v13  ;;  %v392_v54 = vperm.slane %v332_v25, %v2692_v13 }
 0x107   :  { %v380_v28 = vpop.xlane.xlu1 %379 }
 0x108   :  { %v421_v44 = vperm.slane %v380_v28, %v2692_v13  ;;  %v2796_v28 = vld [vmem:[%s4278_s1] sm:$0x3f] }
 0x109   :  { %v368_v27 = vpop.xlane.xlu0 %367 }
 0x10a   :  { %v417_v35 = vperm.slane %v368_v27, %v2692_v13 }
 0x10f   :  { %v326_v31 = vpop.xlane.xlu1 %325 }
 0x110   :  { %v390_v47 = vperm.slane %v326_v31, %v2692_v13 }
 0x111   :  { %v329_v29 = vpop.xlane.xlu2 %328  ;;  %v371_v30 = vpop.xlane.xlu0 %370 }
 0x112   :  { %v418_v32 = vperm.slane %v371_v30, %v2692_v13  ;;  %v391_v42 = vperm.slane %v329_v29, %v2692_v13 }
 0x114   :  { %v423_v36 = vsel %vm396_vm3, %v418_v32, %v417_v35  ;;  %v397_v50 = vsel %vm396_vm3, %v391_v42, %v390_v47 }
 0x115   :  { %v424_v41 = vsel %vm398_vm4, %v419_v38, %v423_v36  ;;  %v399_v56 = vsel %vm398_vm4, %v392_v54, %v397_v50 }
 0x117   :  { %v338_v40 = vpop.xlane.xlu1 %337 }
 0x118   :  { %v394_v60 = vperm.slane %v338_v40, %v2692_v13 }
 0x119   :  { %v377_v34 = vpop.xlane.xlu2 %376 }
 0x11a   :  { %v420_v37 = vperm.slane %v377_v34, %v2692_v13 }
 0x11c   :  { %v425_v43 = vsel %vm4289_vm5, %v420_v37, %v424_v41 }
 0x11d   :  { %v426_v49 = vsel %vm4288_vm6, %v421_v44, %v425_v43 }
 0x11f   :  { %v2774_v58 = vpop.xlane.xlu1 %298 }
 0x120   :  { %v444_v22 = vmul.f32 %v2774_v58, %v2774_v58 }
 0x121   :  { %v335_v45 = vpop.xlane.xlu2 %334  ;;  %v383_v46 = vpop.xlane.xlu0 %382 }
 0x122   :  { %v422_v48 = vperm.slane %v383_v46, %v2692_v13  ;;  %v393_v51 = vperm.slane %v335_v45, %v2692_v13 }
 0x124   :  { %v427_v53 = vsel %vm4287_vm7, %v422_v48, %v426_v49  ;;  %v401_v59 = vsel %vm4289_vm5, %v393_v51, %v399_v56 }
 0x125   :  { %v429_v55 = vmul.f32 %v427_v53, %v2698_v14  ;;  %v403_v3 = vsel %vm4288_vm6, %v394_v60, %v401_v59 }
 0x127   :  { %v430_v57 = vsel %vm296_vm2, %v429_v55, 0.0 }
 0x128   :  { %431 = vadd.xlane.f32.xlu2 %v430_v57 }
 0x129   :  { %v341_v61 = vpop.xlane.xlu2 %340  ;;  %v2778_v62 = vpop.xlane.xlu0 %294 }
 0x12a   :  { %v395_v0 = vperm.slane %v341_v61, %v2692_v13  ;;  %v433_v1 = vmul.f32 %v2774_v58, %v2778_v62  ;;  %v437_v2 = vmul.f32 %v2778_v62, %v2778_v62 }
 0x12c   :  { %v405_v4 = vsel %vm4287_vm7, %v395_v0, %v403_v3  ;;  %v434_v5 = vmul.f32 %v433_v1, %v2774_v58  ;;  %v438_v6 = vmul.f32 %v437_v2, %v2774_v58 }
 0x12d   :  { %v407_v7 = vmul.f32 %v2701_v16, %v405_v4 }
 0x12e   :  { %v435_v8 = vmul.f32 2.0, %v434_v5  ;;  %v439_v10 = vmul.f32 2.0, %v438_v6 }
 0x12f   :  { %v408_v11 = vsel %vm296_vm2, %v407_v7, 0.0 }
 0x130   :  { %409 = vadd.xlane.f32.xlu0 %v408_v11  ;;  %v436_v17 = vmul.f32 %v435_v8, %v405_v4  ;;  %v440_v18 = vmul.f32 %v439_v10, %v427_v53 }
 0x132   :  { %v441_v19 = vsub.f32 %v436_v17, %v440_v18 }
 0x19b   :  { %v432_v20 = vpop.xlane.xlu2 %431 }
 0x19c   :  { %v442_v21 = vmul.f32 %v437_v2, %v432_v20 }
 0x19e   :  { %v443_v25 = vadd.f32 %v442_v21, %v441_v19 }
 0x1a3   :  { %v410_v24 = vpop.xlane.xlu0 %409 }
 0x1a4   :  { %v445_v26 = vmul.f32 %v444_v22, %v410_v24 }
 0x1a6   :  { %v446_v27 = vsub.f32 %v443_v25, %v445_v26 }
 0x1a8   :  { %vm447_vm8 = vcmp.lt.f32.partialorder %v446_v27, 0.0 }
 0x1a9   :  { %v2524_v29 = vsel %vm447_vm8, 1.0, %v2602_v15 }
 0x1aa   :  { %v450_v30 = vmul.f32 %v2524_v29, %v2796_v28 }
 0x1ac   :  { %v452_v31 = vsel %vm296_vm2, %v450_v30, 0.0  ;;  %v451_v32 = vsub.f32 %v2796_v28, %v450_v30 }
 0x1ad   :  { %453 = vadd.xlane.f32.xlu1 %v452_v31 }
 0x1ae   :  { %v455_v34 = vsel %vm296_vm2, %v451_v32, 0.0 }
 0x1af   :  { %456 = vadd.xlane.f32.xlu2 %v455_v34 }
 0x220   :  { %v2803_v35 = vpop.xlane.xlu1 %453 }
 0x221   :  { %vm463_vm9 = vcmp.gt.f32.partialorder %v2803_v35, 0.0 }
 0x222   :  { %v2809_v36 = vsel %vm463_vm9, %v450_v30, %v2698_v14  ;;  %v2811_v37 = vpop.xlane.xlu2 %456 }
 0x223   :  { %vm458_vm10 = vcmp.gt.f32.partialorder %v2811_v37, 0.0  ;;  %v516_v38 = vperm.slane %v2809_v36, 0  ;;  %v511_v40 = vrot.slane %v2809_v36, 1  ;;  %v512_v41 = vrot.slane %v2809_v36, 2 }
 0x224   :  { %v2820_v42 = vsel %vm458_vm10, %v451_v32, %v2701_v16  ;;  %v514_v43 = vrot.slane %v2809_v36, 4  ;;  %v513_v46 = vrot.slane %v2809_v36, 3  ;;  %v515_v7 = vrot.slane %v2809_v36, 5 }
 0x225   :  { %v528_v14 = vmul.f32 %v516_v38, %v2718_v39  ;;  %v517_v44 = vperm.slane %v511_v40, 0  ;;  %v518_v45 = vperm.slane %v512_v41, 0  ;;  %v474_v50 = vperm.slane %v2820_v42, 0 }
 0x226   :  { %v520_v53 = vperm.slane %v514_v43, 0  ;;  %v519_v54 = vperm.slane %v513_v46, 0  ;;  %v470_v56 = vrot.slane %v2820_v42, 2  ;;  %v471_v60 = vrot.slane %v2820_v42, 3 }
 0x227   :  { %v534_v47 = vsel %vm292_vm1, %v528_v14, 0.0  ;;  %v529_v48 = vmul.f32 %v517_v44, %v2727_v52  ;;  %v530_v49 = vmul.f32 %v518_v45, %v2705_v23  ;;  %v486_v55 = vmul.f32 %v474_v50, %v2718_v39 }
 0x228   :  { %535 = vadd.xlane.f32.xlu0 %v534_v47  ;;  %v532_v57 = vmul.f32 %v520_v53, %v2712_v33  ;;  %v531_v59 = vmul.f32 %v519_v54, %v2736_v63  ;;  %v469_v61 = vrot.slane %v2820_v42, 1  ;;  %v476_v1 = vperm.slane %v470_v56, 0 }
 0x229   :  { %v537_v16 = vsel %vm292_vm1, %v529_v48, 0.0  ;;  %v540_v51 = vsel %vm292_vm1, %v530_v49, 0.0  ;;  %v492_v0 = vsel %vm292_vm1, %v486_v55, 0.0  ;;  %v477_v4 = vperm.slane %v471_v60, 0 }
 0x22a   :  { %538 = vadd.xlane.f32.xlu1 %v537_v16  ;;  %541 = vadd.xlane.f32.xlu2 %v540_v51  ;;  %v546_v2 = vsel %vm292_vm1, %v532_v57, 0.0  ;;  %v543_v3 = vsel %vm292_vm1, %v531_v59, 0.0  ;;  %v475_v5 = vperm.slane %v469_v61, 0  ;;  %v488_v6 = vmul.f32 %v476_v1, %v2705_v23 }
 0x22b   :  { %v489_v8 = vmul.f32 %v477_v4, %v2736_v63  ;;  %v473_v11 = vrot.slane %v2820_v42, 5  ;;  %v472_v17 = vrot.slane %v2820_v42, 4  ;;  %v521_v19 = vperm.slane %v515_v7, 0 }
 0x22c   :  { %v487_v10 = vmul.f32 %v475_v5, %v2727_v52  ;;  %v498_v18 = vsel %vm292_vm1, %v488_v6, 0.0  ;;  %v2861_v46 = vsel %vm458_vm10, %v2811_v37, %v2778_v62  ;;  %v2871_v53 = vsel %vm463_vm9, %v2803_v35, %v2774_v58 }
 0x22d   :  { %v501_v20 = vsel %vm292_vm1, %v489_v8, 0.0  ;;  %v479_v22 = vperm.slane %v473_v11, 0  ;;  %v478_v24 = vperm.slane %v472_v17, 0  ;;  %v533_v25 = vmul.f32 %v521_v19, %v2744_v9 }
 0x22e   :  { %v495_v21 = vsel %vm292_vm1, %v487_v10, 0.0  ;;  %v596_v62 = vmul.f32 %v2871_v53, %v2861_v46  ;;  %v600_v37 = vmul.f32 %v2861_v46, %v2861_v46 }
 0x22f   :  { %v491_v26 = vmul.f32 %v479_v22, %v2744_v9  ;;  %v490_v27 = vmul.f32 %v478_v24, %v2712_v33  ;;  %v549_v29 = vsel %vm292_vm1, %v533_v25, 0.0 }
 0x230   :  { %493 = vadd.xlane.f32.xlu0 %v492_v0  ;;  %v597_v0 = vmul.f32 %v596_v62, %v2871_v53  ;;  %v601_v1 = vmul.f32 %v600_v37, %v2871_v53 }
 0x231   :  { %v507_v30 = vsel %vm292_vm1, %v491_v26, 0.0  ;;  %v504_v31 = vsel %vm292_vm1, %v490_v27, 0.0 }
 0x232   :  { %547 = vadd.xlane.f32.xlu1 %v546_v2  ;;  %544 = vadd.xlane.f32.xlu2 %v543_v3  ;;  %v602_v19 = vmul.f32 2.0, %v601_v1 }
 0x238   :  { %499 = vadd.xlane.f32.xlu0 %v498_v18  ;;  %v598_v18 = vmul.f32 2.0, %v597_v0 }
 0x23a   :  { %502 = vadd.xlane.f32.xlu2 %v501_v20  ;;  %496 = vadd.xlane.f32.xlu1 %v495_v21 }
 0x240   :  { %550 = vadd.xlane.f32.xlu0 %v549_v29 }
 0x242   :  { %508 = vadd.xlane.f32.xlu2 %v507_v30  ;;  %505 = vadd.xlane.f32.xlu1 %v504_v31  ;;  %v607_v31 = vmul.f32 %v2871_v53, %v2871_v53 }
 0x29b   :  { %v536_v32 = vpop.xlane.xlu0 %535 }
 0x29c   :  { %v580_v45 = vperm.slane %v536_v32, %v2692_v13 }
 0x29d   :  { %v539_v34 = vpop.xlane.xlu1 %538  ;;  %v542_v38 = vpop.xlane.xlu2 %541 }
 0x29e   :  { %v581_v14 = vperm.slane %v539_v34, %v2692_v13  ;;  %v582_v47 = vperm.slane %v542_v38, %v2692_v13 }
 0x2a0   :  { %v586_v50 = vsel %vm396_vm3, %v581_v14, %v580_v45 }
 0x2a1   :  { %v587_v55 = vsel %vm398_vm4, %v582_v47, %v586_v50 }
 0x2a3   :  { %v494_v40 = vpop.xlane.xlu0 %493 }
 0x2a4   :  { %v558_v54 = vperm.slane %v494_v40, %v2692_v13 }
 0x2a5   :  { %v548_v41 = vpop.xlane.xlu1 %547  ;;  %v545_v43 = vpop.xlane.xlu2 %544 }
 0x2a6   :  { %v583_v16 = vperm.slane %v545_v43, %v2692_v13  ;;  %v584_v56 = vperm.slane %v548_v41, %v2692_v13 }
 0x2a8   :  { %v588_v59 = vsel %vm4289_vm5, %v583_v16, %v587_v55 }
 0x2a9   :  { %v589_v5 = vsel %vm4288_vm6, %v584_v56, %v588_v59 }
 0x2ab   :  { %v500_v44 = vpop.xlane.xlu0 %499 }
 0x2ac   :  { %v560_v60 = vperm.slane %v500_v44, %v2692_v13 }
 0x2ad   :  { %v497_v48 = vpop.xlane.xlu1 %496  ;;  %v503_v49 = vpop.xlane.xlu2 %502 }
 0x2ae   :  { %v559_v51 = vperm.slane %v497_v48, %v2692_v13  ;;  %v561_v2 = vperm.slane %v503_v49, %v2692_v13 }
 0x2b0   :  { %v564_v57 = vsel %vm396_vm3, %v559_v51, %v558_v54 }
 0x2b1   :  { %v565_v35 = vsel %vm398_vm4, %v560_v60, %v564_v57 }
 0x2b2   :  { %v566_v10 = vsel %vm4289_vm5, %v561_v2, %v565_v35 }
 0x2b3   :  { %v551_v58 = vpop.xlane.xlu0 %550 }
 0x2b4   :  { %v585_v61 = vperm.slane %v551_v58, %v2692_v13 }
 0x2b5   :  { %v506_v3 = vpop.xlane.xlu1 %505  ;;  %v509_v4 = vpop.xlane.xlu2 %508 }
 0x2b6   :  { %v562_v6 = vperm.slane %v506_v3, %v2692_v13  ;;  %v563_v7 = vperm.slane %v509_v4, %v2692_v13  ;;  %v590_v8 = vsel %vm4287_vm7, %v585_v61, %v589_v5 }
 0x2b7   :  { %v592_v11 = vmul.f32 %v590_v8, %v2809_v36  ;;  %v603_v25 = vmul.f32 %v602_v19, %v590_v8 }
 0x2b8   :  { %v567_v17 = vsel %vm4288_vm6, %v562_v6, %v566_v10 }
 0x2b9   :  { %v593_v20 = vsel %vm296_vm2, %v592_v11, 0.0  ;;  %v568_v21 = vsel %vm4287_vm7, %v563_v7, %v567_v17 }
 0x2ba   :  { %594 = vadd.xlane.f32.xlu0 %v593_v20  ;;  %v570_v22 = vmul.f32 %v568_v21, %v2820_v42  ;;  %v599_v24 = vmul.f32 %v598_v18, %v568_v21 }
 0x2bc   :  { %v571_v26 = vsel %vm296_vm2, %v570_v22, 0.0  ;;  %v604_v27 = vsub.f32 %v599_v24, %v603_v25 }
 0x2bd   :  { %572 = vadd.xlane.f32.xlu1 %v571_v26 }
 0x32d   :  { %v595_v29 = vpop.xlane.xlu0 %594 }
 0x32e   :  { %v605_v30 = vmul.f32 %v600_v37, %v595_v29 }
 0x330   :  { %v606_v32 = vadd.f32 %v605_v30, %v604_v27  ;;  %v573_v34 = vpop.xlane.xlu1 %572 }
 0x331   :  { %v608_v38 = vmul.f32 %v607_v31, %v573_v34 }
 0x333   :  { %v609_v40 = vsub.f32 %v606_v32, %v608_v38 }
 0x335   :  { %vm610_vm11 = vcmp.lt.f32.partialorder %v609_v40, 0.0 }
 0x336   :  { %v2525_v41 = vsel %vm610_vm11, 1.0, %v2602_v15 }
 0x337   :  { %v613_v43 = vmul.f32 %v2525_v41, %v2796_v28 }
 0x339   :  { %v615_v14 = vsel %vm296_vm2, %v613_v43, 0.0  ;;  %v614_v44 = vsub.f32 %v2796_v28, %v613_v43 }
 0x33a   :  { %616 = vadd.xlane.f32.xlu2 %v615_v14 }
 0x33b   :  { %v618_v45 = vsel %vm296_vm2, %v614_v44, 0.0 }
 0x33c   :  { %619 = vadd.xlane.f32.xlu0 %v618_v45 }
 0x3ad   :  { %v2906_v47 = vpop.xlane.xlu2 %616 }
 0x3ae   :  { %vm626_vm12 = vcmp.gt.f32.partialorder %v2906_v47, 0.0 }
 0x3af   :  { %v2912_v48 = vsel %vm626_vm12, %v613_v43, %v2809_v36  ;;  %v2914_v49 = vpop.xlane.xlu0 %619 }
 0x3b0   :  { %vm621_vm13 = vcmp.gt.f32.partialorder %v2914_v49, 0.0  ;;  %v679_v50 = vperm.slane %v2912_v48, 0  ;;  %v674_v16 = vrot.slane %v2912_v48, 1  ;;  %v675_v51 = vrot.slane %v2912_v48, 2 }
 0x3b1   :  { %v2923_v54 = vsel %vm621_vm13, %v614_v44, %v2820_v42  ;;  %v677_v62 = vrot.slane %v2912_v48, 4  ;;  %v676_v56 = vrot.slane %v2912_v48, 3  ;;  %v678_v20 = vrot.slane %v2912_v48, 5 }
 0x3b2   :  { %v691_v36 = vmul.f32 %v679_v50, %v2718_v39  ;;  %v680_v37 = vperm.slane %v674_v16, 0  ;;  %v681_v55 = vperm.slane %v675_v51, 0  ;;  %v637_v58 = vperm.slane %v2923_v54, 0 }
 0x3b3   :  { %v683_v61 = vperm.slane %v677_v62, 0  ;;  %v682_v0 = vperm.slane %v676_v56, 0  ;;  %v633_v2 = vrot.slane %v2923_v54, 2  ;;  %v634_v5 = vrot.slane %v2923_v54, 3 }
 0x3b4   :  { %v697_v57 = vsel %vm292_vm1, %v691_v36, 0.0  ;;  %v692_v59 = vmul.f32 %v680_v37, %v2727_v52  ;;  %v693_v60 = vmul.f32 %v681_v55, %v2705_v23  ;;  %v649_v1 = vmul.f32 %v637_v58, %v2718_v39 }
 0x3b5   :  { %698 = vadd.xlane.f32.xlu1 %v697_v57  ;;  %v695_v3 = vmul.f32 %v683_v61, %v2712_v33  ;;  %v694_v4 = vmul.f32 %v682_v0, %v2736_v63  ;;  %v632_v6 = vrot.slane %v2923_v54, 1  ;;  %v639_v8 = vperm.slane %v633_v2, 0 }
 0x3b6   :  { %v700_v42 = vsel %vm292_vm1, %v692_v59, 0.0  ;;  %v703_v35 = vsel %vm292_vm1, %v693_v60, 0.0  ;;  %v655_v7 = vsel %vm292_vm1, %v649_v1, 0.0  ;;  %v640_v17 = vperm.slane %v634_v5, 0 }
 0x3b7   :  { %701 = vadd.xlane.f32.xlu2 %v700_v42  ;;  %704 = vadd.xlane.f32.xlu0 %v703_v35  ;;  %v709_v10 = vsel %vm292_vm1, %v695_v3, 0.0  ;;  %v706_v11 = vsel %vm292_vm1, %v694_v4, 0.0  ;;  %v638_v18 = vperm.slane %v632_v6, 0  ;;  %v651_v19 = vmul.f32 %v639_v8, %v2705_v23 }
 0x3b8   :  { %v652_v21 = vmul.f32 %v640_v17, %v2736_v63  ;;  %v636_v24 = vrot.slane %v2923_v54, 5  ;;  %v635_v25 = vrot.slane %v2923_v54, 4  ;;  %v684_v27 = vperm.slane %v678_v20, 0 }
 0x3b9   :  { %v650_v22 = vmul.f32 %v638_v18, %v2727_v52  ;;  %v661_v26 = vsel %vm292_vm1, %v651_v19, 0.0  ;;  %v2964_v56 = vsel %vm621_vm13, %v2914_v49, %v2861_v46  ;;  %v2974_v61 = vsel %vm626_vm12, %v2906_v47, %v2871_v53 }
 0x3ba   :  { %v664_v29 = vsel %vm292_vm1, %v652_v21, 0.0  ;;  %v642_v31 = vperm.slane %v636_v24, 0  ;;  %v641_v32 = vperm.slane %v635_v25, 0  ;;  %v696_v34 = vmul.f32 %v684_v27, %v2744_v9 }
 0x3bb   :  { %v658_v30 = vsel %vm292_vm1, %v650_v22, 0.0  ;;  %v759_v46 = vmul.f32 %v2974_v61, %v2964_v56  ;;  %v763_v49 = vmul.f32 %v2964_v56, %v2964_v56 }
 0x3bc   :  { %v654_v38 = vmul.f32 %v642_v31, %v2744_v9  ;;  %v653_v40 = vmul.f32 %v641_v32, %v2712_v33  ;;  %v712_v41 = vsel %vm292_vm1, %v696_v34, 0.0 }
 0x3bd   :  { %656 = vadd.xlane.f32.xlu1 %v655_v7  ;;  %v760_v7 = vmul.f32 %v759_v46, %v2974_v61  ;;  %v764_v8 = vmul.f32 %v763_v49, %v2974_v61 }
 0x3be   :  { %v670_v43 = vsel %vm292_vm1, %v654_v38, 0.0  ;;  %v667_v14 = vsel %vm292_vm1, %v653_v40, 0.0 }
 0x3bf   :  { %710 = vadd.xlane.f32.xlu2 %v709_v10  ;;  %707 = vadd.xlane.f32.xlu0 %v706_v11  ;;  %v765_v27 = vmul.f32 2.0, %v764_v8 }
 0x3c5   :  { %662 = vadd.xlane.f32.xlu1 %v661_v26  ;;  %v761_v26 = vmul.f32 2.0, %v760_v7 }
 0x3c7   :  { %665 = vadd.xlane.f32.xlu0 %v664_v29  ;;  %659 = vadd.xlane.f32.xlu2 %v658_v30 }
 0x3cd   :  { %713 = vadd.xlane.f32.xlu1 %v712_v41 }
 0x3cf   :  { %671 = vadd.xlane.f32.xlu0 %v670_v43  ;;  %668 = vadd.xlane.f32.xlu2 %v667_v14  ;;  %v770_v14 = vmul.f32 %v2974_v61, %v2974_v61 }
 0x428   :  { %v699_v44 = vpop.xlane.xlu1 %698 }
 0x429   :  { %v743_v55 = vperm.slane %v699_v44, %v2692_v13 }
 0x42a   :  { %v702_v45 = vpop.xlane.xlu2 %701  ;;  %v705_v50 = vpop.xlane.xlu0 %704 }
 0x42b   :  { %v744_v36 = vperm.slane %v702_v45, %v2692_v13  ;;  %v745_v57 = vperm.slane %v705_v50, %v2692_v13 }
 0x42d   :  { %v749_v58 = vsel %vm396_vm3, %v744_v36, %v743_v55 }
 0x42e   :  { %v750_v1 = vsel %vm398_vm4, %v745_v57, %v749_v58 }
 0x430   :  { %v657_v16 = vpop.xlane.xlu1 %656 }
 0x431   :  { %v721_v0 = vperm.slane %v657_v16, %v2692_v13 }
 0x432   :  { %v711_v51 = vpop.xlane.xlu2 %710  ;;  %v708_v62 = vpop.xlane.xlu0 %707 }
 0x433   :  { %v746_v42 = vperm.slane %v708_v62, %v2692_v13  ;;  %v747_v2 = vperm.slane %v711_v51, %v2692_v13 }
 0x435   :  { %v751_v4 = vsel %vm4289_vm5, %v746_v42, %v750_v1 }
 0x436   :  { %v752_v18 = vsel %vm4288_vm6, %v747_v2, %v751_v4 }
 0x438   :  { %v663_v37 = vpop.xlane.xlu1 %662 }
 0x439   :  { %v723_v5 = vperm.slane %v663_v37, %v2692_v13 }
 0x43a   :  { %v660_v59 = vpop.xlane.xlu2 %659  ;;  %v666_v60 = vpop.xlane.xlu0 %665 }
 0x43b   :  { %v722_v35 = vperm.slane %v660_v59, %v2692_v13  ;;  %v724_v10 = vperm.slane %v666_v60, %v2692_v13 }
 0x43d   :  { %v727_v3 = vsel %vm396_vm3, %v722_v35, %v721_v0 }
 0x43e   :  { %v728_v47 = vsel %vm398_vm4, %v723_v5, %v727_v3 }
 0x43f   :  { %v729_v22 = vsel %vm4289_vm5, %v724_v10, %v728_v47 }
 0x440   :  { %v714_v53 = vpop.xlane.xlu1 %713 }
 0x441   :  { %v748_v6 = vperm.slane %v714_v53, %v2692_v13 }
 0x442   :  { %v669_v11 = vpop.xlane.xlu2 %668  ;;  %v672_v17 = vpop.xlane.xlu0 %671 }
 0x443   :  { %v725_v19 = vperm.slane %v669_v11, %v2692_v13  ;;  %v726_v20 = vperm.slane %v672_v17, %v2692_v13  ;;  %v753_v21 = vsel %vm4287_vm7, %v748_v6, %v752_v18 }
 0x444   :  { %v755_v24 = vmul.f32 %v753_v21, %v2912_v48  ;;  %v766_v34 = vmul.f32 %v765_v27, %v753_v21 }
 0x445   :  { %v730_v25 = vsel %vm4288_vm6, %v725_v19, %v729_v22 }
 0x446   :  { %v756_v29 = vsel %vm296_vm2, %v755_v24, 0.0  ;;  %v731_v30 = vsel %vm4287_vm7, %v726_v20, %v730_v25 }
 0x447   :  { %757 = vadd.xlane.f32.xlu1 %v756_v29  ;;  %v733_v31 = vmul.f32 %v731_v30, %v2923_v54  ;;  %v762_v32 = vmul.f32 %v761_v26, %v731_v30 }
 0x449   :  { %v734_v38 = vsel %vm296_vm2, %v733_v31, 0.0  ;;  %v767_v40 = vsub.f32 %v762_v32, %v766_v34 }
 0x44a   :  { %735 = vadd.xlane.f32.xlu2 %v734_v38 }
 0x4ba   :  { %v758_v41 = vpop.xlane.xlu1 %757 }
 0x4bb   :  { %v768_v43 = vmul.f32 %v763_v49, %v758_v41 }
 0x4bd   :  { %v769_v44 = vadd.f32 %v768_v43, %v767_v40  ;;  %v736_v45 = vpop.xlane.xlu2 %735 }
 0x4be   :  { %v771_v50 = vmul.f32 %v770_v14, %v736_v45 }
 0x4c0   :  { %v772_v16 = vsub.f32 %v769_v44, %v771_v50 }
 0x4c2   :  { %vm773_vm14 = vcmp.lt.f32.partialorder %v772_v16, 0.0 }
 0x4c3   :  { %v2526_v51 = vsel %vm773_vm14, 1.0, %v2602_v15 }
 0x4c4   :  { %v776_v62 = vmul.f32 %v2526_v51, %v2796_v28 }
 0x4c6   :  { %v778_v36 = vsel %vm296_vm2, %v776_v62, 0.0  ;;  %v777_v37 = vsub.f32 %v2796_v28, %v776_v62 }
 0x4c7   :  { %779 = vadd.xlane.f32.xlu0 %v778_v36 }
 0x4c8   :  { %v781_v55 = vsel %vm296_vm2, %v777_v37, 0.0 }
 0x4c9   :  { %782 = vadd.xlane.f32.xlu1 %v781_v55 }
 0x53a   :  { %v3009_v57 = vpop.xlane.xlu0 %779 }
 0x53b   :  { %vm789_vm15 = vcmp.gt.f32.partialorder %v3009_v57, 0.0 }
 0x53c   :  { %v3015_v59 = vsel %vm789_vm15, %v776_v62, %v2912_v48  ;;  %v3017_v60 = vpop.xlane.xlu1 %782 }
 0x53d   :  { %vm784_vm0 = vcmp.gt.f32.partialorder %v3017_v60, 0.0  ;;  %v842_v58 = vperm.slane %v3015_v59, 0  ;;  %v837_v42 = vrot.slane %v3015_v59, 1  ;;  %v838_v35 = vrot.slane %v3015_v59, 2 }
 0x53e   :  { %v3026_v0 = vsel %vm784_vm0, %v777_v37, %v2923_v54  ;;  %v840_v46 = vrot.slane %v3015_v59, 4  ;;  %v839_v2 = vrot.slane %v3015_v59, 3  ;;  %v841_v29 = vrot.slane %v3015_v59, 5 }
 0x53f   :  { %v854_v48 = vmul.f32 %v842_v58, %v2718_v39  ;;  %v843_v49 = vperm.slane %v837_v42, 0  ;;  %v844_v1 = vperm.slane %v838_v35, 0  ;;  %v800_v53 = vperm.slane %v3026_v0, 0 }
 0x540   :  { %v846_v6 = vperm.slane %v840_v46, 0  ;;  %v845_v7 = vperm.slane %v839_v2, 0  ;;  %v796_v10 = vrot.slane %v3026_v0, 2  ;;  %v797_v18 = vrot.slane %v3026_v0, 3 }
 0x541   :  { %v860_v3 = vsel %vm292_vm1, %v854_v48, 0.0  ;;  %v855_v4 = vmul.f32 %v843_v49, %v2727_v52  ;;  %v856_v5 = vmul.f32 %v844_v1, %v2705_v23  ;;  %v812_v8 = vmul.f32 %v800_v53, %v2718_v39 }
 0x542   :  { %861 = vadd.xlane.f32.xlu2 %v860_v3  ;;  %v858_v11 = vmul.f32 %v846_v6, %v2712_v33  ;;  %v857_v17 = vmul.f32 %v845_v7, %v2736_v63  ;;  %v795_v19 = vrot.slane %v3026_v0, 1  ;;  %v802_v21 = vperm.slane %v796_v10, 0 }
 0x543   :  { %v863_v54 = vsel %vm292_vm1, %v855_v4, 0.0  ;;  %v866_v47 = vsel %vm292_vm1, %v856_v5, 0.0  ;;  %v818_v20 = vsel %vm292_vm1, %v812_v8, 0.0  ;;  %v803_v25 = vperm.slane %v797_v18, 0 }
 0x544   :  { %864 = vadd.xlane.f32.xlu0 %v863_v54  ;;  %867 = vadd.xlane.f32.xlu1 %v866_v47  ;;  %v872_v22 = vsel %vm292_vm1, %v858_v11, 0.0  ;;  %v869_v24 = vsel %vm292_vm1, %v857_v17, 0.0  ;;  %v801_v26 = vperm.slane %v795_v19, 0  ;;  %v814_v27 = vmul.f32 %v802_v21, %v2705_v23 }
 0x545   :  { %v815_v30 = vmul.f32 %v803_v25, %v2736_v63  ;;  %v799_v32 = vrot.slane %v3026_v0, 5  ;;  %v798_v34 = vrot.slane %v3026_v0, 4  ;;  %v847_v40 = vperm.slane %v841_v29, 0 }
 0x546   :  { %v813_v31 = vmul.f32 %v801_v26, %v2727_v52  ;;  %v824_v38 = vsel %vm292_vm1, %v814_v27, 0.0  ;;  %v3067_v2 = vsel %vm784_vm0, %v3017_v60, %v2964_v56  ;;  %v3077_v6 = vsel %vm789_vm15, %v3009_v57, %v2974_v61 }
 0x547   :  { %v827_v41 = vsel %vm292_vm1, %v815_v30, 0.0  ;;  %v805_v14 = vperm.slane %v799_v32, 0  ;;  %v804_v44 = vperm.slane %v798_v34, 0  ;;  %v859_v45 = vmul.f32 %v847_v40, %v2744_v9 }
 0x548   :  { %v821_v43 = vsel %vm292_vm1, %v813_v31, 0.0  ;;  %v922_v56 = vmul.f32 %v3077_v6, %v3067_v2  ;;  %v926_v60 = vmul.f32 %v3067_v2, %v3067_v2 }
 0x549   :  { %v817_v50 = vmul.f32 %v805_v14, %v2744_v9  ;;  %v816_v16 = vmul.f32 %v804_v44, %v2712_v33  ;;  %v875_v51 = vsel %vm292_vm1, %v859_v45, 0.0 }
 0x54a   :  { %819 = vadd.xlane.f32.xlu2 %v818_v20  ;;  %v923_v57 = vmul.f32 %v922_v56, %v3077_v6  ;;  %v927_v21 = vmul.f32 %v926_v60, %v3077_v6 }
 0x54b   :  { %v833_v62 = vsel %vm292_vm1, %v817_v50, 0.0  ;;  %v830_v36 = vsel %vm292_vm1, %v816_v16, 0.0 }
 0x54c   :  { %873 = vadd.xlane.f32.xlu0 %v872_v22  ;;  %870 = vadd.xlane.f32.xlu1 %v869_v24  ;;  %v928_v40 = vmul.f32 2.0, %v927_v21 }
 0x552   :  { %825 = vadd.xlane.f32.xlu2 %v824_v38  ;;  %v924_v38 = vmul.f32 2.0, %v923_v57 }
 0x554   :  { %828 = vadd.xlane.f32.xlu1 %v827_v41  ;;  %822 = vadd.xlane.f32.xlu0 %v821_v43 }
 0x55a   :  { %876 = vadd.xlane.f32.xlu2 %v875_v51 }
 0x55c   :  { %834 = vadd.xlane.f32.xlu1 %v833_v62  ;;  %831 = vadd.xlane.f32.xlu0 %v830_v36  ;;  %v933_v36 = vmul.f32 %v3077_v6, %v3077_v6 }
 0x5b5   :  { %v862_v37 = vpop.xlane.xlu2 %861 }
 0x5b6   :  { %v906_v1 = vperm.slane %v862_v37, %v2692_v13 }
 0x5b7   :  { %v865_v55 = vpop.xlane.xlu0 %864  ;;  %v868_v58 = vpop.xlane.xlu1 %867 }
 0x5b8   :  { %v907_v48 = vperm.slane %v865_v55, %v2692_v13  ;;  %v908_v3 = vperm.slane %v868_v58, %v2692_v13 }
 0x5ba   :  { %v912_v53 = vsel %vm396_vm3, %v907_v48, %v906_v1 }
 0x5bb   :  { %v913_v8 = vsel %vm398_vm4, %v908_v3, %v912_v53 }
 0x5bd   :  { %v820_v42 = vpop.xlane.xlu2 %819 }
 0x5be   :  { %v884_v7 = vperm.slane %v820_v42, %v2692_v13 }
 0x5bf   :  { %v874_v35 = vpop.xlane.xlu0 %873  ;;  %v871_v46 = vpop.xlane.xlu1 %870 }
 0x5c0   :  { %v909_v54 = vperm.slane %v871_v46, %v2692_v13  ;;  %v910_v10 = vperm.slane %v874_v35, %v2692_v13 }
 0x5c2   :  { %v914_v17 = vsel %vm4289_vm5, %v909_v54, %v913_v8 }
 0x5c3   :  { %v915_v26 = vsel %vm4288_vm6, %v910_v10, %v914_v17 }
 0x5c5   :  { %v826_v49 = vpop.xlane.xlu2 %825 }
 0x5c6   :  { %v886_v18 = vperm.slane %v826_v49, %v2692_v13 }
 0x5c7   :  { %v823_v4 = vpop.xlane.xlu0 %822  ;;  %v829_v5 = vpop.xlane.xlu1 %828 }
 0x5c8   :  { %v885_v47 = vperm.slane %v823_v4, %v2692_v13  ;;  %v887_v22 = vperm.slane %v829_v5, %v2692_v13 }
 0x5ca   :  { %v890_v11 = vsel %vm396_vm3, %v885_v47, %v884_v7 }
 0x5cb   :  { %v891_v19 = vsel %vm398_vm4, %v886_v18, %v890_v11 }
 0x5cc   :  { %v892_v31 = vsel %vm4289_vm5, %v887_v22, %v891_v19 }
 0x5cd   :  { %v877_v61 = vpop.xlane.xlu2 %876 }
 0x5ce   :  { %v911_v20 = vperm.slane %v877_v61, %v2692_v13 }
 0x5cf   :  { %v832_v24 = vpop.xlane.xlu0 %831  ;;  %v835_v25 = vpop.xlane.xlu1 %834 }
 0x5d0   :  { %v888_v27 = vperm.slane %v832_v24, %v2692_v13  ;;  %v889_v29 = vperm.slane %v835_v25, %v2692_v13  ;;  %v916_v30 = vsel %vm4287_vm7, %v911_v20, %v915_v26 }
 0x5d1   :  { %v918_v32 = vmul.f32 %v916_v30, %v3015_v59  ;;  %v929_v45 = vmul.f32 %v928_v40, %v916_v30 }
 0x5d2   :  { %v893_v34 = vsel %vm4288_vm6, %v888_v27, %v892_v31 }
 0x5d3   :  { %v919_v41 = vsel %vm296_vm2, %v918_v32, 0.0  ;;  %v894_v43 = vsel %vm4287_vm7, %v889_v29, %v893_v34 }
 0x5d4   :  { %920 = vadd.xlane.f32.xlu2 %v919_v41  ;;  %v896_v14 = vmul.f32 %v894_v43, %v3026_v0  ;;  %v925_v44 = vmul.f32 %v924_v38, %v894_v43 }
 0x5d6   :  { %v897_v50 = vsel %vm296_vm2, %v896_v14, 0.0  ;;  %v930_v16 = vsub.f32 %v925_v44, %v929_v45 }
 0x5d7   :  { %898 = vadd.xlane.f32.xlu0 %v897_v50 }
 0x647   :  { %v921_v51 = vpop.xlane.xlu2 %920 }
 0x648   :  { %v931_v62 = vmul.f32 %v926_v60, %v921_v51 }
 0x64a   :  { %v932_v37 = vadd.f32 %v931_v62, %v930_v16  ;;  %v899_v55 = vpop.xlane.xlu0 %898 }
 0x64b   :  { %v934_v58 = vmul.f32 %v933_v36, %v899_v55 }
 0x64d   :  { %v935_v42 = vsub.f32 %v932_v37, %v934_v58 }
 0x64f   :  { %vm936_vm8 = vcmp.lt.f32.partialorder %v935_v42, 0.0 }
 0x650   :  { %v2527_v35 = vsel %vm936_vm8, 1.0, %v2602_v15 }
 0x651   :  { %v939_v46 = vmul.f32 %v2527_v35, %v2796_v28 }
 0x653   :  { %v941_v48 = vsel %vm296_vm2, %v939_v46, 0.0  ;;  %v940_v49 = vsub.f32 %v2796_v28, %v939_v46 }
 0x654   :  { %942 = vadd.xlane.f32.xlu1 %v941_v48 }
 0x655   :  { %v944_v1 = vsel %vm296_vm2, %v940_v49, 0.0 }
 0x656   :  { %945 = vadd.xlane.f32.xlu2 %v944_v1 }
 0x6c7   :  { %v3112_v3 = vpop.xlane.xlu1 %942 }
 0x6c8   :  { %vm952_vm9 = vcmp.gt.f32.partialorder %v3112_v3, 0.0 }
 0x6c9   :  { %v3118_v4 = vsel %vm952_vm9, %v939_v46, %v3015_v59  ;;  %v3120_v5 = vpop.xlane.xlu2 %945 }
 0x6ca   :  { %vm947_vm10 = vcmp.gt.f32.partialorder %v3120_v5, 0.0  ;;  %v1005_v53 = vperm.slane %v3118_v4, 0  ;;  %v1000_v28 = vrot.slane %v3118_v4, 1  ;;  %v1001_v54 = vrot.slane %v3118_v4, 2 }
 0x6cb   :  { %v3129_v47 = vsel %vm947_vm10, %v940_v49, %v3026_v0  ;;  %v1003_v7 = vrot.slane %v3118_v4, 4  ;;  %v1002_v8 = vrot.slane %v3118_v4, 3  ;;  %v1004_v40 = vrot.slane %v3118_v4, 5 }
 0x6cc   :  { %v1017_v59 = vmul.f32 %v1005_v53, %v2718_v39  ;;  %v1006_v56 = vperm.slane %v1000_v28, 0  ;;  %v1007_v60 = vperm.slane %v1001_v54, 0  ;;  %v963_v18 = vperm.slane %v3129_v47, 0 }
 0x6cd   :  { %v1009_v57 = vperm.slane %v1003_v7, 0  ;;  %v1008_v19 = vperm.slane %v1002_v8, 0  ;;  %v959_v21 = vrot.slane %v3129_v47, 2  ;;  %v960_v25 = vrot.slane %v3129_v47, 3 }
 0x6ce   :  { %v1023_v10 = vsel %vm292_vm1, %v1017_v59, 0.0  ;;  %v1018_v11 = vmul.f32 %v1006_v56, %v2727_v52  ;;  %v1019_v17 = vmul.f32 %v1007_v60, %v2705_v23  ;;  %v975_v20 = vmul.f32 %v963_v18, %v2718_v39 }
 0x6cf   :  { %1024 = vadd.xlane.f32.xlu0 %v1023_v10  ;;  %v1021_v22 = vmul.f32 %v1009_v57, %v2712_v33  ;;  %v1020_v24 = vmul.f32 %v1008_v19, %v2736_v63  ;;  %v958_v26 = vrot.slane %v3129_v47, 1  ;;  %v965_v29 = vperm.slane %v959_v21, 0 }
 0x6d0   :  { %v1026_v0 = vsel %vm292_vm1, %v1018_v11, 0.0  ;;  %v1029_v61 = vsel %vm292_vm1, %v1019_v17, 0.0  ;;  %v981_v27 = vsel %vm292_vm1, %v975_v20, 0.0  ;;  %v966_v32 = vperm.slane %v960_v25, 0 }
 0x6d1   :  { %1027 = vadd.xlane.f32.xlu1 %v1026_v0  ;;  %1030 = vadd.xlane.f32.xlu2 %v1029_v61  ;;  %v1035_v30 = vsel %vm292_vm1, %v1021_v22, 0.0  ;;  %v1032_v31 = vsel %vm292_vm1, %v1020_v24, 0.0  ;;  %v964_v34 = vperm.slane %v958_v26, 0  ;;  %v977_v38 = vmul.f32 %v965_v29, %v2705_v23 }
 0x6d2   :  { %v978_v41 = vmul.f32 %v966_v32, %v2736_v63  ;;  %v962_v14 = vrot.slane %v3129_v47, 5  ;;  %v961_v44 = vrot.slane %v3129_v47, 4  ;;  %v1010_v50 = vperm.slane %v1004_v40, 0 }
 0x6d3   :  { %v976_v43 = vmul.f32 %v964_v34, %v2727_v52  ;;  %v987_v45 = vsel %vm292_vm1, %v977_v38, 0.0  ;;  %v3170_v60 = vsel %vm947_vm10, %v3120_v5, %v3067_v2  ;;  %v3180_v61 = vsel %vm952_vm9, %v3112_v3, %v3077_v6 }
 0x6d4   :  { %v990_v16 = vsel %vm292_vm1, %v978_v41, 0.0  ;;  %v968_v62 = vperm.slane %v962_v14, 0  ;;  %v967_v36 = vperm.slane %v961_v44, 0  ;;  %v1022_v37 = vmul.f32 %v1010_v50, %v2744_v9 }
 0x6d5   :  { %v984_v51 = vsel %vm292_vm1, %v976_v43, 0.0  ;;  %v1085_v2 = vmul.f32 %v3180_v61, %v3170_v60  ;;  %v1089_v5 = vmul.f32 %v3170_v60, %v3170_v60 }
 0x6d6   :  { %v980_v55 = vmul.f32 %v968_v62, %v2744_v9  ;;  %v979_v58 = vmul.f32 %v967_v36, %v2712_v33  ;;  %v1038_v42 = vsel %vm292_vm1, %v1022_v37, 0.0 }
 0x6d7   :  { %982 = vadd.xlane.f32.xlu0 %v981_v27  ;;  %v1086_v3 = vmul.f32 %v1085_v2, %v3180_v61  ;;  %v1090_v27 = vmul.f32 %v1089_v5, %v3180_v61 }
 0x6d8   :  { %v996_v35 = vsel %vm292_vm1, %v980_v55, 0.0  ;;  %v993_v46 = vsel %vm292_vm1, %v979_v58, 0.0 }
 0x6d9   :  { %1036 = vadd.xlane.f32.xlu1 %v1035_v30  ;;  %1033 = vadd.xlane.f32.xlu2 %v1032_v31  ;;  %v1087_v44 = vmul.f32 2.0, %v1086_v3 }
 0x6df   :  { %988 = vadd.xlane.f32.xlu0 %v987_v45  ;;  %v1091_v45 = vmul.f32 2.0, %v1090_v27 }
 0x6e1   :  { %991 = vadd.xlane.f32.xlu2 %v990_v16  ;;  %985 = vadd.xlane.f32.xlu1 %v984_v51 }
 0x6e7   :  { %1039 = vadd.xlane.f32.xlu0 %v1038_v42 }
 0x6e9   :  { %997 = vadd.xlane.f32.xlu2 %v996_v35  ;;  %994 = vadd.xlane.f32.xlu1 %v993_v46  ;;  %v1096_v35 = vmul.f32 %v3180_v61, %v3180_v61 }
 0x742   :  { %v1025_v48 = vpop.xlane.xlu0 %1024 }
 0x743   :  { %v1069_v56 = vperm.slane %v1025_v48, %v2692_v13 }
 0x744   :  { %v1028_v49 = vpop.xlane.xlu1 %1027  ;;  %v1031_v1 = vpop.xlane.xlu2 %1030 }
 0x745   :  { %v1070_v7 = vperm.slane %v1028_v49, %v2692_v13  ;;  %v1071_v8 = vperm.slane %v1031_v1, %v2692_v13 }
 0x747   :  { %v1075_v17 = vsel %vm396_vm3, %v1070_v7, %v1069_v56 }
 0x748   :  { %v1076_v19 = vsel %vm398_vm4, %v1071_v8, %v1075_v17 }
 0x74a   :  { %v983_v53 = vpop.xlane.xlu0 %982 }
 0x74b   :  { %v1047_v57 = vperm.slane %v983_v53, %v2692_v13 }
 0x74c   :  { %v1037_v28 = vpop.xlane.xlu1 %1036  ;;  %v1034_v54 = vpop.xlane.xlu2 %1033 }
 0x74d   :  { %v1072_v18 = vperm.slane %v1034_v54, %v2692_v13  ;;  %v1073_v20 = vperm.slane %v1037_v28, %v2692_v13  ;;  %v3214_v28 = vld [vmem:[%s4278_s1] sm:$0x3f] }
 0x74f   :  { %v1077_v22 = vsel %vm4289_vm5, %v1072_v18, %v1076_v19 }
 0x750   :  { %v1078_v32 = vsel %vm4288_vm6, %v1073_v20, %v1077_v22 }
 0x752   :  { %v989_v59 = vpop.xlane.xlu0 %988 }
 0x753   :  { %v1049_v24 = vperm.slane %v989_v59, %v2692_v13 }
 0x754   :  { %v986_v10 = vpop.xlane.xlu1 %985  ;;  %v992_v11 = vpop.xlane.xlu2 %991 }
 0x755   :  { %v1048_v0 = vperm.slane %v986_v10, %v2692_v13  ;;  %v1050_v29 = vperm.slane %v992_v11, %v2692_v13 }
 0x757   :  { %v1053_v21 = vsel %vm396_vm3, %v1048_v0, %v1047_v57 }
 0x758   :  { %v1054_v25 = vsel %vm398_vm4, %v1049_v24, %v1053_v21 }
 0x759   :  { %v1055_v41 = vsel %vm4289_vm5, %v1050_v29, %v1054_v25 }
 0x75a   :  { %v1040_v6 = vpop.xlane.xlu0 %1039 }
 0x75b   :  { %v1074_v26 = vperm.slane %v1040_v6, %v2692_v13 }
 0x75c   :  { %v995_v30 = vpop.xlane.xlu1 %994  ;;  %v998_v31 = vpop.xlane.xlu2 %997 }
 0x75d   :  { %v1051_v34 = vperm.slane %v995_v30, %v2692_v13  ;;  %v1052_v38 = vperm.slane %v998_v31, %v2692_v13  ;;  %v1079_v40 = vsel %vm4287_vm7, %v1074_v26, %v1078_v32 }
 0x75e   :  { %v1081_v43 = vmul.f32 %v1079_v40, %v3118_v4  ;;  %v1092_v36 = vmul.f32 %v1091_v45, %v1079_v40 }
 0x75f   :  { %v1056_v14 = vsel %vm4288_vm6, %v1051_v34, %v1055_v41 }
 0x760   :  { %v1082_v50 = vsel %vm296_vm2, %v1081_v43, 0.0  ;;  %v1057_v16 = vsel %vm4287_vm7, %v1052_v38, %v1056_v14 }
 0x761   :  { %1083 = vadd.xlane.f32.xlu0 %v1082_v50  ;;  %v1059_v51 = vmul.f32 %v1057_v16, %v3129_v47  ;;  %v1088_v62 = vmul.f32 %v1087_v44, %v1057_v16 }
 0x763   :  { %v1060_v37 = vsel %vm296_vm2, %v1059_v51, 0.0  ;;  %v1093_v55 = vsub.f32 %v1088_v62, %v1092_v36 }
 0x764   :  { %1061 = vadd.xlane.f32.xlu1 %v1060_v37 }
 0x7d4   :  { %v1084_v58 = vpop.xlane.xlu0 %1083 }
 0x7d5   :  { %v1094_v42 = vmul.f32 %v1089_v5, %v1084_v58 }
 0x7d7   :  { %v1095_v46 = vadd.f32 %v1094_v42, %v1093_v55  ;;  %v1062_v48 = vpop.xlane.xlu1 %1061 }
 0x7d8   :  { %v1097_v49 = vmul.f32 %v1096_v35, %v1062_v48 }
 0x7da   :  { %v1098_v1 = vsub.f32 %v1095_v46, %v1097_v49 }
 0x7dc   :  { %vm1099_vm11 = vcmp.lt.f32.partialorder %v1098_v1, 0.0 }
 0x7dd   :  { %v2528_v53 = vsel %vm1099_vm11, 1.0, %v2602_v15 }
 0x7de   :  { %v1102_v54 = vmul.f32 %v3214_v28, %v2528_v53 }
 0x7e0   :  { %v1104_v7 = vsel %vm296_vm2, %v1102_v54, 0.0  ;;  %v1103_v59 = vsub.f32 %v3214_v28, %v1102_v54 }
 0x7e1   :  { %1105 = vadd.xlane.f32.xlu2 %v1104_v7 }
 0x7e2   :  { %v1107_v56 = vsel %vm296_vm2, %v1103_v59, 0.0 }
 0x7e3   :  { %1108 = vadd.xlane.f32.xlu0 %v1107_v56 }
 0x854   :  { %v3220_v8 = vpop.xlane.xlu2 %1105 }
 0x855   :  { %vm1115_vm12 = vcmp.gt.f32.partialorder %v3220_v8, 0.0 }
 0x856   :  { %v3226_v10 = vsel %vm1115_vm12, %v1102_v54, %v3118_v4  ;;  %v3228_v11 = vpop.xlane.xlu0 %1108 }
 0x857   :  { %vm1110_vm13 = vcmp.gt.f32.partialorder %v3228_v11, 0.0  ;;  %v1168_v17 = vperm.slane %v3226_v10, 0  ;;  %v1163_v18 = vrot.slane %v3226_v10, 1  ;;  %v1164_v0 = vrot.slane %v3226_v10, 2 }
 0x858   :  { %v3237_v57 = vsel %vm1110_vm13, %v1103_v59, %v3129_v47  ;;  %v1166_v2 = vrot.slane %v3226_v10, 4  ;;  %v1165_v20 = vrot.slane %v3226_v10, 3  ;;  %v1167_v50 = vrot.slane %v3226_v10, 5 }
 0x859   :  { %v1180_v4 = vmul.f32 %v1168_v17, %v2718_v39  ;;  %v1169_v5 = vperm.slane %v1163_v18, 0  ;;  %v1170_v19 = vperm.slane %v1164_v0, 0  ;;  %v1126_v6 = vperm.slane %v3237_v57, 0 }
 0x85a   :  { %v1172_v25 = vperm.slane %v1166_v2, 0  ;;  %v1171_v26 = vperm.slane %v1165_v20, 0  ;;  %v1122_v29 = vrot.slane %v3237_v57, 2  ;;  %v1123_v32 = vrot.slane %v3237_v57, 3 }
 0x85b   :  { %v1186_v21 = vsel %vm292_vm1, %v1180_v4, 0.0  ;;  %v1181_v22 = vmul.f32 %v1169_v5, %v2727_v52  ;;  %v1182_v24 = vmul.f32 %v1170_v19, %v2705_v23  ;;  %v1138_v27 = vmul.f32 %v1126_v6, %v2718_v39 }
 0x85c   :  { %1187 = vadd.xlane.f32.xlu1 %v1186_v21  ;;  %v1184_v30 = vmul.f32 %v1172_v25, %v2712_v33  ;;  %v1183_v31 = vmul.f32 %v1171_v26, %v2736_v63  ;;  %v1121_v34 = vrot.slane %v3237_v57, 1  ;;  %v1128_v40 = vperm.slane %v1122_v29, 0 }
 0x85d   :  { %v1189_v47 = vsel %vm292_vm1, %v1181_v22, 0.0  ;;  %v1192_v3 = vsel %vm292_vm1, %v1182_v24, 0.0  ;;  %v1144_v38 = vsel %vm292_vm1, %v1138_v27, 0.0  ;;  %v1129_v14 = vperm.slane %v1123_v32, 0 }
 0x85e   :  { %1190 = vadd.xlane.f32.xlu2 %v1189_v47  ;;  %1193 = vadd.xlane.f32.xlu0 %v1192_v3  ;;  %v1198_v41 = vsel %vm292_vm1, %v1184_v30, 0.0  ;;  %v1195_v43 = vsel %vm292_vm1, %v1183_v31, 0.0  ;;  %v1127_v44 = vperm.slane %v1121_v34, 0  ;;  %v1140_v45 = vmul.f32 %v1128_v40, %v2705_v23 }
 0x85f   :  { %v1141_v16 = vmul.f32 %v1129_v14, %v2736_v63  ;;  %v1125_v62 = vrot.slane %v3237_v57, 5  ;;  %v1124_v36 = vrot.slane %v3237_v57, 4  ;;  %v1173_v55 = vperm.slane %v1167_v50, 0 }
 0x860   :  { %v1139_v51 = vmul.f32 %v1127_v44, %v2727_v52  ;;  %v1150_v37 = vsel %vm292_vm1, %v1140_v45, 0.0  ;;  %v3278_v20 = vsel %vm1110_vm13, %v3228_v11, %v3170_v60  ;;  %v3288_v25 = vsel %vm1115_vm12, %v3220_v8, %v3180_v61 }
 0x861   :  { %v1153_v58 = vsel %vm292_vm1, %v1141_v16, 0.0  ;;  %v1131_v35 = vperm.slane %v1125_v62, 0  ;;  %v1130_v46 = vperm.slane %v1124_v36, 0  ;;  %v1185_v48 = vmul.f32 %v1173_v55, %v2744_v9 }
 0x862   :  { %v1147_v42 = vsel %vm292_vm1, %v1139_v51, 0.0  ;;  %v1248_v60 = vmul.f32 %v3288_v25, %v3278_v20  ;;  %v1252_v11 = vmul.f32 %v3278_v20, %v3278_v20 }
 0x863   :  { %v1143_v49 = vmul.f32 %v1131_v35, %v2744_v9  ;;  %v1142_v1 = vmul.f32 %v1130_v46, %v2712_v33  ;;  %v1201_v53 = vsel %vm292_vm1, %v1185_v48, 0.0 }
 0x864   :  { %1145 = vadd.xlane.f32.xlu1 %v1144_v38  ;;  %v1249_v8 = vmul.f32 %v1248_v60, %v3288_v25  ;;  %v1253_v40 = vmul.f32 %v1252_v11, %v3288_v25 }
 0x865   :  { %v1159_v54 = vsel %vm292_vm1, %v1143_v49, 0.0  ;;  %v1156_v7 = vsel %vm292_vm1, %v1142_v1, 0.0 }
 0x866   :  { %1199 = vadd.xlane.f32.xlu2 %v1198_v41  ;;  %1196 = vadd.xlane.f32.xlu0 %v1195_v43  ;;  %v1254_v55 = vmul.f32 2.0, %v1253_v40 }
 0x86c   :  { %1151 = vadd.xlane.f32.xlu1 %v1150_v37  ;;  %v1250_v37 = vmul.f32 2.0, %v1249_v8 }
 0x86e   :  { %1154 = vadd.xlane.f32.xlu0 %v1153_v58  ;;  %1148 = vadd.xlane.f32.xlu2 %v1147_v42 }
 0x874   :  { %1202 = vadd.xlane.f32.xlu1 %v1201_v53 }
 0x876   :  { %1160 = vadd.xlane.f32.xlu0 %v1159_v54  ;;  %1157 = vadd.xlane.f32.xlu2 %v1156_v7  ;;  %v1259_v7 = vmul.f32 %v3288_v25, %v3288_v25 }
 0x8cf   :  { %v1188_v59 = vpop.xlane.xlu1 %1187 }
 0x8d0   :  { %v1232_v19 = vperm.slane %v1188_v59, %v2692_v13 }
 0x8d1   :  { %v1191_v56 = vpop.xlane.xlu2 %1190  ;;  %v1194_v17 = vpop.xlane.xlu0 %1193 }
 0x8d2   :  { %v1233_v4 = vperm.slane %v1191_v56, %v2692_v13  ;;  %v1234_v21 = vperm.slane %v1194_v17, %v2692_v13 }
 0x8d4   :  { %v1238_v6 = vsel %vm396_vm3, %v1233_v4, %v1232_v19 }
 0x8d5   :  { %v1239_v27 = vsel %vm398_vm4, %v1234_v21, %v1238_v6 }
 0x8d7   :  { %v1146_v18 = vpop.xlane.xlu1 %1145 }
 0x8d8   :  { %v1210_v26 = vperm.slane %v1146_v18, %v2692_v13 }
 0x8d9   :  { %v1200_v0 = vpop.xlane.xlu2 %1199  ;;  %v1197_v2 = vpop.xlane.xlu0 %1196 }
 0x8da   :  { %v1235_v47 = vperm.slane %v1197_v2, %v2692_v13  ;;  %v1236_v29 = vperm.slane %v1200_v0, %v2692_v13 }
 0x8dc   :  { %v1240_v31 = vsel %vm4289_vm5, %v1235_v47, %v1239_v27 }
 0x8dd   :  { %v1241_v44 = vsel %vm4288_vm6, %v1236_v29, %v1240_v31 }
 0x8df   :  { %v1152_v5 = vpop.xlane.xlu1 %1151 }
 0x8e0   :  { %v1212_v32 = vperm.slane %v1152_v5, %v2692_v13 }
 0x8e1   :  { %v1149_v22 = vpop.xlane.xlu2 %1148  ;;  %v1155_v24 = vpop.xlane.xlu0 %1154 }
 0x8e2   :  { %v1211_v3 = vperm.slane %v1149_v22, %v2692_v13  ;;  %v1213_v41 = vperm.slane %v1155_v24, %v2692_v13 }
 0x8e4   :  { %v1216_v30 = vsel %vm396_vm3, %v1211_v3, %v1210_v26 }
 0x8e5   :  { %v1217_v34 = vsel %vm398_vm4, %v1212_v32, %v1216_v30 }
 0x8e6   :  { %v1218_v51 = vsel %vm4289_vm5, %v1213_v41, %v1217_v34 }
 0x8e7   :  { %v1203_v61 = vpop.xlane.xlu1 %1202 }
 0x8e8   :  { %v1237_v38 = vperm.slane %v1203_v61, %v2692_v13 }
 0x8e9   :  { %v1158_v43 = vpop.xlane.xlu2 %1157  ;;  %v1161_v14 = vpop.xlane.xlu0 %1160 }
 0x8ea   :  { %v1214_v45 = vperm.slane %v1158_v43, %v2692_v13  ;;  %v1215_v50 = vperm.slane %v1161_v14, %v2692_v13  ;;  %v1242_v16 = vsel %vm4287_vm7, %v1237_v38, %v1241_v44 }
 0x8eb   :  { %v1244_v62 = vmul.f32 %v1242_v16, %v3226_v10  ;;  %v1255_v48 = vmul.f32 %v1254_v55, %v1242_v16 }
 0x8ec   :  { %v1219_v36 = vsel %vm4288_vm6, %v1214_v45, %v1218_v51 }
 0x8ed   :  { %v1245_v58 = vsel %vm296_vm2, %v1244_v62, 0.0  ;;  %v1220_v42 = vsel %vm4287_vm7, %v1215_v50, %v1219_v36 }
 0x8ee   :  { %1246 = vadd.xlane.f32.xlu1 %v1245_v58  ;;  %v1222_v35 = vmul.f32 %v1220_v42, %v3237_v57  ;;  %v1251_v46 = vmul.f32 %v1250_v37, %v1220_v42 }
 0x8f0   :  { %v1223_v49 = vsel %vm296_vm2, %v1222_v35, 0.0  ;;  %v1256_v1 = vsub.f32 %v1251_v46, %v1255_v48 }
 0x8f1   :  { %1224 = vadd.xlane.f32.xlu2 %v1223_v49 }
 0x961   :  { %v1247_v53 = vpop.xlane.xlu1 %1246 }
 0x962   :  { %v1257_v54 = vmul.f32 %v1252_v11, %v1247_v53 }
 0x964   :  { %v1258_v59 = vadd.f32 %v1257_v54, %v1256_v1  ;;  %v1225_v56 = vpop.xlane.xlu2 %1224 }
 0x965   :  { %v1260_v17 = vmul.f32 %v1259_v7, %v1225_v56 }
 0x967   :  { %v1261_v18 = vsub.f32 %v1258_v59, %v1260_v17 }
 0x969   :  { %vm1262_vm14 = vcmp.lt.f32.partialorder %v1261_v18, 0.0 }
 0x96a   :  { %v2529_v0 = vsel %vm1262_vm14, 1.0, %v2602_v15 }
 0x96b   :  { %v1265_v2 = vmul.f32 %v3214_v28, %v2529_v0 }
 0x96d   :  { %v1267_v4 = vsel %vm296_vm2, %v1265_v2, 0.0  ;;  %v1266_v5 = vsub.f32 %v3214_v28, %v1265_v2 }
 0x96e   :  { %1268 = vadd.xlane.f32.xlu0 %v1267_v4 }
 0x96f   :  { %v1270_v19 = vsel %vm296_vm2, %v1266_v5, 0.0 }
 0x970   :  { %1271 = vadd.xlane.f32.xlu1 %v1270_v19 }
 0x9e1   :  { %v3323_v21 = vpop.xlane.xlu0 %1268 }
 0x9e2   :  { %vm1278_vm15 = vcmp.gt.f32.partialorder %v3323_v21, 0.0 }
 0x9e3   :  { %v3329_v22 = vsel %vm1278_vm15, %v1265_v2, %v3226_v10  ;;  %v3331_v24 = vpop.xlane.xlu1 %1271 }
 0x9e4   :  { %vm1273_vm0 = vcmp.gt.f32.partialorder %v3331_v24, 0.0  ;;  %v1331_v6 = vperm.slane %v3329_v22, 0  ;;  %v1326_v47 = vrot.slane %v3329_v22, 1  ;;  %v1327_v3 = vrot.slane %v3329_v22, 2 }
 0x9e5   :  { %v3340_v26 = vsel %vm1273_vm0, %v1266_v5, %v3237_v57  ;;  %v1329_v60 = vrot.slane %v3329_v22, 4  ;;  %v1328_v29 = vrot.slane %v3329_v22, 3  ;;  %v1330_v58 = vrot.slane %v3329_v22, 5 }
 0x9e6   :  { %v1343_v10 = vmul.f32 %v1331_v6, %v2718_v39  ;;  %v1332_v11 = vperm.slane %v1326_v47, 0  ;;  %v1333_v27 = vperm.slane %v1327_v3, 0  ;;  %v1289_v61 = vperm.slane %v3340_v26, 0 }
 0x9e7   :  { %v1335_v34 = vperm.slane %v1329_v60, 0  ;;  %v1334_v38 = vperm.slane %v1328_v29, 0  ;;  %v1285_v41 = vrot.slane %v3340_v26, 2  ;;  %v1286_v44 = vrot.slane %v3340_v26, 3 }
 0x9e8   :  { %v1349_v30 = vsel %vm292_vm1, %v1343_v10, 0.0  ;;  %v1344_v31 = vmul.f32 %v1332_v11, %v2727_v52  ;;  %v1345_v32 = vmul.f32 %v1333_v27, %v2705_v23  ;;  %v1301_v40 = vmul.f32 %v1289_v61, %v2718_v39 }
 0x9e9   :  { %1350 = vadd.xlane.f32.xlu2 %v1349_v30  ;;  %v1347_v43 = vmul.f32 %v1335_v34, %v2712_v33  ;;  %v1346_v14 = vmul.f32 %v1334_v38, %v2736_v63  ;;  %v1284_v45 = vrot.slane %v3340_v26, 1  ;;  %v1291_v16 = vperm.slane %v1285_v41, 0 }
 0x9ea   :  { %v1352_v57 = vsel %vm292_vm1, %v1344_v31, 0.0  ;;  %v1355_v8 = vsel %vm292_vm1, %v1345_v32, 0.0  ;;  %v1307_v50 = vsel %vm292_vm1, %v1301_v40, 0.0  ;;  %v1292_v36 = vperm.slane %v1286_v44, 0 }
 0x9eb   :  { %1353 = vadd.xlane.f32.xlu0 %v1352_v57  ;;  %1356 = vadd.xlane.f32.xlu1 %v1355_v8  ;;  %v1361_v51 = vsel %vm292_vm1, %v1347_v43, 0.0  ;;  %v1358_v62 = vsel %vm292_vm1, %v1346_v14, 0.0  ;;  %v1290_v37 = vperm.slane %v1284_v45, 0  ;;  %v1303_v55 = vmul.f32 %v1291_v16, %v2705_v23 }
 0x9ec   :  { %v1304_v42 = vmul.f32 %v1292_v36, %v2736_v63  ;;  %v1288_v46 = vrot.slane %v3340_v26, 5  ;;  %v1287_v48 = vrot.slane %v3340_v26, 4  ;;  %v1336_v1 = vperm.slane %v1330_v58, 0 }
 0x9ed   :  { %v1302_v35 = vmul.f32 %v1290_v37, %v2727_v52  ;;  %v1313_v49 = vsel %vm292_vm1, %v1303_v55, 0.0  ;;  %v3381_v29 = vsel %vm1273_vm0, %v3331_v24, %v3278_v20  ;;  %v3391_v34 = vsel %vm1278_vm15, %v3323_v21, %v3288_v25 }
 0x9ee   :  { %v1316_v53 = vsel %vm292_vm1, %v1304_v42, 0.0  ;;  %v1294_v7 = vperm.slane %v1288_v46, 0  ;;  %v1293_v59 = vperm.slane %v1287_v48, 0  ;;  %v1348_v56 = vmul.f32 %v1336_v1, %v2744_v9 }
 0x9ef   :  { %v1310_v54 = vsel %vm292_vm1, %v1302_v35, 0.0  ;;  %v1411_v20 = vmul.f32 %v3391_v34, %v3381_v29  ;;  %v1415_v24 = vmul.f32 %v3381_v29, %v3381_v29 }
 0x9f0   :  { %v1306_v17 = vmul.f32 %v1294_v7, %v2744_v9  ;;  %v1305_v18 = vmul.f32 %v1293_v59, %v2712_v33  ;;  %v1364_v0 = vsel %vm292_vm1, %v1348_v56, 0.0 }
 0x9f1   :  { %1308 = vadd.xlane.f32.xlu2 %v1307_v50  ;;  %v1412_v21 = vmul.f32 %v1411_v20, %v3391_v34  ;;  %v1416_v16 = vmul.f32 %v1415_v24, %v3391_v34 }
 0x9f2   :  { %v1322_v2 = vsel %vm292_vm1, %v1306_v17, 0.0  ;;  %v1319_v4 = vsel %vm292_vm1, %v1305_v18, 0.0 }
 0x9f3   :  { %1362 = vadd.xlane.f32.xlu0 %v1361_v51  ;;  %1359 = vadd.xlane.f32.xlu1 %v1358_v62  ;;  %v1417_v1 = vmul.f32 2.0, %v1416_v16 }
 0x9f9   :  { %1314 = vadd.xlane.f32.xlu2 %v1313_v49  ;;  %v1413_v49 = vmul.f32 2.0, %v1412_v21 }
 0x9fb   :  { %1317 = vadd.xlane.f32.xlu1 %v1316_v53  ;;  %1311 = vadd.xlane.f32.xlu0 %v1310_v54 }
 0xa01   :  { %1365 = vadd.xlane.f32.xlu2 %v1364_v0 }
 0xa03   :  { %1323 = vadd.xlane.f32.xlu1 %v1322_v2  ;;  %1320 = vadd.xlane.f32.xlu0 %v1319_v4  ;;  %v1422_v4 = vmul.f32 %v3391_v34, %v3391_v34 }
 0xa5c   :  { %v1351_v5 = vpop.xlane.xlu2 %1350 }
 0xa5d   :  { %v1395_v27 = vperm.slane %v1351_v5, %v2692_v13 }
 0xa5e   :  { %v1354_v19 = vpop.xlane.xlu0 %1353  ;;  %v1357_v6 = vpop.xlane.xlu1 %1356 }
 0xa5f   :  { %v1396_v10 = vperm.slane %v1354_v19, %v2692_v13  ;;  %v1397_v30 = vperm.slane %v1357_v6, %v2692_v13 }
 0xa61   :  { %v1401_v61 = vsel %vm396_vm3, %v1396_v10, %v1395_v27 }
 0xa62   :  { %v1402_v40 = vsel %vm398_vm4, %v1397_v30, %v1401_v61 }
 0xa64   :  { %v1309_v47 = vpop.xlane.xlu2 %1308 }
 0xa65   :  { %v1373_v38 = vperm.slane %v1309_v47, %v2692_v13 }
 0xa66   :  { %v1363_v3 = vpop.xlane.xlu0 %1362  ;;  %v1360_v60 = vpop.xlane.xlu1 %1359 }
 0xa67   :  { %v1398_v57 = vperm.slane %v1360_v60, %v2692_v13  ;;  %v1399_v41 = vperm.slane %v1363_v3, %v2692_v13 }
 0xa69   :  { %v1403_v14 = vsel %vm4289_vm5, %v1398_v57, %v1402_v40 }
 0xa6a   :  { %v1404_v37 = vsel %vm4288_vm6, %v1399_v41, %v1403_v14 }
 0xa6c   :  { %v1315_v11 = vpop.xlane.xlu2 %1314 }
 0xa6d   :  { %v1375_v44 = vperm.slane %v1315_v11, %v2692_v13 }
 0xa6e   :  { %v1312_v31 = vpop.xlane.xlu0 %1311  ;;  %v1318_v32 = vpop.xlane.xlu1 %1317 }
 0xa6f   :  { %v1374_v8 = vperm.slane %v1312_v31, %v2692_v13  ;;  %v1376_v51 = vperm.slane %v1318_v32, %v2692_v13 }
 0xa71   :  { %v1379_v43 = vsel %vm396_vm3, %v1374_v8, %v1373_v38 }
 0xa72   :  { %v1380_v45 = vsel %vm398_vm4, %v1375_v44, %v1379_v43 }
 0xa73   :  { %v1381_v35 = vsel %vm4289_vm5, %v1376_v51, %v1380_v45 }
 0xa74   :  { %v1366_v25 = vpop.xlane.xlu2 %1365 }
 0xa75   :  { %v1400_v50 = vperm.slane %v1366_v25, %v2692_v13 }
 0xa76   :  { %v1321_v62 = vpop.xlane.xlu0 %1320  ;;  %v1324_v36 = vpop.xlane.xlu1 %1323 }
 0xa77   :  { %v1377_v55 = vperm.slane %v1321_v62, %v2692_v13  ;;  %v1378_v58 = vperm.slane %v1324_v36, %v2692_v13  ;;  %v1405_v42 = vsel %vm4287_vm7, %v1400_v50, %v1404_v37 }
 0xa78   :  { %v1407_v46 = vmul.f32 %v1405_v42, %v3329_v22  ;;  %v1418_v56 = vmul.f32 %v1417_v1, %v1405_v42 }
 0xa79   :  { %v1382_v48 = vsel %vm4288_vm6, %v1377_v55, %v1381_v35 }
 0xa7a   :  { %v1408_v53 = vsel %vm296_vm2, %v1407_v46, 0.0  ;;  %v1383_v54 = vsel %vm4287_vm7, %v1378_v58, %v1382_v48 }
 0xa7b   :  { %1409 = vadd.xlane.f32.xlu2 %v1408_v53  ;;  %v1385_v7 = vmul.f32 %v1383_v54, %v3340_v26  ;;  %v1414_v59 = vmul.f32 %v1413_v49, %v1383_v54 }
 0xa7d   :  { %v1386_v17 = vsel %vm296_vm2, %v1385_v7, 0.0  ;;  %v1419_v18 = vsub.f32 %v1414_v59, %v1418_v56 }
 0xa7e   :  { %1387 = vadd.xlane.f32.xlu0 %v1386_v17 }
 0xaee   :  { %v1410_v0 = vpop.xlane.xlu2 %1409 }
 0xaef   :  { %v1420_v2 = vmul.f32 %v1415_v24, %v1410_v0 }
 0xaf1   :  { %v1421_v5 = vadd.f32 %v1420_v2, %v1419_v18  ;;  %v1388_v19 = vpop.xlane.xlu0 %1387 }
 0xaf2   :  { %v1423_v6 = vmul.f32 %v1422_v4, %v1388_v19 }
 0xaf4   :  { %v1424_v47 = vsub.f32 %v1421_v5, %v1423_v6 }
 0xaf6   :  { %vm1425_vm8 = vcmp.lt.f32.partialorder %v1424_v47, 0.0 }
 0xaf7   :  { %v2530_v3 = vsel %vm1425_vm8, 1.0, %v2602_v15 }
 0xaf8   :  { %v1428_v60 = vmul.f32 %v3214_v28, %v2530_v3 }
 0xafa   :  { %v1430_v10 = vsel %vm296_vm2, %v1428_v60, 0.0  ;;  %v1429_v11 = vsub.f32 %v3214_v28, %v1428_v60 }
 0xafb   :  { %1431 = vadd.xlane.f32.xlu1 %v1430_v10 }
 0xafc   :  { %v1433_v27 = vsel %vm296_vm2, %v1429_v11, 0.0 }
 0xafd   :  { %1434 = vadd.xlane.f32.xlu2 %v1433_v27 }
 0xb6e   :  { %v3426_v30 = vpop.xlane.xlu1 %1431 }
 0xb6f   :  { %vm1441_vm9 = vcmp.gt.f32.partialorder %v3426_v30, 0.0 }
 0xb70   :  { %v3432_v31 = vsel %vm1441_vm9, %v1428_v60, %v3329_v22  ;;  %v3434_v32 = vpop.xlane.xlu2 %1434 }
 0xb71   :  { %vm1436_vm10 = vcmp.gt.f32.partialorder %v3434_v32, 0.0  ;;  %v1494_v61 = vperm.slane %v3432_v31, 0  ;;  %v1489_v57 = vrot.slane %v3432_v31, 1  ;;  %v1490_v8 = vrot.slane %v3432_v31, 2 }
 0xb72   :  { %v3443_v38 = vsel %vm1436_vm10, %v1429_v11, %v3340_v26  ;;  %v1492_v20 = vrot.slane %v3432_v31, 4  ;;  %v1491_v41 = vrot.slane %v3432_v31, 3  ;;  %v1493_v53 = vrot.slane %v3432_v31, 5 }
 0xb73   :  { %v1506_v22 = vmul.f32 %v1494_v61, %v2718_v39  ;;  %v1495_v24 = vperm.slane %v1489_v57, 0  ;;  %v1496_v40 = vperm.slane %v1490_v8, 0  ;;  %v1452_v25 = vperm.slane %v3443_v38, 0 }
 0xb74   :  { %v1498_v45 = vperm.slane %v1492_v20, 0  ;;  %v1497_v50 = vperm.slane %v1491_v41, 0  ;;  %v1448_v51 = vrot.slane %v3443_v38, 2  ;;  %v1449_v37 = vrot.slane %v3443_v38, 3 }
 0xb75   :  { %v1512_v43 = vsel %vm292_vm1, %v1506_v22, 0.0  ;;  %v1507_v14 = vmul.f32 %v1495_v24, %v2727_v52  ;;  %v1508_v44 = vmul.f32 %v1496_v40, %v2705_v23  ;;  %v1464_v16 = vmul.f32 %v1452_v25, %v2718_v39 }
 0xb76   :  { %1513 = vadd.xlane.f32.xlu0 %v1512_v43  ;;  %v1510_v62 = vmul.f32 %v1498_v45, %v2712_v33  ;;  %v1509_v36 = vmul.f32 %v1497_v50, %v2736_v63  ;;  %v1447_v55 = vrot.slane %v3443_v38, 1  ;;  %v1454_v42 = vperm.slane %v1448_v51, 0 }
 0xb77   :  { %v1515_v26 = vsel %vm292_vm1, %v1507_v14, 0.0  ;;  %v1518_v21 = vsel %vm292_vm1, %v1508_v44, 0.0  ;;  %v1470_v58 = vsel %vm292_vm1, %v1464_v16, 0.0  ;;  %v1455_v48 = vperm.slane %v1449_v37, 0 }
 0xb78   :  { %1516 = vadd.xlane.f32.xlu1 %v1515_v26  ;;  %1519 = vadd.xlane.f32.xlu2 %v1518_v21  ;;  %v1524_v35 = vsel %vm292_vm1, %v1510_v62, 0.0  ;;  %v1521_v46 = vsel %vm292_vm1, %v1509_v36, 0.0  ;;  %v1453_v49 = vperm.slane %v1447_v55, 0  ;;  %v1466_v1 = vmul.f32 %v1454_v42, %v2705_v23 }
 0xb79   :  { %v1467_v54 = vmul.f32 %v1455_v48, %v2736_v63  ;;  %v1451_v59 = vrot.slane %v3443_v38, 5  ;;  %v1450_v56 = vrot.slane %v3443_v38, 4  ;;  %v1499_v18 = vperm.slane %v1493_v53, 0 }
 0xb7a   :  { %v1465_v7 = vmul.f32 %v1453_v49, %v2727_v52  ;;  %v1476_v17 = vsel %vm292_vm1, %v1466_v1, 0.0  ;;  %v3484_v41 = vsel %vm1436_vm10, %v3434_v32, %v3381_v29  ;;  %v3494_v45 = vsel %vm1441_vm9, %v3426_v30, %v3391_v34 }
 0xb7b   :  { %v1479_v0 = vsel %vm292_vm1, %v1467_v54, 0.0  ;;  %v1457_v4 = vperm.slane %v1451_v59, 0  ;;  %v1456_v5 = vperm.slane %v1450_v56, 0  ;;  %v1511_v19 = vmul.f32 %v1499_v18, %v2744_v9 }
 0xb7c   :  { %v1473_v2 = vsel %vm292_vm1, %v1465_v7, 0.0  ;;  %v1574_v29 = vmul.f32 %v3494_v45, %v3484_v41  ;;  %v1578_v32 = vmul.f32 %v3484_v41, %v3484_v41 }
 0xb7d   :  { %v1469_v6 = vmul.f32 %v1457_v4, %v2744_v9  ;;  %v1468_v47 = vmul.f32 %v1456_v5, %v2712_v33  ;;  %v1527_v3 = vsel %vm292_vm1, %v1511_v19, 0.0 }
 0xb7e   :  { %1471 = vadd.xlane.f32.xlu0 %v1470_v58  ;;  %v1575_v30 = vmul.f32 %v1574_v29, %v3494_v45  ;;  %v1579_v42 = vmul.f32 %v1578_v32, %v3494_v45 }
 0xb7f   :  { %v1485_v60 = vsel %vm292_vm1, %v1469_v6, 0.0  ;;  %v1482_v10 = vsel %vm292_vm1, %v1468_v47, 0.0 }
 0xb80   :  { %1525 = vadd.xlane.f32.xlu1 %v1524_v35  ;;  %1522 = vadd.xlane.f32.xlu2 %v1521_v46  ;;  %v1580_v18 = vmul.f32 2.0, %v1579_v42 }
 0xb86   :  { %1477 = vadd.xlane.f32.xlu0 %v1476_v17  ;;  %v1576_v17 = vmul.f32 2.0, %v1575_v30 }
 0xb88   :  { %1480 = vadd.xlane.f32.xlu2 %v1479_v0  ;;  %1474 = vadd.xlane.f32.xlu1 %v1473_v2 }
 0xb8e   :  { %1528 = vadd.xlane.f32.xlu0 %v1527_v3 }
 0xb90   :  { %1486 = vadd.xlane.f32.xlu2 %v1485_v60  ;;  %1483 = vadd.xlane.f32.xlu1 %v1482_v10  ;;  %v1585_v10 = vmul.f32 %v3494_v45, %v3494_v45 }
 0xbe9   :  { %v1514_v11 = vpop.xlane.xlu0 %1513 }
 0xbea   :  { %v1558_v40 = vperm.slane %v1514_v11, %v2692_v13 }
 0xbeb   :  { %v1517_v27 = vpop.xlane.xlu1 %1516  ;;  %v1520_v61 = vpop.xlane.xlu2 %1519 }
 0xbec   :  { %v1559_v22 = vperm.slane %v1517_v27, %v2692_v13  ;;  %v1560_v43 = vperm.slane %v1520_v61, %v2692_v13 }
 0xbee   :  { %v1564_v25 = vsel %vm396_vm3, %v1559_v22, %v1558_v40 }
 0xbef   :  { %v1565_v16 = vsel %vm398_vm4, %v1560_v43, %v1564_v25 }
 0xbf1   :  { %v1472_v57 = vpop.xlane.xlu0 %1471 }
 0xbf2   :  { %v1536_v50 = vperm.slane %v1472_v57, %v2692_v13 }
 0xbf3   :  { %v1526_v8 = vpop.xlane.xlu1 %1525  ;;  %v1523_v20 = vpop.xlane.xlu2 %1522 }
 0xbf4   :  { %v1561_v26 = vperm.slane %v1523_v20, %v2692_v13  ;;  %v1562_v51 = vperm.slane %v1526_v8, %v2692_v13 }
 0xbf6   :  { %v1566_v36 = vsel %vm4289_vm5, %v1561_v26, %v1565_v16 }
 0xbf7   :  { %v1567_v49 = vsel %vm4288_vm6, %v1562_v51, %v1566_v36 }
 0xbf9   :  { %v1478_v24 = vpop.xlane.xlu0 %1477 }
 0xbfa   :  { %v1538_v37 = vperm.slane %v1478_v24, %v2692_v13 }
 0xbfb   :  { %v1475_v14 = vpop.xlane.xlu1 %1474  ;;  %v1481_v44 = vpop.xlane.xlu2 %1480 }
 0xbfc   :  { %v1537_v21 = vperm.slane %v1475_v14, %v2692_v13  ;;  %v1539_v35 = vperm.slane %v1481_v44, %v2692_v13 }
 0xbfe   :  { %v1542_v62 = vsel %vm396_vm3, %v1537_v21, %v1536_v50 }
 0xbff   :  { %v1543_v55 = vsel %vm398_vm4, %v1538_v37, %v1542_v62 }
 0xc00   :  { %v1544_v7 = vsel %vm4289_vm5, %v1539_v35, %v1543_v55 }
 0xc01   :  { %v1529_v34 = vpop.xlane.xlu0 %1528 }
 0xc02   :  { %v1563_v58 = vperm.slane %v1529_v34, %v2692_v13 }
 0xc03   :  { %v1484_v46 = vpop.xlane.xlu1 %1483  ;;  %v1487_v48 = vpop.xlane.xlu2 %1486 }
 0xc04   :  { %v1540_v1 = vperm.slane %v1484_v46, %v2692_v13  ;;  %v1541_v53 = vperm.slane %v1487_v48, %v2692_v13  ;;  %v1568_v54 = vsel %vm4287_vm7, %v1563_v58, %v1567_v49 }
 0xc05   :  { %v1570_v59 = vmul.f32 %v1568_v54, %v3432_v31  ;;  %v1581_v19 = vmul.f32 %v1580_v18, %v1568_v54 }
 0xc06   :  { %v1545_v56 = vsel %vm4288_vm6, %v1540_v1, %v1544_v7 }
 0xc07   :  { %v1571_v0 = vsel %vm296_vm2, %v1570_v59, 0.0  ;;  %v1546_v2 = vsel %vm4287_vm7, %v1541_v53, %v1545_v56 }
 0xc08   :  { %1572 = vadd.xlane.f32.xlu0 %v1571_v0  ;;  %v1548_v4 = vmul.f32 %v1546_v2, %v3443_v38  ;;  %v1577_v5 = vmul.f32 %v1576_v17, %v1546_v2 }
 0xc0a   :  { %v1549_v6 = vsel %vm296_vm2, %v1548_v4, 0.0  ;;  %v1582_v47 = vsub.f32 %v1577_v5, %v1581_v19 }
 0xc0b   :  { %1550 = vadd.xlane.f32.xlu1 %v1549_v6 }
 0xc7b   :  { %v1573_v3 = vpop.xlane.xlu0 %1572 }
 0xc7c   :  { %v1583_v60 = vmul.f32 %v1578_v32, %v1573_v3 }
 0xc7e   :  { %v1584_v11 = vadd.f32 %v1583_v60, %v1582_v47  ;;  %v1551_v27 = vpop.xlane.xlu1 %1550 }
 0xc7f   :  { %v1586_v61 = vmul.f32 %v1585_v10, %v1551_v27 }
 0xc81   :  { %v1587_v57 = vsub.f32 %v1584_v11, %v1586_v61 }
 0xc83   :  { %vm1588_vm11 = vcmp.lt.f32.partialorder %v1587_v57, 0.0 }
 0xc84   :  { %v2531_v8 = vsel %vm1588_vm11, 1.0, %v2602_v15 }
 0xc85   :  { %v1591_v20 = vmul.f32 %v3214_v28, %v2531_v8 }
 0xc87   :  { %v1593_v22 = vsel %vm296_vm2, %v1591_v20, 0.0  ;;  %v1592_v24 = vsub.f32 %v3214_v28, %v1591_v20 }
 0xc88   :  { %1594 = vadd.xlane.f32.xlu2 %v1593_v22 }
 0xc89   :  { %v1596_v40 = vsel %vm296_vm2, %v1592_v24, 0.0 }
 0xc8a   :  { %1597 = vadd.xlane.f32.xlu0 %v1596_v40 }
 0xcfb   :  { %v3529_v43 = vpop.xlane.xlu2 %1594 }
 0xcfc   :  { %vm1604_vm12 = vcmp.gt.f32.partialorder %v3529_v43, 0.0 }
 0xcfd   :  { %v3535_v14 = vsel %vm1604_vm12, %v1591_v20, %v3432_v31  ;;  %v3537_v44 = vpop.xlane.xlu0 %1597 }
 0xcfe   :  { %vm1599_vm13 = vcmp.gt.f32.partialorder %v3537_v44, 0.0  ;;  %v1657_v25 = vperm.slane %v3535_v14, 0  ;;  %v1652_v28 = vrot.slane %v3535_v14, 1  ;;  %v1653_v26 = vrot.slane %v3535_v14, 2 }
 0xcff   :  { %v3546_v21 = vsel %vm1599_vm13, %v1592_v24, %v3443_v38  ;;  %v1655_v50 = vrot.slane %v3535_v14, 4  ;;  %v1654_v16 = vrot.slane %v3535_v14, 3  ;;  %v1656_v18 = vrot.slane %v3535_v14, 5 }
 0xd00   :  { %v1669_v31 = vmul.f32 %v1657_v25, %v2718_v39  ;;  %v1658_v29 = vperm.slane %v1652_v28, 0  ;;  %v1659_v32 = vperm.slane %v1653_v26, 0  ;;  %v1615_v37 = vperm.slane %v3546_v21, 0 }
 0xd01   :  { %v1661_v30 = vperm.slane %v1655_v50, 0  ;;  %v1660_v55 = vperm.slane %v1654_v16, 0  ;;  %v1611_v42 = vrot.slane %v3546_v21, 2  ;;  %v1612_v48 = vrot.slane %v3546_v21, 3 }
 0xd02   :  { %v1675_v51 = vsel %vm292_vm1, %v1669_v31, 0.0  ;;  %v1670_v62 = vmul.f32 %v1658_v29, %v2727_v52  ;;  %v1671_v36 = vmul.f32 %v1659_v32, %v2705_v23  ;;  %v1627_v58 = vmul.f32 %v1615_v37, %v2718_v39 }
 0xd03   :  { %1676 = vadd.xlane.f32.xlu1 %v1675_v51  ;;  %v1673_v35 = vmul.f32 %v1661_v30, %v2712_v33  ;;  %v1672_v46 = vmul.f32 %v1660_v55, %v2736_v63  ;;  %v1610_v49 = vrot.slane %v3546_v21, 1  ;;  %v1617_v53 = vperm.slane %v1611_v42, 0 }
 0xd04   :  { %v1678_v38 = vsel %vm292_vm1, %v1670_v62, 0.0  ;;  %v1681_v34 = vsel %vm292_vm1, %v1671_v36, 0.0  ;;  %v1633_v1 = vsel %vm292_vm1, %v1627_v58, 0.0  ;;  %v1618_v59 = vperm.slane %v1612_v48, 0 }
 0xd05   :  { %1679 = vadd.xlane.f32.xlu2 %v1678_v38  ;;  %1682 = vadd.xlane.f32.xlu0 %v1681_v34  ;;  %v1687_v54 = vsel %vm292_vm1, %v1673_v35, 0.0  ;;  %v1684_v7 = vsel %vm292_vm1, %v1672_v46, 0.0  ;;  %v1616_v56 = vperm.slane %v1610_v49, 0  ;;  %v1629_v17 = vmul.f32 %v1617_v53, %v2705_v23 }
 0xd06   :  { %v1630_v0 = vmul.f32 %v1618_v59, %v2736_v63  ;;  %v1614_v4 = vrot.slane %v3546_v21, 5  ;;  %v1613_v5 = vrot.slane %v3546_v21, 4  ;;  %v1662_v6 = vperm.slane %v1656_v18, 0 }
 0xd07   :  { %v1628_v2 = vmul.f32 %v1616_v56, %v2727_v52  ;;  %v1639_v19 = vsel %vm292_vm1, %v1629_v17, 0.0  ;;  %v3587_v32 = vsel %vm1599_vm13, %v3537_v44, %v3484_v41  ;;  %v3597_v34 = vsel %vm1604_vm12, %v3529_v43, %v3494_v45 }
 0xd08   :  { %v1642_v47 = vsel %vm292_vm1, %v1630_v0, 0.0  ;;  %v1620_v60 = vperm.slane %v1614_v4, 0  ;;  %v1619_v10 = vperm.slane %v1613_v5, 0  ;;  %v1674_v11 = vmul.f32 %v1662_v6, %v2744_v9 }
 0xd09   :  { %v1636_v3 = vsel %vm292_vm1, %v1628_v2, 0.0  ;;  %v1737_v41 = vmul.f32 %v3597_v34, %v3587_v32  ;;  %v1741_v44 = vmul.f32 %v3587_v32, %v3587_v32 }
 0xd0a   :  { %v1632_v27 = vmul.f32 %v1620_v60, %v2744_v9  ;;  %v1631_v61 = vmul.f32 %v1619_v10, %v2712_v33  ;;  %v1690_v57 = vsel %vm292_vm1, %v1674_v11, 0.0 }
 0xd0b   :  { %1634 = vadd.xlane.f32.xlu1 %v1633_v1  ;;  %v1738_v43 = vmul.f32 %v1737_v41, %v3597_v34  ;;  %v1742_v1 = vmul.f32 %v1741_v44, %v3597_v34 }
 0xd0c   :  { %v1648_v8 = vsel %vm292_vm1, %v1632_v27, 0.0  ;;  %v1645_v20 = vsel %vm292_vm1, %v1631_v61, 0.0 }
 0xd0d   :  { %1688 = vadd.xlane.f32.xlu2 %v1687_v54  ;;  %1685 = vadd.xlane.f32.xlu0 %v1684_v7  ;;  %v1739_v5 = vmul.f32 2.0, %v1738_v43 }
 0xd13   :  { %1640 = vadd.xlane.f32.xlu1 %v1639_v19  ;;  %v1743_v19 = vmul.f32 2.0, %v1742_v1 }
 0xd15   :  { %1643 = vadd.xlane.f32.xlu0 %v1642_v47  ;;  %1637 = vadd.xlane.f32.xlu2 %v1636_v3 }
 0xd1b   :  { %1691 = vadd.xlane.f32.xlu1 %v1690_v57 }
 0xd1d   :  { %1649 = vadd.xlane.f32.xlu0 %v1648_v8  ;;  %1646 = vadd.xlane.f32.xlu2 %v1645_v20  ;;  %v1748_v8 = vmul.f32 %v3597_v34, %v3597_v34 }
 0xd76   :  { %v1677_v22 = vpop.xlane.xlu1 %1676 }
 0xd77   :  { %v1721_v29 = vperm.slane %v1677_v22, %v2692_v13 }
 0xd78   :  { %v1680_v24 = vpop.xlane.xlu2 %1679  ;;  %v1683_v40 = vpop.xlane.xlu0 %1682 }
 0xd79   :  { %v1722_v50 = vperm.slane %v1680_v24, %v2692_v13  ;;  %v1723_v16 = vperm.slane %v1683_v40, %v2692_v13 }
 0xd7b   :  { %v1727_v36 = vsel %vm396_vm3, %v1722_v50, %v1721_v29 }
 0xd7c   :  { %v1728_v55 = vsel %vm398_vm4, %v1723_v16, %v1727_v36 }
 0xd7e   :  { %v1635_v25 = vpop.xlane.xlu1 %1634 }
 0xd7f   :  { %v1699_v30 = vperm.slane %v1635_v25, %v2692_v13 }
 0xd80   :  { %v1689_v28 = vpop.xlane.xlu2 %1688  ;;  %v1686_v26 = vpop.xlane.xlu0 %1685 }
 0xd81   :  { %v1724_v37 = vperm.slane %v1686_v26, %v2692_v13  ;;  %v1725_v58 = vperm.slane %v1689_v28, %v2692_v13  ;;  %v3631_v28 = vld [vmem:[%s4278_s1] sm:$0x3f] }
 0xd83   :  { %v1729_v35 = vsel %vm4289_vm5, %v1724_v37, %v1728_v55 }
 0xd84   :  { %v1730_v59 = vsel %vm4288_vm6, %v1725_v58, %v1729_v35 }
 0xd86   :  { %v1641_v31 = vpop.xlane.xlu1 %1640 }
 0xd87   :  { %v1701_v46 = vperm.slane %v1641_v31, %v2692_v13 }
 0xd88   :  { %v1638_v51 = vpop.xlane.xlu2 %1637  ;;  %v1644_v62 = vpop.xlane.xlu0 %1643 }
 0xd89   :  { %v1700_v38 = vperm.slane %v1638_v51, %v2692_v13  ;;  %v1702_v53 = vperm.slane %v1644_v62, %v2692_v13 }
 0xd8b   :  { %v1705_v42 = vsel %vm396_vm3, %v1700_v38, %v1699_v30 }
 0xd8c   :  { %v1706_v48 = vsel %vm398_vm4, %v1701_v46, %v1705_v42 }
 0xd8d   :  { %v1707_v0 = vsel %vm4289_vm5, %v1702_v53, %v1706_v48 }
 0xd8e   :  { %v1692_v45 = vpop.xlane.xlu1 %1691 }
 0xd8f   :  { %v1726_v49 = vperm.slane %v1692_v45, %v2692_v13 }
 0xd90   :  { %v1647_v54 = vpop.xlane.xlu2 %1646  ;;  %v1650_v7 = vpop.xlane.xlu0 %1649 }
 0xd91   :  { %v1703_v56 = vperm.slane %v1647_v54, %v2692_v13  ;;  %v1704_v17 = vperm.slane %v1650_v7, %v2692_v13  ;;  %v1731_v18 = vsel %vm4287_vm7, %v1726_v49, %v1730_v59 }
 0xd92   :  { %v1733_v2 = vmul.f32 %v1731_v18, %v3535_v14  ;;  %v1744_v10 = vmul.f32 %v1743_v19, %v1731_v18 }
 0xd93   :  { %v1708_v4 = vsel %vm4288_vm6, %v1703_v56, %v1707_v0 }
 0xd94   :  { %v1734_v6 = vsel %vm296_vm2, %v1733_v2, 0.0  ;;  %v1709_v47 = vsel %vm4287_vm7, %v1704_v17, %v1708_v4 }
 0xd95   :  { %1735 = vadd.xlane.f32.xlu1 %v1734_v6  ;;  %v1711_v3 = vmul.f32 %v1709_v47, %v3546_v21  ;;  %v1740_v60 = vmul.f32 %v1739_v5, %v1709_v47 }
 0xd97   :  { %v1712_v11 = vsel %vm296_vm2, %v1711_v3, 0.0  ;;  %v1745_v27 = vsub.f32 %v1740_v60, %v1744_v10 }
 0xd98   :  { %1713 = vadd.xlane.f32.xlu2 %v1712_v11 }
 0xe08   :  { %v1736_v61 = vpop.xlane.xlu1 %1735 }
 0xe09   :  { %v1746_v57 = vmul.f32 %v1741_v44, %v1736_v61 }
 0xe0b   :  { %v1747_v20 = vadd.f32 %v1746_v57, %v1745_v27  ;;  %v1714_v22 = vpop.xlane.xlu2 %1713 }
 0xe0c   :  { %v1749_v24 = vmul.f32 %v1748_v8, %v1714_v22 }
 0xe0e   :  { %v1750_v40 = vsub.f32 %v1747_v20, %v1749_v24 }
 0xe10   :  { %vm1751_vm14 = vcmp.lt.f32.partialorder %v1750_v40, 0.0 }
 0xe11   :  { %v2532_v25 = vsel %vm1751_vm14, 1.0, %v2602_v15 }
 0xe12   :  { %v1754_v26 = vmul.f32 %v3631_v28, %v2532_v25 }
 0xe14   :  { %v1756_v50 = vsel %vm296_vm2, %v1754_v26, 0.0  ;;  %v1755_v31 = vsub.f32 %v3631_v28, %v1754_v26 }
 0xe15   :  { %1757 = vadd.xlane.f32.xlu0 %v1756_v50 }
 0xe16   :  { %v1759_v29 = vsel %vm296_vm2, %v1755_v31, 0.0 }
 0xe17   :  { %1760 = vadd.xlane.f32.xlu1 %v1759_v29 }
 0xe88   :  { %v3637_v16 = vpop.xlane.xlu0 %1757 }
 0xe89   :  { %vm1767_vm15 = vcmp.gt.f32.partialorder %v3637_v16, 0.0 }
 0xe8a   :  { %v3643_v51 = vsel %vm1767_vm15, %v1754_v26, %v3535_v14  ;;  %v3645_v62 = vpop.xlane.xlu1 %1760 }
 0xe8b   :  { %vm1762_vm0 = vcmp.gt.f32.partialorder %v3645_v62, 0.0  ;;  %v1820_v36 = vperm.slane %v3643_v51, 0  ;;  %v1815_v37 = vrot.slane %v3643_v51, 1  ;;  %v1816_v38 = vrot.slane %v3643_v51, 2 }
 0xe8c   :  { %v3654_v30 = vsel %vm1762_vm0, %v1755_v31, %v3546_v21  ;;  %v1818_v41 = vrot.slane %v3643_v51, 4  ;;  %v1817_v58 = vrot.slane %v3643_v51, 3  ;;  %v1819_v6 = vrot.slane %v3643_v51, 5 }
 0xe8d   :  { %v1832_v14 = vmul.f32 %v1820_v36, %v2718_v39  ;;  %v1821_v44 = vperm.slane %v1815_v37, 0  ;;  %v1822_v55 = vperm.slane %v1816_v38, 0  ;;  %v1778_v45 = vperm.slane %v3654_v30, 0 }
 0xe8e   :  { %v1824_v48 = vperm.slane %v1818_v41, 0  ;;  %v1823_v49 = vperm.slane %v1817_v58, 0  ;;  %v1774_v53 = vrot.slane %v3654_v30, 2  ;;  %v1775_v59 = vrot.slane %v3654_v30, 3 }
 0xe8f   :  { %v1838_v42 = vsel %vm292_vm1, %v1832_v14, 0.0  ;;  %v1833_v35 = vmul.f32 %v1821_v44, %v2727_v52  ;;  %v1834_v46 = vmul.f32 %v1822_v55, %v2705_v23  ;;  %v1790_v1 = vmul.f32 %v1778_v45, %v2718_v39 }
 0xe90   :  { %1839 = vadd.xlane.f32.xlu2 %v1838_v42  ;;  %v1836_v54 = vmul.f32 %v1824_v48, %v2712_v33  ;;  %v1835_v7 = vmul.f32 %v1823_v49, %v2736_v63  ;;  %v1773_v56 = vrot.slane %v3654_v30, 1  ;;  %v1780_v18 = vperm.slane %v1774_v53, 0 }
 0xe91   :  { %v1841_v21 = vsel %vm292_vm1, %v1833_v35, 0.0  ;;  %v1844_v43 = vsel %vm292_vm1, %v1834_v46, 0.0  ;;  %v1796_v17 = vsel %vm292_vm1, %v1790_v1, 0.0  ;;  %v1781_v4 = vperm.slane %v1775_v59, 0 }
 0xe92   :  { %1842 = vadd.xlane.f32.xlu0 %v1841_v21  ;;  %1845 = vadd.xlane.f32.xlu1 %v1844_v43  ;;  %v1850_v0 = vsel %vm292_vm1, %v1836_v54, 0.0  ;;  %v1847_v2 = vsel %vm292_vm1, %v1835_v7, 0.0  ;;  %v1779_v5 = vperm.slane %v1773_v56, 0  ;;  %v1792_v19 = vmul.f32 %v1780_v18, %v2705_v23 }
 0xe93   :  { %v1793_v47 = vmul.f32 %v1781_v4, %v2736_v63  ;;  %v1777_v60 = vrot.slane %v3654_v30, 5  ;;  %v1776_v10 = vrot.slane %v3654_v30, 4  ;;  %v1825_v27 = vperm.slane %v1819_v6, 0 }
 0xe94   :  { %v1791_v3 = vmul.f32 %v1779_v5, %v2727_v52  ;;  %v1802_v11 = vsel %vm292_vm1, %v1792_v19, 0.0  ;;  %v3695_v58 = vsel %vm1762_vm0, %v3645_v62, %v3587_v32  ;;  %v3705_v48 = vsel %vm1767_vm15, %v3637_v16, %v3597_v34 }
 0xe95   :  { %v1805_v61 = vsel %vm292_vm1, %v1793_v47, 0.0  ;;  %v1783_v8 = vperm.slane %v1777_v60, 0  ;;  %v1782_v20 = vperm.slane %v1776_v10, 0  ;;  %v1837_v22 = vmul.f32 %v1825_v27, %v2744_v9 }
 0xe96   :  { %v1799_v57 = vsel %vm292_vm1, %v1791_v3, 0.0  ;;  %v1900_v32 = vmul.f32 %v3705_v48, %v3695_v58  ;;  %v1904_v62 = vmul.f32 %v3695_v58, %v3695_v58 }
 0xe97   :  { %v1795_v24 = vmul.f32 %v1783_v8, %v2744_v9  ;;  %v1794_v40 = vmul.f32 %v1782_v20, %v2712_v33  ;;  %v1853_v25 = vsel %vm292_vm1, %v1837_v22, 0.0 }
 0xe98   :  { %1797 = vadd.xlane.f32.xlu2 %v1796_v17  ;;  %v1901_v16 = vmul.f32 %v1900_v32, %v3705_v48  ;;  %v1905_v18 = vmul.f32 %v1904_v62, %v3705_v48 }
 0xe99   :  { %v1811_v26 = vsel %vm292_vm1, %v1795_v24, 0.0  ;;  %v1808_v50 = vsel %vm292_vm1, %v1794_v40, 0.0 }
 0xe9a   :  { %1851 = vadd.xlane.f32.xlu0 %v1850_v0  ;;  %1848 = vadd.xlane.f32.xlu1 %v1847_v2  ;;  %v1902_v10 = vmul.f32 2.0, %v1901_v16  ;;  %v1906_v27 = vmul.f32 2.0, %v1905_v18 }
 0xea0   :  { %1803 = vadd.xlane.f32.xlu2 %v1802_v11 }
 0xea2   :  { %1806 = vadd.xlane.f32.xlu1 %v1805_v61  ;;  %1800 = vadd.xlane.f32.xlu0 %v1799_v57 }
 0xea8   :  { %1854 = vadd.xlane.f32.xlu2 %v1853_v25 }
 0xeaa   :  { %1812 = vadd.xlane.f32.xlu1 %v1811_v26  ;;  %1809 = vadd.xlane.f32.xlu0 %v1808_v50  ;;  %v1911_v50 = vmul.f32 %v3705_v48, %v3705_v48 }
 0xf03   :  { %v1840_v31 = vpop.xlane.xlu2 %1839 }
 0xf04   :  { %v1884_v55 = vperm.slane %v1840_v31, %v2692_v13 }
 0xf05   :  { %v1843_v29 = vpop.xlane.xlu0 %1842  ;;  %v1846_v36 = vpop.xlane.xlu1 %1845 }
 0xf06   :  { %v1885_v14 = vperm.slane %v1843_v29, %v2692_v13  ;;  %v1886_v42 = vperm.slane %v1846_v36, %v2692_v13 }
 0xf08   :  { %v1890_v45 = vsel %vm396_vm3, %v1885_v14, %v1884_v55 }
 0xf09   :  { %v1891_v1 = vsel %vm398_vm4, %v1886_v42, %v1890_v45 }
 0xf0b   :  { %v1798_v37 = vpop.xlane.xlu2 %1797 }
 0xf0c   :  { %v1862_v49 = vperm.slane %v1798_v37, %v2692_v13 }
 0xf0d   :  { %v1852_v38 = vpop.xlane.xlu0 %1851  ;;  %v1849_v41 = vpop.xlane.xlu1 %1848 }
 0xf0e   :  { %v1887_v21 = vperm.slane %v1849_v41, %v2692_v13  ;;  %v1888_v53 = vperm.slane %v1852_v38, %v2692_v13 }
 0xf10   :  { %v1892_v7 = vsel %vm4289_vm5, %v1887_v21, %v1891_v1 }
 0xf11   :  { %v1893_v5 = vsel %vm4288_vm6, %v1888_v53, %v1892_v7 }
 0xf13   :  { %v1804_v44 = vpop.xlane.xlu2 %1803 }
 0xf14   :  { %v1864_v59 = vperm.slane %v1804_v44, %v2692_v13 }
 0xf15   :  { %v1801_v35 = vpop.xlane.xlu0 %1800  ;;  %v1807_v46 = vpop.xlane.xlu1 %1806 }
 0xf16   :  { %v1863_v43 = vperm.slane %v1801_v35, %v2692_v13  ;;  %v1865_v0 = vperm.slane %v1807_v46, %v2692_v13 }
 0xf18   :  { %v1868_v54 = vsel %vm396_vm3, %v1863_v43, %v1862_v49 }
 0xf19   :  { %v1869_v56 = vsel %vm398_vm4, %v1864_v59, %v1868_v54 }
 0xf1a   :  { %v1870_v3 = vsel %vm4289_vm5, %v1865_v0, %v1869_v56 }
 0xf1b   :  { %v1855_v34 = vpop.xlane.xlu2 %1854 }
 0xf1c   :  { %v1889_v17 = vperm.slane %v1855_v34, %v2692_v13 }
 0xf1d   :  { %v1810_v2 = vpop.xlane.xlu0 %1809  ;;  %v1813_v4 = vpop.xlane.xlu1 %1812 }
 0xf1e   :  { %v1866_v19 = vperm.slane %v1810_v2, %v2692_v13  ;;  %v1867_v6 = vperm.slane %v1813_v4, %v2692_v13  ;;  %v1894_v47 = vsel %vm4287_vm7, %v1889_v17, %v1893_v5 }
 0xf1f   :  { %v1896_v60 = vmul.f32 %v1894_v47, %v3643_v51  ;;  %v1907_v22 = vmul.f32 %v1906_v27, %v1894_v47 }
 0xf20   :  { %v1871_v11 = vsel %vm4288_vm6, %v1866_v19, %v1870_v3 }
 0xf21   :  { %v1897_v61 = vsel %vm296_vm2, %v1896_v60, 0.0  ;;  %v1872_v57 = vsel %vm4287_vm7, %v1867_v6, %v1871_v11 }
 0xf22   :  { %1898 = vadd.xlane.f32.xlu2 %v1897_v61  ;;  %v1874_v8 = vmul.f32 %v1872_v57, %v3654_v30  ;;  %v1903_v20 = vmul.f32 %v1902_v10, %v1872_v57 }
 0xf24   :  { %v1875_v24 = vsel %vm296_vm2, %v1874_v8, 0.0  ;;  %v1908_v40 = vsub.f32 %v1903_v20, %v1907_v22 }
 0xf25   :  { %1876 = vadd.xlane.f32.xlu0 %v1875_v24 }
 0xf95   :  { %v1899_v25 = vpop.xlane.xlu2 %1898 }
 0xf96   :  { %v1909_v26 = vmul.f32 %v1904_v62, %v1899_v25 }
 0xf98   :  { %v1910_v31 = vadd.f32 %v1909_v26, %v1908_v40  ;;  %v1877_v29 = vpop.xlane.xlu0 %1876 }
 0xf99   :  { %v1912_v36 = vmul.f32 %v1911_v50, %v1877_v29 }
 0xf9b   :  { %v1913_v37 = vsub.f32 %v1910_v31, %v1912_v36 }
 0xf9d   :  { %vm1914_vm8 = vcmp.lt.f32.partialorder %v1913_v37, 0.0 }
 0xf9e   :  { %v2533_v38 = vsel %vm1914_vm8, 1.0, %v2602_v15 }
 0xf9f   :  { %v1917_v41 = vmul.f32 %v3631_v28, %v2533_v38 }
 0xfa1   :  { %v1919_v14 = vsel %vm296_vm2, %v1917_v41, 0.0  ;;  %v1918_v44 = vsub.f32 %v3631_v28, %v1917_v41 }
 0xfa2   :  { %1920 = vadd.xlane.f32.xlu1 %v1919_v14 }
 0xfa3   :  { %v1922_v55 = vsel %vm296_vm2, %v1918_v44, 0.0 }
 0xfa4   :  { %1923 = vadd.xlane.f32.xlu2 %v1922_v55 }
0x1015   :  { %v3740_v42 = vpop.xlane.xlu1 %1920 }
0x1016   :  { %vm1930_vm9 = vcmp.gt.f32.partialorder %v3740_v42, 0.0 }
0x1017   :  { %v3746_v35 = vsel %vm1930_vm9, %v1917_v41, %v3643_v51  ;;  %v3748_v46 = vpop.xlane.xlu2 %1923 }
0x1018   :  { %vm1925_vm10 = vcmp.gt.f32.partialorder %v3748_v46, 0.0  ;;  %v1983_v45 = vperm.slane %v3746_v35, 0  ;;  %v1978_v21 = vrot.slane %v3746_v35, 1  ;;  %v1979_v43 = vrot.slane %v3746_v35, 2 }
0x1019   :  { %v3757_v49 = vsel %vm1925_vm10, %v1918_v44, %v3654_v30  ;;  %v1981_v32 = vrot.slane %v3746_v35, 4  ;;  %v1980_v53 = vrot.slane %v3746_v35, 3  ;;  %v1982_v27 = vrot.slane %v3746_v35, 5 }
0x101a   :  { %v1995_v51 = vmul.f32 %v1983_v45, %v2718_v39  ;;  %v1984_v62 = vperm.slane %v1978_v21, 0  ;;  %v1985_v1 = vperm.slane %v1979_v43, 0  ;;  %v1941_v34 = vperm.slane %v3757_v49, 0 }
0x101b   :  { %v1987_v56 = vperm.slane %v1981_v32, 0  ;;  %v1986_v17 = vperm.slane %v1980_v53, 0  ;;  %v1937_v0 = vrot.slane %v3757_v49, 2  ;;  %v1938_v5 = vrot.slane %v3757_v49, 3 }
0x101c   :  { %v2001_v54 = vsel %vm292_vm1, %v1995_v51, 0.0  ;;  %v1996_v7 = vmul.f32 %v1984_v62, %v2727_v52  ;;  %v1997_v59 = vmul.f32 %v1985_v1, %v2705_v23  ;;  %v1953_v18 = vmul.f32 %v1941_v34, %v2718_v39 }
0x101d   :  { %2002 = vadd.xlane.f32.xlu0 %v2001_v54  ;;  %v1999_v2 = vmul.f32 %v1987_v56, %v2712_v33  ;;  %v1998_v4 = vmul.f32 %v1986_v17, %v2736_v63  ;;  %v1936_v19 = vrot.slane %v3757_v49, 1  ;;  %v1943_v47 = vperm.slane %v1937_v0, 0 }
0x101e   :  { %v2004_v30 = vsel %vm292_vm1, %v1996_v7, 0.0  ;;  %v2007_v16 = vsel %vm292_vm1, %v1997_v59, 0.0  ;;  %v1959_v6 = vsel %vm292_vm1, %v1953_v18, 0.0  ;;  %v1944_v10 = vperm.slane %v1938_v5, 0 }
0x101f   :  { %2005 = vadd.xlane.f32.xlu1 %v2004_v30  ;;  %2008 = vadd.xlane.f32.xlu2 %v2007_v16  ;;  %v2013_v3 = vsel %vm292_vm1, %v1999_v2, 0.0  ;;  %v2010_v60 = vsel %vm292_vm1, %v1998_v4, 0.0  ;;  %v1942_v39 = vperm.slane %v1936_v19, 0  ;;  %v1955_v11 = vmul.f32 %v1943_v47, %v2705_v23 }
0x1020   :  { %v1956_v61 = vmul.f32 %v1944_v10, %v2736_v63  ;;  %v1940_v8 = vrot.slane %v3757_v49, 5  ;;  %v1939_v20 = vrot.slane %v3757_v49, 4  ;;  %v1988_v24 = vperm.slane %v1982_v27, 0 }
0x1021   :  { %v1954_v57 = vmul.f32 %v1942_v39, %v2727_v52  ;;  %v1965_v22 = vsel %vm292_vm1, %v1955_v11, 0.0  ;;  %v3798_v21 = vsel %vm1925_vm10, %v3748_v46, %v3695_v58  ;;  %v3808_v54 = vsel %vm1930_vm9, %v3740_v42, %v3705_v48 }
0x1022   :  { %v1968_v40 = vsel %vm292_vm1, %v1956_v61, 0.0  ;;  %v1946_v26 = vperm.slane %v1940_v8, 0  ;;  %v1945_v23 = vperm.slane %v1939_v20, 0  ;;  %v2000_v63 = vmul.f32 %v1988_v24, %v2744_v9 }
0x1023   :  { %v1962_v25 = vsel %vm292_vm1, %v1954_v57, 0.0  ;;  %v2063_v58 = vmul.f32 %v3808_v54, %v3798_v21  ;;  %v2067_v46 = vmul.f32 %v3798_v21, %v3798_v21 }
0x1024   :  { %v1958_v52 = vmul.f32 %v1946_v26, %v2744_v9  ;;  %v1957_v50 = vmul.f32 %v1945_v23, %v2712_v33  ;;  %v2016_v31 = vsel %vm292_vm1, %v2000_v63, 0.0  ;;  %v2074_v23 = vmul.f32 %v3808_v54, %v3808_v54 }
0x1025   :  { %1960 = vadd.xlane.f32.xlu0 %v1959_v6  ;;  %v2064_v42 = vmul.f32 %v2063_v58, %v3808_v54  ;;  %v2068_v0 = vmul.f32 %v2067_v46, %v3808_v54 }
0x1026   :  { %v1974_v29 = vsel %vm292_vm1, %v1958_v52, 0.0  ;;  %v1971_v36 = vsel %vm292_vm1, %v1957_v50, 0.0 }
0x1027   :  { %2014 = vadd.xlane.f32.xlu1 %v2013_v3  ;;  %2011 = vadd.xlane.f32.xlu2 %v2010_v60  ;;  %v2065_v39 = vmul.f32 2.0, %v2064_v42  ;;  %v2069_v27 = vmul.f32 2.0, %v2068_v0  ;;  %v2356_v42 = vld [vmem:[%s4282_s5 + $0xe8] sm:$0xff]  ;;  %v2339_v0 = vld [vmem:[%s4282_s5 + $0x60] sm:$0xff] }
0x102d   :  { %1966 = vadd.xlane.f32.xlu0 %v1965_v22 }
0x102f   :  { %1969 = vadd.xlane.f32.xlu2 %v1968_v40  ;;  %1963 = vadd.xlane.f32.xlu1 %v1962_v25  ;;  %v2095_v40 = vshrl.u32 %v286_v12, 7 }
0x1031   :  { %2541 = vset.pattern.permute.xlu0 %v2095_v40  ;;  %2540 = vset.pattern.permute.xlu2 %v2095_v40 }
0x1032   :  { %2539 = vset.pattern.permute.xlu1 %v2095_v40 }
0x1035   :  { %2017 = vadd.xlane.f32.xlu0 %v2016_v31 }
0x1037   :  { %1975 = vadd.xlane.f32.xlu2 %v1974_v29  ;;  %1972 = vadd.xlane.f32.xlu1 %v1971_v36 }
0x1090   :  { %v2003_v37 = vpop.xlane.xlu0 %2002 }
0x1091   :  { %v2047_v33 = vperm.slane %v2003_v37, %v2692_v13 }
0x1092   :  { %v2006_v38 = vpop.xlane.xlu1 %2005  ;;  %v2009_v41 = vpop.xlane.xlu2 %2008 }
0x1093   :  { %v2048_v45 = vperm.slane %v2006_v38, %v2692_v13  ;;  %v2049_v43 = vperm.slane %v2009_v41, %v2692_v13 }
0x1095   :  { %v2053_v62 = vsel %vm396_vm3, %v2048_v45, %v2047_v33 }
0x1096   :  { %v2054_v59 = vsel %vm398_vm4, %v2049_v43, %v2053_v62  ;;  %v2341_v62 = vld [vmem:[%s4282_s5 + $0x70] sm:$0xff] }
0x1098   :  { %v1961_v14 = vpop.xlane.xlu0 %1960 }
0x1099   :  { %v2025_v7 = vperm.slane %v1961_v14, %v2692_v13 }
0x109a   :  { %v2015_v44 = vpop.xlane.xlu1 %2014  ;;  %v2012_v55 = vpop.xlane.xlu2 %2011 }
0x109b   :  { %v2050_v1 = vperm.slane %v2012_v55, %v2692_v13  ;;  %v2051_v34 = vperm.slane %v2015_v44, %v2692_v13 }
0x109d   :  { %v2055_v16 = vsel %vm4289_vm5, %v2050_v1, %v2054_v59 }
0x109e   :  { %v2056_v19 = vsel %vm4288_vm6, %v2051_v34, %v2055_v16 }
0x10a0   :  { %v1967_v9 = vpop.xlane.xlu0 %1966 }
0x10a1   :  { %v2027_v56 = vperm.slane %v1967_v9, %v2692_v13 }
0x10a2   :  { %v1964_v32 = vpop.xlane.xlu1 %1963  ;;  %v1970_v51 = vpop.xlane.xlu2 %1969 }
0x10a3   :  { %v2026_v53 = vperm.slane %v1964_v32, %v2692_v13  ;;  %v2028_v2 = vperm.slane %v1970_v51, %v2692_v13  ;;  %v2358_v51 = vld [vmem:[%s4282_s5 + $0xf8] sm:$0xff] }
0x10a4   :  { %2417 = vmatpush.msra.mxu1 %v2358_v51  ;;  %v2351_v51 = vld [vmem:[%s4282_s5 + $0xc0] sm:$0xff] }
0x10a5   :  { %v2031_v30 = vsel %vm396_vm3, %v2026_v53, %v2025_v7  ;;  %v2357_v53 = vld [vmem:[%s4282_s5 + $0xf0] sm:$0xff] }
0x10a6   :  { %v2032_v17 = vsel %vm398_vm4, %v2027_v56, %v2031_v30  ;;  %2418 = vmatpush.msra.mxu1 %v2357_v53 }
0x10a7   :  { %v2033_v60 = vsel %vm4289_vm5, %v2028_v2, %v2032_v17  ;;  %v2355_v2 = vld [vmem:[%s4282_s5 + $0xe0] sm:$0xff] }
0x10a8   :  { %v2018_v48 = vpop.xlane.xlu0 %2017  ;;  %2419 = vmatpush.msra.mxu1 %v2356_v42 }
0x10a9   :  { %v2052_v18 = vperm.slane %v2018_v48, %v2692_v13  ;;  %v2340_v48 = vld [vmem:[%s4282_s5 + $0x68] sm:$0xff] }
0x10aa   :  { %v1973_v4 = vpop.xlane.xlu1 %1972  ;;  %v1976_v5 = vpop.xlane.xlu2 %1975  ;;  %2420 = vmatpush.msra.mxu1 %v2355_v2 }
0x10ab   :  { %v2029_v6 = vperm.slane %v1973_v4, %v2692_v13  ;;  %v2030_v47 = vperm.slane %v1976_v5, %v2692_v13  ;;  %v2057_v3 = vsel %vm4287_vm7, %v2052_v18, %v2056_v19  ;;  %v2564_v4 = vld [vmem:[%s4277_s0 + $0x20] sm:$0xff]  ;;  %v2565_v19 = vld [vmem:[%s4277_s0 + $0x28] sm:$0xff] }
0x10ac   :  { %v2059_v10 = vmul.f32 %v2057_v3, %v3746_v35  ;;  %v2070_v22 = vmul.f32 %v2069_v27, %v2057_v3  ;;  %v2338_v27 = vld [vmem:[%s4282_s5 + $0x58] sm:$0xff] }
0x10ad   :  { %v2034_v11 = vsel %vm4288_vm6, %v2029_v6, %v2033_v60 }
0x10ae   :  { %v2060_v61 = vsel %vm296_vm2, %v2059_v10, 0.0  ;;  %v2035_v57 = vsel %vm4287_vm7, %v2030_v47, %v2034_v11 }
0x10af   :  { %2061 = vadd.xlane.f32.xlu0 %v2060_v61  ;;  %v2037_v8 = vmul.f32 %v2035_v57, %v3757_v49  ;;  %v2066_v20 = vmul.f32 %v2065_v39, %v2035_v57  ;;  %v2354_v61 = vld [vmem:[%s4282_s5 + $0xd8] sm:$0xff] }
0x10b0   :  { %2421 = vmatpush.msra.mxu1 %v2354_v61 }
0x10b1   :  { %v2038_v13 = vsel %vm296_vm2, %v2037_v8, 0.0  ;;  %v2071_v24 = vsub.f32 %v2066_v20, %v2070_v22  ;;  %v2337_v22 = vld [vmem:[%s4282_s5 + $0x50] sm:$0xff] }
0x10b2   :  { %2039 = vadd.xlane.f32.xlu1 %v2038_v13  ;;  %v2353_v13 = vld [vmem:[%s4282_s5 + $0xd0] sm:$0xff] }
0x10b3   :  { %2422 = vmatpush.msra.mxu1 %v2353_v13 }
0x1122   :  { %v2062_v25 = vpop.xlane.xlu0 %2061 }
0x1123   :  { %v2072_v26 = vmul.f32 %v2067_v46, %v2062_v25 }
0x1125   :  { %v2073_v63 = vadd.f32 %v2072_v26, %v2071_v24  ;;  %v2040_v52 = vpop.xlane.xlu1 %2039 }
0x1126   :  { %v2075_v50 = vmul.f32 %v2074_v23, %v2040_v52 }
0x1128   :  { %v2076_v31 = vsub.f32 %v2073_v63, %v2075_v50 }
0x112a   :  { %vm2077_vm1 = vcmp.lt.f32.partialorder %v2076_v31, 0.0 }
0x112b   :  { %v2534_v29 = vsel %vm2077_vm1, 1.0, %v2602_v15 }
0x112c   :  { %v2080_v36 = vmul.f32 %v3631_v28, %v2534_v29 }
0x112e   :  { %v2082_v37 = vsel %vm296_vm2, %v2080_v36, 0.0  ;;  %v2081_v12 = vsub.f32 %v3631_v28, %v2080_v36 }
0x112f   :  { %2083 = vadd.xlane.f32.xlu2 %v2082_v37 }
0x1130   :  { %v2085_v38 = vsel %vm296_vm2, %v2081_v12, 0.0  ;;  %v2336_v12 = vld [vmem:[%s4282_s5 + $0x48] sm:$0xff] }
0x1131   :  { %2086 = vadd.xlane.f32.xlu0 %v2085_v38  ;;  %v2352_v38 = vld [vmem:[%s4282_s5 + $0xc8] sm:$0xff] }
0x1132   :  { %2423 = vmatpush.msra.mxu1 %v2352_v38 }
0x1134   :  { %2424 = vmatpush.msra.mxu1 %v2351_v51 }
0x11a2   :  { %v2084_v41 = vpop.xlane.xlu2 %2083 }
0x11a4   :  { %v2087_v14 = vpop.xlane.xlu0 %2086 }
0x11a5   :  { %vm2088_vm11 = vcmp.gt.f32.partialorder %v2084_v41, %v2087_v14 }
0x11a6   :  { %v2091_v44 = vsel %vm2088_vm11, %v3746_v35, %v3757_v49  ;;  %v3848_v43 = vsel %vm2088_vm11, %v3808_v54, %v3798_v21  ;;  %v2342_v21 = vld [vmem:[%s4282_s5 + $0x78] sm:$0xff] }
0x11a7   :  { %v2107_v55 = vperm.slane %v2091_v44, 2  ;;  %v2100_v45 = vperm.slane %v2091_v44, 1  ;;  %v2093_v9 = vperm.slane %v2091_v44, 0  ;;  %v2114_v15 = vperm.slane %v2091_v44, 3  ;;  %2397 = vmatpush.msra.mxu0 %v2342_v21  ;;  %v2335_v21 = vld [vmem:[%s4282_s5 + $0x40] sm:$0xff] }
0x11a8   :  { %v2121_v33 = vperm.slane %v2091_v44, 4  ;;  %v2128_v28 = vperm.slane %v2091_v44, 5  ;;  %v3851_v32 = vrot.slane %v3848_v43, 2  ;;  %v3854_v35 = vrot.slane %v3848_v43, 3 }
0x11a9   :  { %2112 = vperm.xlu2 %2540, %v2107_v55   ;;  %2105 = vperm.xlu1 %2539, %v2100_v45   ;;  %v3857_v49 = vrot.slane %v3848_v43, 1  ;;  %2546 = vrcp.f32 %v3848_v43  ;;  %v3878_v54 = vrot.slane %v3848_v43, 4  ;;  %v3883_v46 = vrot.slane %v3848_v43, 5 }
0x11aa   :  { %2098 = vperm.xlu0 %2541, %v2093_v9   ;;  %2548 = vrcp.f32 %v3851_v32  ;;  %2398 = vmatpush.msra.mxu0 %v2341_v62  ;;  %v2274_v18 = vand.u32 2147483648, %v3851_v32  ;;  %v2240_v3 = vand.u32 2147483647, %v3848_v43  ;;  %v2290_v39 = vand.u32 2147483648, %v3854_v35  ;;  %v2329_v9 = vld [vmem:[%s4282_s5 + $0x10] sm:$0xff] }
0x11ab   :  { %2550 = vrcp.f32 %v3854_v35  ;;  %vm2268_vm2 = vweird.f32 %v3851_v32  ;;  %v2272_v8 = vand.u32 2147483647, %v3851_v32  ;;  %vm2236_vm12 = vweird.f32 %v3848_v43 }
0x11ac   :  { %2552 = vrcp.f32 %v3857_v49  ;;  %2399 = vmatpush.msra.mxu0 %v2340_v48  ;;  %v3939_v40 = vor.u32 1.1754944e-38, %v2274_v18  ;;  %vm2284_vm13 = vweird.f32 %v3854_v35  ;;  %v2288_v25 = vand.u32 2147483647, %v3854_v35 }
0x11ad   :  { %2554 = vrcp.f32 %v3878_v54  ;;  %v2258_v26 = vand.u32 2147483648, %v3857_v49  ;;  %v2242_v23 = vand.u32 2147483648, %v3848_v43  ;;  %vm2252_vm14 = vweird.f32 %v3857_v49 }
0x11ae   :  { %2556 = vrcp.f32 %v3883_v46  ;;  %2400 = vmatpush.msra.mxu0 %v2339_v0  ;;  %v2256_v50 = vand.u32 2147483647, %v3857_v49  ;;  %v3950_v37 = vor.u32 1.1754944e-38, %v2290_v39  ;;  %vm3960_vm0 = vcmp.eq.f32.partialorder %v2240_v3, 8.507059e+37  ;;  %v2567_v0 = vld [vmem:[%s4277_s0 + $0x38] sm:$0xff]  ;;  %v2349_v3 = vld [vmem:[%s4282_s5 + $0xb0] sm:$0xff] }
0x11af   :  { %v3872_v1 = vpop.eup %2546  ;;  %vm3969_vm9 = vcmp.eq.f32.partialorder %v2272_v8, 8.507059e+37  ;;  %vm3973_vm10 = vcmp.eq.f32.partialorder %v2288_v25, 8.507059e+37  ;;  %v2304_v61 = vand.u32 2147483647, %v3878_v54 }
0x11b0   :  { %v3880_v7 = vpop.eup %2548  ;;  %v2232_v30 = vmul.f32 %v3872_v1, %v3848_v43  ;;  %2401 = vmatpush.msra.mxu0 %v2338_v27  ;;  %vm2237_vm15 = vweird.f32 %v3872_v1  ;;  %vm3993_vm11 = vcmp.eq.f32.partialorder %v2256_v50, 8.507059e+37  ;;  %v2568_v43 = vld [vmem:[%s4277_s0 + $0x50] sm:$0xff]  ;;  %v2331_v50 = vld [vmem:[%s4282_s5 + $0x20] sm:$0xff] }
0x11b1   :  { %2119 = vperm.xlu2 %2540, %v2114_v15   ;;  %2126 = vperm.xlu1 %2539, %v2121_v33   ;;  %v3885_v59 = vpop.eup %2550  ;;  %v2264_v16 = vmul.f32 %v3880_v7, %v3851_v32  ;;  %vm2269_vm8 = vweird.f32 %v3880_v7  ;;  %v3977_v15 = vor.u32 1.1754944e-38, %v2258_v26  ;;  %v3979_v33 = vor.u32 1.1754944e-38, %v2242_v23  ;;  %vm4021_vm6 = vmor %vm2236_vm12, %vm2237_vm15  ;;  %v2332_v32 = vld [vmem:[%s4282_s5 + $0x28] sm:$0xff] }
0x11b2   :  { %v3887_v34 = vpop.eup %2552  ;;  %v2280_v56 = vmul.f32 %v3885_v59, %v3854_v35  ;;  %v2233_v47 = vsub.f32 1.0, %v2232_v30  ;;  %2402 = vmatpush.msra.mxu0 %v2337_v22  ;;  %vm2285_vm1 = vweird.f32 %v3885_v59  ;;  %vm4032_vm5 = vmor %vm2268_vm2, %vm2269_vm8  ;;  %v2348_v26 = vld [vmem:[%s4282_s5 + $0xa8] sm:$0xff]  ;;  %vm2316_vm12 = vweird.f32 %v3883_v46 }
0x11b3   :  { %v2248_v17 = vmul.f32 %v3887_v34, %v3857_v49  ;;  %v2265_v60 = vsub.f32 1.0, %v2264_v16  ;;  %v3926_v57 = vpop.eup %2554  ;;  %v2334_v16 = vld [vmem:[%s4282_s5 + $0x38] sm:$0xff]  ;;  %vm2253_vm7 = vweird.f32 %v3887_v34  ;;  %vm4054_vm2 = vmor %vm2284_vm13, %vm2285_vm1  ;;  %v2347_v49 = vld [vmem:[%s4282_s5 + $0xa0] sm:$0xff] }
0x11b4   :  { %v2281_v10 = vsub.f32 1.0, %v2280_v56  ;;  %v3937_v24 = vpop.eup %2556  ;;  %v2234_v31 = vmul.f32 %v3872_v1, %v2233_v47  ;;  %v2296_v44 = vmul.f32 %v3926_v57, %v3878_v54  ;;  %2403 = vmatpush.msra.mxu0 %v2336_v12  ;;  %v2350_v56 = vld [vmem:[%s4282_s5 + $0xb8] sm:$0xff]  ;;  %v2448_v12 = vld [vmem:[%s4284_s7 + $0x50] sm:$0xff]  ;;  %vm2301_vm13 = vweird.f32 %v3926_v57 }
0x11b5   :  { %v2249_v20 = vsub.f32 1.0, %v2248_v17  ;;  %v2266_v29 = vmul.f32 %v3880_v7, %v2265_v60  ;;  %v2312_v55 = vmul.f32 %v3937_v24, %v3883_v46  ;;  %v2566_v17 = vld [vmem:[%s4277_s0 + $0x30] sm:$0xff]  ;;  %2425 = vmatpush.msra.mxu1 %v2350_v56 }
0x11b6   :  { %v2282_v36 = vmul.f32 %v3885_v59, %v2281_v10  ;;  %v2235_v30 = vadd.f32 %v3872_v1, %v2234_v31  ;;  %2404 = vmatpush.msra.mxu0 %v2335_v21  ;;  %v2297_v47 = vsub.f32 1.0, %v2296_v44  ;;  %v2330_v44 = vld [vmem:[%s4282_s5 + $0x18] sm:$0xff] }
0x11b7   :  { %v2250_v41 = vmul.f32 %v3887_v34, %v2249_v20  ;;  %v2267_v48 = vadd.f32 %v3880_v7, %v2266_v29  ;;  %v2313_v60 = vsub.f32 1.0, %v2312_v55  ;;  %2426 = vmatpush.msra.mxu1 %v2349_v3  ;;  %v2320_v29 = vand.u32 2147483647, %v3883_v46 }
0x11b8   :  { %v2283_v42 = vadd.f32 %v3885_v59, %v2282_v36  ;;  %2405 = vmatpush.msra.mxu0 %v2334_v16  ;;  %v2239_v25 = vsel %vm4021_vm6, %v3872_v1, %v2235_v30  ;;  %vm4075_vm6 = vmor %vm2252_vm14, %vm2253_vm7  ;;  %v2449_v36 = vld [vmem:[%s4284_s7 + $0x58] sm:$0xff]  ;;  %v2322_v55 = vand.u32 2147483648, %v3883_v46  ;;  %vm2300_vm14 = vweird.f32 %v3878_v54 }
0x11b9   :  { %2133 = vperm.xlu2 %2540, %v2128_v28   ;;  %v2306_v28 = vand.u32 2147483648, %v3878_v54  ;;  %v2271_v23 = vsel %vm4032_vm5, %v3880_v7, %v2267_v48  ;;  %v2314_v31 = vmul.f32 %v3937_v24, %v2313_v60  ;;  %2427 = vmatpush.msra.mxu1 %v2348_v26  ;;  %vm2317_vm5 = vweird.f32 %v3937_v24  ;;  %vm2302_vm8 = vmor %vm2300_vm14, %vm2301_vm13 }
0x11ba   :  { %v2287_v35 = vsel %vm4054_vm2, %v3885_v59, %v2283_v42  ;;  %v2298_v59 = vmul.f32 %v3926_v57, %v2297_v47  ;;  %2462 = vmatpush.msrb.mxu2 %v2449_v36  ;;  %v2345_v42 = vld [vmem:[%s4282_s5 + $0x90] sm:$0xff]  ;;  %v2446_v47 = vld [vmem:[%s4284_s7 + $0x40] sm:$0xff]  ;;  %vm4170_vm7 = vmor %vm2316_vm12, %vm2317_vm5  ;;  %vm4202_vm15 = vcmp.eq.f32.partialorder %v2320_v29, 8.507059e+37  ;;  %vm2497_vm12 = vcmask 21504  }
0x11bb   :  { %v4043_v8 = vor.u32 1.1754944e-38, %v2306_v28  ;;  %v4109_v28 = vsel %vm3969_vm9, %v3939_v40, %v2271_v23  ;;  %v4116_v14 = vsel %vm3973_vm10, %v3950_v37, %v2287_v35  ;;  %2428 = vmatpush.msra.mxu1 %v2347_v49  ;;  %v2447_v37 = vld [vmem:[%s4284_s7 + $0x48] sm:$0xff]  ;;  %v2343_v35 = vld [vmem:[%s4282_s5 + $0x80] sm:$0xff]  ;;  %v2444_v49 = vld [vmem:[%s4284_s7 + $0x30] sm:$0xff]  ;;  %vm4314_vm10 = vcmask 1044484  }
0x11bc   :  { %2463 = vmatpush.msrb.mxu2 %v2448_v12  ;;  %v4140_v48 = vadd.f32 %v3926_v57, %v2298_v59  ;;  %vm4315_vm1 = vmmov %vm4314_vm10 }
0x11be   :  { %2464 = vmatpush.msrb.mxu2 %v2447_v37 }
0x11c0   :  { %2465 = vmatpush.msrb.mxu2 %v2446_v47 }
0x1203   :  { %v2113_v58 = vpop.permute.xlu2 %2112 }
0x1204   :  { %v2139_v5 = vmul.f32 %v2564_v4, %v2113_v58  ;;  %v2140_v6 = vmul.f32 %v2565_v19, %v2113_v58  ;;  %v2251_v19 = vadd.f32 %v3887_v34, %v2250_v41  ;;  %v4100_v41 = vsel %vm3960_vm0, %v3979_v33, %v2239_v25  ;;  %v2346_v33 = vld [vmem:[%s4282_s5 + $0x98] sm:$0xff] }
0x1205   :  { %2429 = vmatpush.msra.mxu1 %v2346_v33  ;;  %v2445_v25 = vld [vmem:[%s4284_s7 + $0x38] sm:$0xff]  ;;  %vm4211_vm0 = vcmp.eq.f32.partialorder %v2304_v61, 8.507059e+37 }
0x1206   :  { %v2171_v63 = vrot.slane %v2139_v5, 4  ;;  %v2177_v52 = vrot.slane %v2140_v6, 4  ;;  %v2255_v7 = vsel %vm4075_vm6, %v3887_v34, %v2251_v19  ;;  %2466 = vmatpush.msrb.mxu2 %v2445_v25  ;;  %vm2505_vm6 = vcmask 16384  }
0x1207   :  { %v4124_v40 = vsel %vm3993_vm11, %v3977_v15, %v2255_v7  ;;  %v2571_v15 = vld [vmem:[%s4277_s0 + $0x18] sm:$0xff]  ;;  %2430 = vmatpush.msra.mxu1 %v2345_v42  ;;  %vm4316_vm11 = vcmask 1045509  }
0x1208   :  { %v3988_v62 = vadd.f32 %v2171_v63, %v2139_v5  ;;  %v3990_v53 = vadd.f32 %v2177_v52, %v2140_v6  ;;  %v2333_v5 = vld [vmem:[%s4282_s5 + $0x30] sm:$0xff]  ;;  %v2328_v6 = vld [vmem:[%s4282_s5 + $0x8] sm:$0xff]  ;;  %2467 = vmatpush.msrb.mxu2 %v2444_v49  ;;  %vm4317_vm2 = vmmov %vm4316_vm11 }
0x1209   :  { %2406 = vmatpush.msra.mxu0 %v2333_v5  ;;  %v2573_v5 = vld [vmem:[%s4277_s0 + $0x8] sm:$0xff] }
0x120a   :  { %v2173_v20 = vrot.slane %v3988_v62, 2  ;;  %v2179_v22 = vrot.slane %v3990_v53, 2 }
0x120b   :  { %v2120_v11 = vpop.permute.xlu2 %2119  ;;  %2407 = vmatpush.msra.mxu0 %v2332_v32 }
0x120c   :  { %v2141_v18 = vmul.f32 %v2566_v17, %v2120_v11  ;;  %v2142_v2 = vmul.f32 %v2567_v0, %v2120_v11  ;;  %v2569_v11 = vld [vmem:[%s4277_s0 + $0x58] sm:$0xff]  ;;  %v2174_v21 = vadd.f32 %v2173_v20, %v3988_v62  ;;  %v2180_v51 = vadd.f32 %v2179_v22, %v3990_v53  ;;  %v2570_v62 = vld [vmem:[%s4277_s0 + $0x10] sm:$0xff]  ;;  %v2327_v22 = vld [vmem:[%s4282_s5] sm:$0xff] }
0x120d   :  { %2408 = vmatpush.msra.mxu0 %v2331_v50  ;;  %v4146_v17 = vadd.f32 %v3937_v24, %v2314_v31 }
0x120e   :  { %v2183_v63 = vrot.slane %v2141_v18, 4  ;;  %v2189_v52 = vrot.slane %v2142_v2, 4  ;;  %v2175_v3 = vrot.slane %v2174_v21, 1  ;;  %v2181_v60 = vrot.slane %v2180_v51, 1 }
0x120f   :  { %2409 = vmatpush.msra.mxu0 %v2330_v44 }
0x1210   :  { %v2184_v30 = vadd.f32 %v2183_v63, %v2141_v18  ;;  %v2190_v16 = vadd.f32 %v2189_v52, %v2142_v2  ;;  %v2572_v2 = vld [vmem:[%s4277_s0] sm:$0xff]  ;;  %v2319_v63 = vsel %vm4170_vm7, %v3937_v24, %v4146_v17  ;;  %v4184_v52 = vor.u32 1.1754944e-38, %v2322_v55 }
0x1211   :  { %2410 = vmatpush.msra.mxu0 %v2329_v9  ;;  %v2176_v31 = vadd.f32 %v2175_v3, %v2174_v21  ;;  %v2182_v36 = vadd.f32 %v2181_v60, %v2180_v51  ;;  %v2443_v9 = vld [vmem:[%s4284_s7 + $0x28] sm:$0xff]  ;;  %v2574_v21 = vld [vmem:[%s4277_s0 + $0x40] sm:$0xff] }
0x1212   :  { %2468 = vmatpush.msrb.mxu2 %v2443_v9 }
0x1213   :  { %v2134_v4 = vpop.permute.xlu2 %2133  ;;  %2411 = vmatpush.msra.mxu0 %v2328_v6  ;;  %v2278_v61 = vmul.f32 %v4109_v28, %v2182_v36  ;;  %v2324_v36 = vsel %vm4202_vm15, %v4184_v52, %v2319_v63 }
0x1214   :  { %v2145_v39 = vmul.f32 %v2568_v43, %v2134_v4  ;;  %v2146_v27 = vmul.f32 %v2569_v11, %v2134_v4  ;;  %v2185_v11 = vrot.slane %v2184_v30, 2 }
0x1215   :  { %2412 = vmatpush.msra.mxu0 %v2327_v22 }
0x1216   :  { %v2207_v34 = vrot.slane %v2145_v39, 4  ;;  %v2213_v38 = vrot.slane %v2146_v27, 4 }
0x1218   :  { %v2208_v18 = vadd.f32 %v2207_v34, %v2145_v39  ;;  %v2214_v0 = vadd.f32 %v2213_v38, %v2146_v27  ;;  %v2344_v39 = vld [vmem:[%s4282_s5 + $0x88] sm:$0xff]  ;;  %v2191_v27 = vrot.slane %v2190_v16, 2  ;;  %v2186_v38 = vadd.f32 %v2185_v11, %v2184_v30 }
0x1219   :  { %2431 = vmatpush.msra.mxu1 %v2344_v39  ;;  %v2575_v30 = vld [vmem:[%s4277_s0 + $0x48] sm:$0xff] }
0x121a   :  { %v2209_v1 = vrot.slane %v2208_v18, 2  ;;  %v2215_v50 = vrot.slane %v2214_v0, 2  ;;  %v2192_v44 = vadd.f32 %v2191_v27, %v2190_v16  ;;  %v2187_v47 = vrot.slane %v2186_v38, 1 }
0x121b   :  { %v2106_v45 = vpop.permute.xlu1 %2105  ;;  %2432 = vmatpush.msra.mxu1 %v2343_v35 }
0x121c   :  { %v2137_v53 = vmul.f32 %v2570_v62, %v2106_v45  ;;  %v2138_v58 = vmul.f32 %v2571_v15, %v2106_v45  ;;  %v2099_v56 = vpop.permute.xlu0 %2098  ;;  %v2216_v15 = vadd.f32 %v2215_v50, %v2214_v0  ;;  %v2188_v35 = vadd.f32 %v2187_v47, %v2186_v38 }
0x121d   :  { %v2135_v4 = vmul.f32 %v2572_v2, %v2099_v56  ;;  %v2136_v19 = vmul.f32 %v2573_v5, %v2099_v56  ;;  %v2442_v2 = vld [vmem:[%s4284_s7 + $0x20] sm:$0xff]  ;;  %v2603_v47 = vmov 0  }
0x121e   :  { %v2159_v10 = vrot.slane %v2137_v53, 4  ;;  %v2165_v43 = vrot.slane %v2138_v58, 4  ;;  %2469 = vmatpush.msrb.mxu2 %v2442_v2  ;;  %v2217_v11 = vrot.slane %v2216_v15, 1  ;;  %2542 = vset.pattern.permute.xlu1 %v2603_v47 }
0x121f   :  { %v2147_v32 = vrot.slane %v2135_v4, 4  ;;  %v2153_v20 = vrot.slane %v2136_v19, 4  ;;  %2543 = vset.pattern.permute.xlu0 %v2603_v47 }
0x1220   :  { %v2160_v26 = vadd.f32 %v2159_v10, %v2137_v53  ;;  %v2166_v23 = vadd.f32 %v2165_v43, %v2138_v58  ;;  %v2210_v53 = vadd.f32 %v2209_v1, %v2208_v18  ;;  %v2193_v18 = vrot.slane %v2192_v44, 1 }
0x1221   :  { %v2148_v7 = vadd.f32 %v2147_v32, %v2135_v4  ;;  %v2154_v59 = vadd.f32 %v2153_v20, %v2136_v19 }
0x1222   :  { %v2161_v12 = vrot.slane %v2160_v26, 2  ;;  %v2167_v34 = vrot.slane %v2166_v23, 2  ;;  %v2211_v39 = vrot.slane %v2210_v53, 1  ;;  %v2194_v1 = vadd.f32 %v2193_v18, %v2192_v44  ;;  %v2438_v18 = vld [vmem:[%s4284_s7] sm:$0xff] }
0x1223   :  { %v2149_v55 = vrot.slane %v2148_v7, 2  ;;  %v2155_v33 = vrot.slane %v2154_v59, 2  ;;  %v2127_v45 = vpop.permute.xlu1 %2126 }
0x1224   :  { %v2162_v37 = vadd.f32 %v2161_v12, %v2160_v26  ;;  %v2168_v62 = vadd.f32 %v2167_v34, %v2166_v23  ;;  %v2143_v51 = vmul.f32 %v2574_v21, %v2127_v45  ;;  %v2144_v16 = vmul.f32 %v2575_v30, %v2127_v45 }
0x1225   :  { %v2150_v58 = vadd.f32 %v2149_v55, %v2148_v7  ;;  %v2156_v56 = vadd.f32 %v2155_v33, %v2154_v59  ;;  %v2277_v23 = vmul.f32 %v4109_v28, %v2176_v31  ;;  %v2212_v12 = vadd.f32 %v2211_v39, %v2210_v53 }
0x1226   :  { %v2163_v4 = vrot.slane %v2162_v37, 1  ;;  %v2169_v5 = vrot.slane %v2168_v62, 1  ;;  %v2195_v19 = vrot.slane %v2143_v51, 4  ;;  %v2201_v6 = vrot.slane %v2144_v16, 4 }
0x1227   :  { %v2151_v0 = vrot.slane %v2150_v58, 1  ;;  %v2157_v3 = vrot.slane %v2156_v56, 1  ;;  %v2218_v34 = vadd.f32 %v2217_v11, %v2216_v15  ;;  %v2303_v28 = vsel %vm2302_vm8, %v3926_v57, %v4140_v48 }
0x1228   :  { %v2164_v60 = vadd.f32 %v2163_v4, %v2162_v37  ;;  %v2170_v10 = vadd.f32 %v2169_v5, %v2168_v62  ;;  %v2196_v29 = vadd.f32 %v2195_v19, %v2143_v51  ;;  %v2202_v43 = vadd.f32 %v2201_v6, %v2144_v16  ;;  %v2441_v4 = vld [vmem:[%s4284_s7 + $0x18] sm:$0xff]  ;;  %v2440_v5 = vld [vmem:[%s4284_s7 + $0x10] sm:$0xff]  ;;  %v2439_v19 = vld [vmem:[%s4284_s7 + $0x8] sm:$0xff] }
0x1229   :  { %v2152_v27 = vadd.f32 %v2151_v0, %v2150_v58  ;;  %v2158_v32 = vadd.f32 %v2157_v3, %v2156_v56  ;;  %v2294_v38 = vmul.f32 %v4116_v14, %v2194_v1  ;;  %v2377_v57 = vrot.slane %v2277_v23, 6  ;;  %2470 = vmatpush.msrb.mxu2 %v2441_v4  ;;  %v2478_v6 = vld [vmem:[%s4280_s3] sm:$0x3f] }
0x122a   :  { %v2261_v20 = vmul.f32 %v4124_v40, %v2164_v60  ;;  %v2262_v22 = vmul.f32 %v4124_v40, %v2170_v10  ;;  %v2197_v25 = vrot.slane %v2196_v29, 2  ;;  %v2203_v26 = vrot.slane %v2202_v43, 2  ;;  %2482 = vperm.xlu1 %2542, %v2478_v6   ;;  %v2544_v0 = vld [vmem:[%s4283_s6] ss:$0 sm:$0xff] }
0x122b   :  { %v2245_v55 = vmul.f32 %v4100_v41, %v2152_v27  ;;  %v2246_v33 = vmul.f32 %v4100_v41, %v2158_v32  ;;  %v2293_v41 = vmul.f32 %v4116_v14, %v2188_v35  ;;  %v2387_v48 = vrot.slane %v2278_v61, 6  ;;  %2471 = vmatpush.msrb.mxu2 %v2440_v5 }
0x122c   :  { %v2375_v50 = vrot.slane %v2261_v20, 7  ;;  %v2385_v7 = vrot.slane %v2262_v22, 7  ;;  %v2198_v59 = vadd.f32 %v2197_v25, %v2196_v29  ;;  %v2204_v49 = vadd.f32 %v2203_v26, %v2202_v43  ;;  %v2545_v43 = vld [vmem:[%s4285_s8] ss:$0 sm:$0xff]  ;;  %s2604_s8 = smov [#allocation2]  }
0x122d   :  { %v2308_v24 = vsel %vm4211_vm0, %v4043_v8, %v2303_v28  ;;  %v2325_v17 = vmul.f32 %v2324_v36, %v2212_v12  ;;  %v2326_v13 = vmul.f32 %v2324_v36, %v2218_v34  ;;  %v2379_v62 = vrot.slane %v2293_v41, 5  ;;  %2472 = vmatpush.msrb.mxu2 %v2439_v19  ;;  %s2512_s1 = sshll.u32 %s2604_s8, 4  ;;  %s2513_s1 = int_to_ptr.vmem [resolvable:$true] %s2512_s1 }
0x122e   :  { %v2199_v40 = vrot.slane %v2198_v59, 1  ;;  %v2205_v31 = vrot.slane %v2204_v49, 1  ;;  %v2376_v54 = vsel %vm396_vm3, %v2375_v50, %v2245_v55  ;;  %v2386_v44 = vsel %vm396_vm3, %v2385_v7, %v2246_v33  ;;  %v2495_v7 = vld [vmem:[%s4281_s4] sm:$0x3f] }
0x122f   :  { %v2378_v52 = vsel %vm398_vm4, %v2377_v57, %v2376_v54  ;;  %v2388_v14 = vsel %vm398_vm4, %v2387_v48, %v2386_v44  ;;  %v2389_v21 = vrot.slane %v2294_v38, 5  ;;  %vm4312_vm3 = vcmask 1043459   ;;  %2473 = vmatpush.msrb.mxu2 %v2438_v18 }
0x1230   :  { %v2200_v45 = vadd.f32 %v2199_v40, %v2198_v59  ;;  %v2206_v9 = vadd.f32 %v2205_v31, %v2204_v49  ;;  %v2380_v16 = vsel %vm4312_vm3, %v2379_v62, %v2378_v52  ;;  %v2383_v53 = vrot.slane %v2325_v17, 3  ;;  %vm4313_vm9 = vmmov %vm4312_vm3 }
0x1231   :  { %v2390_v15 = vsel %vm4313_vm9, %v2389_v21, %v2388_v14  ;;  %v2393_v58 = vrot.slane %v2326_v13, 3  ;;  %vm2454_vm4 = vcmask 785408  }
0x1232   :  { %v2309_v37 = vmul.f32 %v2308_v24, %v2200_v45  ;;  %v2310_v63 = vmul.f32 %v2308_v24, %v2206_v9 }
0x1234   :  { %v2381_v51 = vrot.slane %v2309_v37, 4  ;;  %v2391_v30 = vrot.slane %v2310_v63, 4 }
0x1236   :  { %v2382_v8 = vsel %vm4314_vm10, %v2381_v51, %v2380_v16  ;;  %v2392_v56 = vsel %vm4315_vm1, %v2391_v30, %v2390_v15 }
0x1237   :  { %v2384_v42 = vsel %vm4316_vm11, %v2383_v53, %v2382_v8  ;;  %v2394_v2 = vsel %vm4317_vm2, %v2393_v58, %v2392_v56 }
0x1238   :  { %2413 = vmatmul.f32.vlgmr.msra.gmra.mxu0 %v2384_v42  ;;  %2433 = vmatmul.f32.vlgmr.msra.gmra.mxu1 %v2394_v2 }
0x129c   :  { %v2483_v26 = vpop.permute.xlu1 %2482 }
0x12b5   :  { %v2414_v3 = vpop.f32.mrf.mxu0  ;;  %v2434_v10 = vpop.f32.mrf.mxu1 }
0x12b6   :  { %v2415_v60 = vadd.f32 %v2544_v0, %v2414_v3 }
0x12b8   :  { %v2435_v46 = vadd.f32 %v2434_v10, %v2415_v60 }
0x12ba   :  { %v2437_v29 = vmax.f32 %v2435_v46, 0.0 }
0x12bc   :  { %2535 = vmatmul.msk.f32.vlgmr.msrb.gmra.mxu2 %vm2454_vm4, %v2437_v29 }
0x133f   :  { %v2475_v39 = vpop.f32.mrf.mxu2 }
0x1340   :  { %v2476_v11 = vadd.f32 %v2545_v43, %v2475_v39 }
0x1342   :  { %v2487_v27 = vand.u32 2147483647, %v2476_v11  ;;  %v2479_v23 = vmax.f32 %v2476_v11, 0.0  ;;  %v2485_v61 = vmul.f32 %v2483_v26, %v2476_v11 }
0x1344   :  { %v2488_v32 = vsub.f32 0.0, %v2487_v27  ;;  %v2486_v1 = vsub.f32 %v2479_v23, %v2485_v61 }
0x1346   :  { %v2489_v20 = vmul.f32 1.442695, %v2488_v32 }
0x1348   :  { %2558 = vpow2.f32 %v2489_v20 }
0x134e   :  { %v2559_v22 = vpop.eup %2558 }
0x134f   :  { %v2491_v25 = vadd.f32 1.0, %v2559_v22 }
0x1351   :  { %2560 = vlog2.f32 %v2491_v25 }
0x1357   :  { %v2561_v35 = vpop.eup %2560 }
0x1358   :  { %v2493_v50 = vmul.f32 0.6931472, %v2561_v35 }
0x135a   :  { %v2494_v59 = vadd.f32 %v2493_v50, %v2486_v1 }
0x135c   :  { %v2496_v49 = vmul.f32 %v2495_v7, %v2494_v59 }
0x135e   :  { %v2498_v12 = vsel %vm2497_vm12, %v2496_v49, 0.0 }
0x135f   :  { %v2499_v34 = vrot.slane %v2498_v12, 4 }
0x1361   :  { %v2500_v55 = vadd.f32 %v2499_v34, %v2498_v12 }
0x1363   :  { %v2501_v33 = vrot.slane %v2500_v55, 2 }
0x1365   :  { %v2502_v28 = vadd.f32 %v2501_v33, %v2500_v55 }
0x1367   :  { %v2503_v40 = vrot.slane %v2502_v28, 1 }
0x1369   :  { %v2504_v31 = vadd.f32 %v2503_v40, %v2502_v28 }
0x136b   :  { %2506 = vst.msk [vmem:[#allocation2] sm:$0x1] %vm2505_vm6, %v2504_v31 }
0x136c   :  { %2517 = dma.vmem_to_hbm [thread:$0]  %s2513_s1, 16, %s2515_s21, [#allocation3]  }
0x136d   :  { %2600 = dma.done.wait [#allocation3], 16  }
0x136e   :  { %2601 = vsyncadd [#allocation3], 4294967280 }
0x136f   :  { %2522 = vsyncpa [#allocation3], 1 }

</bundles_post_ra>
